<compile_context>
chip_gen: v5e
topology: v5e:2x2
jax: 0.10.0
libtpu: 0.0.40
codegen_flags: <defaults>
</compile_context>

<pallas_src>
import jax
import jax.numpy as jnp
from jax.experimental import pallas as pl
from jax.experimental.pallas import tpu as pltpu

_KSIZE = 5
_STRIDE = 2
_LN_EPS = 1e-6
# MXU operand dtype for all dots (accumulation stays f32).
_MM_DTYPE = jnp.bfloat16


def _erf_f32(x):
    # Abramowitz & Stegun 7.1.26 rational approximation of erf, |err| < 1.5e-7
    # (float32) -- used for the exact (erf-based) nn.GELU(); stays on plain
    # VPU/EUP ops (lax.erf lowering is not guaranteed in Mosaic).
    a1, a2, a3, a4, a5 = (0.254829592, -0.284496736, 1.421413741,
                          -1.453152027, 1.061405429)
    p = 0.3275911
    ax = jnp.abs(x)
    t = 1.0 / (1.0 + p * ax)
    poly = ((((a5 * t + a4) * t + a3) * t + a2) * t + a1) * t
    y = 1.0 - poly * jnp.exp(-ax * ax)
    return jnp.where(x < 0.0, -y, y)


def _convnet_block_kernel(x_ref, wrow_ref, onehot_ref, consts_ref,
                          w1_ref, b1_ref, w2_ref, o_ref):
    # x_ref block: (BN, F) -- BN batch rows, lane-dense flat NCDHW data.
    x = x_ref[...]
    F = x.shape[-1]
    C = w2_ref.shape[1]
    DHW = F // C

    # ---- depthwise Conv3d(k=5, s=2, p=0, groups=C), 1x1x1 output:
    #      h[n,c] = sum_r x[n,r] * w_row[r] * [channel(r) == c]
    #      -> elementwise weight multiply (f32) + one bf16 MXU dot against the
    #      compile-time-constant 0/1 channel-membership matrix. ----
    xw = (x * wrow_ref[...]).astype(_MM_DTYPE)                       # (BN, F)
    h = jnp.dot(xw, onehot_ref[...],
                preferred_element_type=jnp.float32)                  # (BN, C)

    dwb = consts_ref[0:1, :]
    ln_g = consts_ref[1:2, :]
    ln_b = consts_ref[2:3, :]
    b2 = consts_ref[3:4, :]
    h = h + dwb

    # ---- LayerNorm over channels (biased variance, eps=1e-6, affine) ----
    mean = jnp.mean(h, axis=-1, keepdims=True)
    var = jnp.mean(jnp.square(h - mean), axis=-1, keepdims=True)
    h = (h - mean) * jax.lax.rsqrt(var + _LN_EPS)
    h = h * ln_g + ln_b

    # ---- pwconv1: Linear(C -> 4C) + exact GELU (bf16 MXU, f32 accumulate) ----
    g = jnp.dot(h.astype(_MM_DTYPE), w1_ref[...],
                preferred_element_type=jnp.float32) + b1_ref[...]
    g = 0.5 * g * (1.0 + _erf_f32(g * 0.7071067811865476))

    # ---- pwconv2: Linear(4C -> C) + nonlinearity(x) = x * sigmoid(x) ----
    y = jnp.dot(g.astype(_MM_DTYPE), w2_ref[...],
                preferred_element_type=jnp.float32) + b2
    y = y * jax.nn.sigmoid(y)

    # ---- Dropout(p=0) == identity. Spatial broadcast of the residual branch
    #      via a 0/1 (C, F) matrix generated in-kernel (parameter-independent,
    #      lane-dense iota range compares -> no HBM read, unmasked stores,
    #      no in-kernel relayout of the big tensors). ----
    c_iota = jax.lax.broadcasted_iota(jnp.int32, (C, F), 0)
    r_iota = jax.lax.broadcasted_iota(jnp.int32, (C, F), 1)
    lo = c_iota * DHW
    bcast = jnp.where((r_iota >= lo) & (r_iota < lo + DHW),
                      1.0, 0.0).astype(_MM_DTYPE)                    # (C, F)
    y_rep = jnp.dot(y.astype(_MM_DTYPE), bcast,
                    preferred_element_type=jnp.float32)              # (BN, F)

    o_ref[...] = (x + y_rep).astype(o_ref.dtype)


def convnet_block_forward(x_ncdhw, params):
    N, C, D, Hs, Ws = x_ncdhw.shape
    OD = (D - _KSIZE) // _STRIDE + 1
    OH = (Hs - _KSIZE) // _STRIDE + 1
    OW = (Ws - _KSIZE) // _STRIDE + 1
    # The PyTorch module's `x + h` only broadcasts when the dwconv output is
    # exactly 1x1x1 (h is (N, C, 1, 1, 1)); this also lets the conv collapse
    # to a single matmul below.
    assert OD == 1 and OH == 1 and OW == 1, "residual add needs 1x1x1 dwconv output"

    DHW = D * Hs * Ws
    F = C * DHW
    dtype = x_ncdhw.dtype
    x_flat = x_ncdhw.reshape(N, F)            # row-major view -- no transpose

    # Tiny parameter-dependent operand: zero-padded, flattened depthwise
    # weight applied elementwise in-kernel (the big block-sparse (F, C) weight
    # is never materialized per call any more).
    w_pad = jnp.zeros((C, D, Hs, Ws), jnp.float32).at[
        :, :_KSIZE, :_KSIZE, :_KSIZE].set(params["dw_w"].astype(jnp.float32))
    w_row = w_pad.reshape(1, F)                                       # 27 KiB

    # Parameter-independent 0/1 channel-membership matrix: constant-folded by
    # XLA at compile time; stored/read as bf16 (exact for 0/1 values).
    ch = jnp.arange(F, dtype=jnp.int32) // DHW
    onehot = (ch[:, None] == jnp.arange(C, dtype=jnp.int32)[None, :]
              ).astype(_MM_DTYPE)                                     # (F, C)

    # dw bias | LN gamma | LN beta | pwconv2 bias as (4, C): rows are selected
    # by sublane index in-kernel.
    consts = jnp.stack([params["dw_b"], params["ln_g"],
                        params["ln_b"], params["b2"]]).astype(jnp.float32)

    w1 = params["w1"].astype(_MM_DTYPE)                      # (C, 4C)
    b1 = params["b1"].astype(jnp.float32).reshape(1, 4 * C)  # (1, 4C)
    w2 = params["w2"].astype(_MM_DTYPE)                      # (4C, C)

    # Batch-split only across real TensorCores: 2 on v7x (megacore sharding
    # with "parallel"), 1 on single-TC v5e/v6e where an extra grid step is a
    # serial loop that only adds overhead and halves MXU weight-tile reuse.
    try:
        kind = jax.devices()[0].device_kind.lower()
    except Exception:
        kind = ""
    num_tc = 2 if ("v7" in kind or "7x" in kind) else 1
    nb = num_tc if (num_tc > 1 and N % (8 * num_tc) == 0) else 1
    BN = N // nb

    def _const2d(shape):
        return pl.BlockSpec(shape, lambda i: (0, 0))

    out_flat = pl.pallas_call(
        _convnet_block_kernel,
        out_shape=jax.ShapeDtypeStruct((N, F), dtype),
        grid_spec=pltpu.PrefetchScalarGridSpec(
            num_scalar_prefetch=0,
            grid=(nb,),
            in_specs=[
                pl.BlockSpec((BN, F), lambda i: (i, 0)),   # x, lane-dense flat
                _const2d((1, F)),                          # w_row (dw weight)
                _const2d((F, C)),                          # 0/1 onehot (bf16)
                _const2d((4, C)),                          # dwb|ln_g|ln_b|b2
                _const2d((C, 4 * C)),                      # pwconv1 weight^T
                _const2d((1, 4 * C)),                      # pwconv1 bias
                _const2d((4 * C, C)),                      # pwconv2 weight^T
            ],
            out_specs=pl.BlockSpec((BN, F), lambda i: (i, 0)),
        ),
        compiler_params=pltpu.CompilerParams(
            dimension_semantics=("parallel",),
            vmem_limit_bytes=32 * 1024 * 1024,   # ~6 MiB used; safe v5e..v7x
        ),
    )(x_flat, w_row, onehot, consts, w1, b1, w2)

    return out_flat.reshape(N, C, D, Hs, Ws)


def _reference_forward(x, params):
    # Pure-JAX f32 reference of the PyTorch forward (dwconv output is 1x1x1).
    win = x[:, :, :_KSIZE, :_KSIZE, :_KSIZE]
    h = jnp.einsum("ncdhw,cdhw->nc", win, params["dw_w"]) + params["dw_b"]
    mean = h.mean(-1, keepdims=True)
    var = ((h - mean) ** 2).mean(-1, keepdims=True)
    h = (h - mean) / jnp.sqrt(var + _LN_EPS) * params["ln_g"] + params["ln_b"]
    h = h @ params["w1"] + params["b1"]
    h = 0.5 * h * (1.0 + jax.scipy.special.erf(h / jnp.sqrt(2.0)))
    h = h @ params["w2"] + params["b2"]
    h = h * jax.nn.sigmoid(h)
    return x + h[:, :, None, None, None]


if __name__ == "__main__":
    key = jax.random.PRNGKey(0)
    keys = jax.random.split(key, 9)

    # in_channels == out_channels == 32; spatial 6 -> dwconv output 1x1x1;
    # C*D*H*W = 6912 = 54*128 keeps the flat layout lane-dense; N=16 batch.
    N, C, D, H, W = 16, 32, 6, 6, 6
    x = jax.random.normal(keys[0], (N, C, D, H, W), jnp.float32)

    # Parameter shapes per the module __init__ (linear weights stored
    # pre-transposed to (in, out) for row-major matmuls):
    params = {
        "dw_w": 0.05 * jax.random.normal(keys[1], (C, _KSIZE, _KSIZE, _KSIZE), jnp.float32),
        "dw_b": 0.05 * jax.random.normal(keys[2], (C,), jnp.float32),
        "ln_g": 1.0 + 0.1 * jax.random.normal(keys[3], (C,), jnp.float32),
        "ln_b": 0.1 * jax.random.normal(keys[4], (C,), jnp.float32),
        "w1": jax.random.normal(keys[5], (C, 4 * C), jnp.float32) * (1.0 / (C ** 0.5)),
        "b1": 0.05 * jax.random.normal(keys[6], (4 * C,), jnp.float32),
        "w2": jax.random.normal(keys[7], (4 * C, C), jnp.float32) * (1.0 / ((4 * C) ** 0.5)),
        "b2": 0.05 * jax.random.normal(keys[8], (C,), jnp.float32),
    }

    fwd = jax.jit(convnet_block_forward)
    y = fwd(x, params)
    jax.block_until_ready(y)
    assert y.shape == (N, C, D, H, W) and y.dtype == jnp.float32

    # Loose-tolerance check vs a pure-JAX f32 reference (bf16 MXU operands in
    # the kernel add <~1% relative error confined to the non-residual branch).
    y_ref = _reference_forward(x, params)
    err = float(jnp.max(jnp.abs(y - y_ref)))
    assert err < 1e-1, f"max abs error vs reference: {err}"
    print("KERNEL_OK")
</pallas_src>

<mosaic_0001>
module attributes {stable_mosaic.version = 11 : i64} {
  func.func @_convnet_block_kernel(%arg0: i32, %arg1: memref<16x6912xf32, #tpu.memory_space<vmem>>, %arg2: memref<1x6912xf32, #tpu.memory_space<vmem>>, %arg3: memref<6912x32xbf16, #tpu.memory_space<vmem>>, %arg4: memref<4x32xf32, #tpu.memory_space<vmem>>, %arg5: memref<32x128xbf16, #tpu.memory_space<vmem>>, %arg6: memref<1x128xf32, #tpu.memory_space<vmem>>, %arg7: memref<128x32xbf16, #tpu.memory_space<vmem>>, %arg8: memref<16x6912xf32, #tpu.memory_space<vmem>>) attributes {dimension_semantics = [#tpu.dimension_semantics<parallel>], iteration_bounds = array<i64: 1>, scalar_prefetch = 0 : i64, scratch_operands = 0 : i64, tpu.core_type = #tpu.core_type<tc>, window_params = [{transform_indices = @transform_0, window_bounds = array<i64: 16, 6912>}, {pipeline_mode = #tpu.pipeline_mode<synchronous>, transform_indices = @transform_1, window_bounds = array<i64: 1, 6912>}, {pipeline_mode = #tpu.pipeline_mode<synchronous>, transform_indices = @transform_2, window_bounds = array<i64: 6912, 32>}, {pipeline_mode = #tpu.pipeline_mode<synchronous>, transform_indices = @transform_3, window_bounds = array<i64: 4, 32>}, {pipeline_mode = #tpu.pipeline_mode<synchronous>, transform_indices = @transform_4, window_bounds = array<i64: 32, 128>}, {pipeline_mode = #tpu.pipeline_mode<synchronous>, transform_indices = @transform_5, window_bounds = array<i64: 1, 128>}, {pipeline_mode = #tpu.pipeline_mode<synchronous>, transform_indices = @transform_6, window_bounds = array<i64: 128, 32>}, {transform_indices = @transform_7, window_bounds = array<i64: 16, 6912>}]} {
    %c0 = arith.constant 0 : index
    %c0_0 = arith.constant 0 : index
    %0 = vector.load %arg1[%c0, %c0_0] : memref<16x6912xf32, #tpu.memory_space<vmem>>, vector<16x6912xf32>
    %c0_1 = arith.constant 0 : index
    %c0_2 = arith.constant 0 : index
    %1 = vector.load %arg2[%c0_1, %c0_2] : memref<1x6912xf32, #tpu.memory_space<vmem>>, vector<1x6912xf32>
    %2 = vector.broadcast %1 : vector<1x6912xf32> to vector<16x6912xf32>
    %3 = arith.mulf %0, %2 : vector<16x6912xf32>
    %4 = arith.truncf %3 : vector<16x6912xf32> to vector<16x6912xbf16>
    %c0_3 = arith.constant 0 : index
    %c0_4 = arith.constant 0 : index
    %5 = vector.load %arg3[%c0_3, %c0_4] : memref<6912x32xbf16, #tpu.memory_space<vmem>>, vector<6912x32xbf16>
    %cst = arith.constant dense<0.000000e+00> : vector<16x32xf32>
    %6 = tpu.matmul %4, %5, %cst {dimension_numbers = #tpu.dot_dimension_numbers<[1], [0], [0], [1], [0, 0, 1, 1], [], []>} : vector<16x6912xbf16>, vector<6912x32xbf16>, vector<16x32xf32> -> vector<16x32xf32>
    %c0_5 = arith.constant 0 : index
    %c0_6 = arith.constant 0 : index
    %7 = vector.load %arg4[%c0_5, %c0_6] : memref<4x32xf32, #tpu.memory_space<vmem>>, vector<1x32xf32>
    %c1 = arith.constant 1 : index
    %c0_7 = arith.constant 0 : index
    %8 = vector.load %arg4[%c1, %c0_7] : memref<4x32xf32, #tpu.memory_space<vmem>>, vector<1x32xf32>
    %c2 = arith.constant 2 : index
    %c0_8 = arith.constant 0 : index
    %9 = vector.load %arg4[%c2, %c0_8] : memref<4x32xf32, #tpu.memory_space<vmem>>, vector<1x32xf32>
    %c3 = arith.constant 3 : index
    %c0_9 = arith.constant 0 : index
    %10 = vector.load %arg4[%c3, %c0_9] : memref<4x32xf32, #tpu.memory_space<vmem>>, vector<1x32xf32>
    %11 = vector.broadcast %7 : vector<1x32xf32> to vector<16x32xf32>
    %12 = arith.addf %6, %11 : vector<16x32xf32>
    %cst_10 = arith.constant dense<0.000000e+00> : vector<16xf32>
    %13 = vector.multi_reduction <add>, %12, %cst_10 [1] : vector<16x32xf32> to vector<16xf32>
    %14 = vector.shape_cast %13 : vector<16xf32> to vector<16x1xf32>
    %cst_11 = arith.constant 3.200000e+01 : f32
    %15 = vector.broadcast %cst_11 : f32 to vector<16x1xf32>
    %16 = arith.divf %14, %15 : vector<16x1xf32>
    %17 = vector.broadcast %16 : vector<16x1xf32> to vector<16x32xf32>
    %18 = arith.subf %12, %17 : vector<16x32xf32>
    %19 = arith.mulf %18, %18 : vector<16x32xf32>
    %cst_12 = arith.constant dense<0.000000e+00> : vector<16xf32>
    %20 = vector.multi_reduction <add>, %19, %cst_12 [1] : vector<16x32xf32> to vector<16xf32>
    %21 = vector.shape_cast %20 : vector<16xf32> to vector<16x1xf32>
    %cst_13 = arith.constant 3.200000e+01 : f32
    %22 = vector.broadcast %cst_13 : f32 to vector<16x1xf32>
    %23 = arith.divf %21, %22 : vector<16x1xf32>
    %24 = vector.broadcast %16 : vector<16x1xf32> to vector<16x32xf32>
    %25 = arith.subf %12, %24 : vector<16x32xf32>
    %cst_14 = arith.constant 9.99999997E-7 : f32
    %26 = vector.broadcast %cst_14 : f32 to vector<16x1xf32>
    %27 = arith.addf %23, %26 : vector<16x1xf32>
    %28 = math.rsqrt %27 : vector<16x1xf32>
    %29 = vector.broadcast %28 : vector<16x1xf32> to vector<16x32xf32>
    %30 = arith.mulf %25, %29 : vector<16x32xf32>
    %31 = vector.broadcast %8 : vector<1x32xf32> to vector<16x32xf32>
    %32 = arith.mulf %30, %31 : vector<16x32xf32>
    %33 = vector.broadcast %9 : vector<1x32xf32> to vector<16x32xf32>
    %34 = arith.addf %32, %33 : vector<16x32xf32>
    %35 = arith.truncf %34 : vector<16x32xf32> to vector<16x32xbf16>
    %c0_15 = arith.constant 0 : index
    %c0_16 = arith.constant 0 : index
    %36 = vector.load %arg5[%c0_15, %c0_16] : memref<32x128xbf16, #tpu.memory_space<vmem>>, vector<32x128xbf16>
    %cst_17 = arith.constant dense<0.000000e+00> : vector<16x128xf32>
    %37 = tpu.matmul %35, %36, %cst_17 {dimension_numbers = #tpu.dot_dimension_numbers<[1], [0], [0], [1], [0, 0, 1, 1], [], []>} : vector<16x32xbf16>, vector<32x128xbf16>, vector<16x128xf32> -> vector<16x128xf32>
    %c0_18 = arith.constant 0 : index
    %c0_19 = arith.constant 0 : index
    %38 = vector.load %arg6[%c0_18, %c0_19] : memref<1x128xf32, #tpu.memory_space<vmem>>, vector<1x128xf32>
    %39 = vector.broadcast %38 : vector<1x128xf32> to vector<16x128xf32>
    %40 = arith.addf %37, %39 : vector<16x128xf32>
    %cst_20 = arith.constant 5.000000e-01 : f32
    %41 = vector.broadcast %cst_20 : f32 to vector<16x128xf32>
    %42 = arith.mulf %41, %40 : vector<16x128xf32>
    %cst_21 = arith.constant 0.707106769 : f32
    %43 = vector.broadcast %cst_21 : f32 to vector<16x128xf32>
    %44 = arith.mulf %40, %43 : vector<16x128xf32>
    %45 = math.absf %44 : vector<16x128xf32>
    %cst_22 = arith.constant 0.327591091 : f32
    %46 = vector.broadcast %cst_22 : f32 to vector<16x128xf32>
    %47 = arith.mulf %46, %45 : vector<16x128xf32>
    %cst_23 = arith.constant 1.000000e+00 : f32
    %48 = vector.broadcast %cst_23 : f32 to vector<16x128xf32>
    %49 = arith.addf %48, %47 : vector<16x128xf32>
    %cst_24 = arith.constant 1.000000e+00 : f32
    %50 = vector.broadcast %cst_24 : f32 to vector<16x128xf32>
    %51 = arith.divf %50, %49 : vector<16x128xf32>
    %cst_25 = arith.constant 1.06140542 : f32
    %52 = vector.broadcast %cst_25 : f32 to vector<16x128xf32>
    %53 = arith.mulf %52, %51 : vector<16x128xf32>
    %cst_26 = arith.constant -1.45315206 : f32
    %54 = vector.broadcast %cst_26 : f32 to vector<16x128xf32>
    %55 = arith.addf %53, %54 : vector<16x128xf32>
    %56 = arith.mulf %55, %51 : vector<16x128xf32>
    %cst_27 = arith.constant 1.42141378 : f32
    %57 = vector.broadcast %cst_27 : f32 to vector<16x128xf32>
    %58 = arith.addf %56, %57 : vector<16x128xf32>
    %59 = arith.mulf %58, %51 : vector<16x128xf32>
    %cst_28 = arith.constant -0.284496725 : f32
    %60 = vector.broadcast %cst_28 : f32 to vector<16x128xf32>
    %61 = arith.addf %59, %60 : vector<16x128xf32>
    %62 = arith.mulf %61, %51 : vector<16x128xf32>
    %cst_29 = arith.constant 0.254829586 : f32
    %63 = vector.broadcast %cst_29 : f32 to vector<16x128xf32>
    %64 = arith.addf %62, %63 : vector<16x128xf32>
    %65 = arith.mulf %64, %51 : vector<16x128xf32>
    %cst_30 = arith.constant 0.000000e+00 : f32
    %66 = vector.broadcast %cst_30 : f32 to vector<16x128xf32>
    %67 = arith.subf %66, %45 : vector<16x128xf32>
    %68 = arith.mulf %67, %45 : vector<16x128xf32>
    %69 = math.exp %68 : vector<16x128xf32>
    %70 = arith.mulf %65, %69 : vector<16x128xf32>
    %cst_31 = arith.constant 1.000000e+00 : f32
    %71 = vector.broadcast %cst_31 : f32 to vector<16x128xf32>
    %72 = arith.subf %71, %70 : vector<16x128xf32>
    %cst_32 = arith.constant 0.000000e+00 : f32
    %73 = vector.broadcast %cst_32 : f32 to vector<16x128xf32>
    %74 = arith.cmpf olt, %44, %73 : vector<16x128xf32>
    %cst_33 = arith.constant 0.000000e+00 : f32
    %75 = vector.broadcast %cst_33 : f32 to vector<16x128xf32>
    %76 = arith.subf %75, %72 : vector<16x128xf32>
    %77 = arith.select %74, %76, %72 : vector<16x128xi1>, vector<16x128xf32>
    %cst_34 = arith.constant 1.000000e+00 : f32
    %78 = vector.broadcast %cst_34 : f32 to vector<16x128xf32>
    %79 = arith.addf %78, %77 : vector<16x128xf32>
    %80 = arith.mulf %42, %79 : vector<16x128xf32>
    %81 = arith.truncf %80 : vector<16x128xf32> to vector<16x128xbf16>
    %c0_35 = arith.constant 0 : index
    %c0_36 = arith.constant 0 : index
    %82 = vector.load %arg7[%c0_35, %c0_36] : memref<128x32xbf16, #tpu.memory_space<vmem>>, vector<128x32xbf16>
    %cst_37 = arith.constant dense<0.000000e+00> : vector<16x32xf32>
    %83 = tpu.matmul %81, %82, %cst_37 {dimension_numbers = #tpu.dot_dimension_numbers<[1], [0], [0], [1], [0, 0, 1, 1], [], []>} : vector<16x128xbf16>, vector<128x32xbf16>, vector<16x32xf32> -> vector<16x32xf32>
    %84 = vector.broadcast %10 : vector<1x32xf32> to vector<16x32xf32>
    %85 = arith.addf %83, %84 : vector<16x32xf32>
    %86 = arith.negf %85 : vector<16x32xf32>
    %87 = math.exp %86 : vector<16x32xf32>
    %cst_38 = arith.constant 1.000000e+00 : f32
    %88 = vector.broadcast %cst_38 : f32 to vector<16x32xf32>
    %89 = arith.addf %88, %87 : vector<16x32xf32>
    %90 = arith.divf %88, %89 : vector<16x32xf32>
    %91 = arith.mulf %85, %90 : vector<16x32xf32>
    %92 = tpu.iota {dimensions = array<i32: 0>} : vector<32x6912xi32>
    %93 = tpu.iota {dimensions = array<i32: 1>} : vector<32x6912xi32>
    %c216_i32 = arith.constant 216 : i32
    %94 = vector.broadcast %c216_i32 : i32 to vector<32x6912xi32>
    %95 = arith.muli %92, %94 : vector<32x6912xi32>
    %96 = arith.cmpi sge, %93, %95 : vector<32x6912xi32>
    %c216_i32_39 = arith.constant 216 : i32
    %97 = vector.broadcast %c216_i32_39 : i32 to vector<32x6912xi32>
    %98 = arith.addi %95, %97 : vector<32x6912xi32>
    %99 = arith.cmpi slt, %93, %98 : vector<32x6912xi32>
    %100 = arith.andi %96, %99 : vector<32x6912xi1>
    %cst_40 = arith.constant 1.000000e+00 : f32
    %cst_41 = arith.constant 0.000000e+00 : f32
    %101 = vector.broadcast %cst_40 : f32 to vector<32x6912xf32>
    %102 = vector.broadcast %cst_41 : f32 to vector<32x6912xf32>
    %103 = arith.select %100, %101, %102 : vector<32x6912xi1>, vector<32x6912xf32>
    %104 = arith.truncf %103 : vector<32x6912xf32> to vector<32x6912xbf16>
    %105 = arith.truncf %91 : vector<16x32xf32> to vector<16x32xbf16>
    %cst_42 = arith.constant dense<0.000000e+00> : vector<16x6912xf32>
    %106 = tpu.matmul %105, %104, %cst_42 {dimension_numbers = #tpu.dot_dimension_numbers<[1], [0], [0], [1], [0, 0, 1, 1], [], []>} : vector<16x32xbf16>, vector<32x6912xbf16>, vector<16x6912xf32> -> vector<16x6912xf32>
    %107 = arith.addf %0, %106 : vector<16x6912xf32>
    %c0_43 = arith.constant 0 : index
    %c0_44 = arith.constant 0 : index
    %108 = vector.load %arg8[%c0_43, %c0_44] : memref<16x6912xf32, #tpu.memory_space<vmem>>, vector<16x6912xf32>
    tpu.vector_store %arg8[%c0_43, %c0_44], %107 {strides = array<i32>} : memref<16x6912xf32, #tpu.memory_space<vmem>>, vector<16x6912xf32>,
    return
  }
  func.func @transform_0(%arg0: i32) -> (i32, i32) {
    %c0_i32 = arith.constant 0 : i32
    %c0_i32_0 = arith.constant 0 : i32
    return %arg0, %c0_i32 : i32, i32
  }
  func.func @transform_1(%arg0: i32) -> (i32, i32) {
    %c0_i32 = arith.constant 0 : i32
    %c0_i32_0 = arith.constant 0 : i32
    %c0_i32_1 = arith.constant 0 : i32
    return %c0_i32, %c0_i32_0 : i32, i32
  }
  func.func @transform_2(%arg0: i32) -> (i32, i32) {
    %c0_i32 = arith.constant 0 : i32
    %c0_i32_0 = arith.constant 0 : i32
    %c0_i32_1 = arith.constant 0 : i32
    return %c0_i32, %c0_i32_0 : i32, i32
  }
  func.func @transform_3(%arg0: i32) -> (i32, i32) {
    %c0_i32 = arith.constant 0 : i32
    %c0_i32_0 = arith.constant 0 : i32
    %c0_i32_1 = arith.constant 0 : i32
    return %c0_i32, %c0_i32_0 : i32, i32
  }
  func.func @transform_4(%arg0: i32) -> (i32, i32) {
    %c0_i32 = arith.constant 0 : i32
    %c0_i32_0 = arith.constant 0 : i32
    %c0_i32_1 = arith.constant 0 : i32
    return %c0_i32, %c0_i32_0 : i32, i32
  }
  func.func @transform_5(%arg0: i32) -> (i32, i32) {
    %c0_i32 = arith.constant 0 : i32
    %c0_i32_0 = arith.constant 0 : i32
    %c0_i32_1 = arith.constant 0 : i32
    return %c0_i32, %c0_i32_0 : i32, i32
  }
  func.func @transform_6(%arg0: i32) -> (i32, i32) {
    %c0_i32 = arith.constant 0 : i32
    %c0_i32_0 = arith.constant 0 : i32
    %c0_i32_1 = arith.constant 0 : i32
    return %c0_i32, %c0_i32_0 : i32, i32
  }
  func.func @transform_7(%arg0: i32) -> (i32, i32) {
    %c0_i32 = arith.constant 0 : i32
    %c0_i32_0 = arith.constant 0 : i32
    return %arg0, %c0_i32 : i32, i32
  }
}

</mosaic_0001>

<bundles_post_ra>
// kernel: convnet_block_forward.1
= control target key start
LH: loop header
LB: loop body
LE: loop exit
PB: predicated region body
PF: predicated region fallthrough
CT: control target
= control target key end

     0   :  { %vm13425_vm0 = vcmask 261120   ;;  %s13417_s2 = inlined_call_operand.vmem [shape: bf16[6912,32], index: 2, kind: input, shape index: {}]   ;;  %s13418_s1 = inlined_call_operand.vmem [shape: f32[1,6912], index: 1, kind: input, shape index: {}]   ;;  %s13419_s0 = inlined_call_operand.vmem [shape: f32[16,6912], index: 0, kind: input, shape index: {}]   ;;  %s13420_s3 = inlined_call_operand.vmem [shape: f32[4,32], index: 3, kind: input, shape index: {}]   ;;  %s13421_s5 = inlined_call_operand.vmem [shape: f32[1,128], index: 5, kind: input, shape index: {}]   ;;  %s13422_s4 = inlined_call_operand.vmem [shape: bf16[32,128], index: 4, kind: input, shape index: {}]   ;;  %s13423_s6 = inlined_call_operand.vmem [shape: bf16[128,32], index: 6, kind: input, shape index: {}]   ;;  %s13424_s7 = inlined_call_operand.vmem [shape: f32[16,6912], index: 7, kind: output, shape index: {}]  }
   0x1   :  { %v9000_v0 = vld [vmem:[%s13417_s2 + $0x38] sm:$0xff]  ;;  %v8999_v4 = vld [vmem:[%s13417_s2 + $0x30] sm:$0xff]  ;;  %v8998_v8 = vld [vmem:[%s13417_s2 + $0x28] sm:$0xff] }
   0x2   :  { %v9008_v1 = vld [vmem:[%s13417_s2 + $0x78] sm:$0xff]  ;;  %3880 = vmatpush.bf16.msra.mxu0 %v9000_v0  ;;  %v9007_v5 = vld [vmem:[%s13417_s2 + $0x70] sm:$0xff]  ;;  %v9006_v9 = vld [vmem:[%s13417_s2 + $0x68] sm:$0xff] }
   0x3   :  { %v9016_v2 = vld [vmem:[%s13417_s2 + $0xb8] sm:$0xff]  ;;  %3894 = vmatpush.bf16.msra.mxu1 %v9008_v1  ;;  %v9015_v6 = vld [vmem:[%s13417_s2 + $0xb0] sm:$0xff]  ;;  %v9014_v10 = vld [vmem:[%s13417_s2 + $0xa8] sm:$0xff] }
   0x4   :  { %v9024_v3 = vld [vmem:[%s13417_s2 + $0xf8] sm:$0xff]  ;;  %3908 = vmatpush.bf16.msra.mxu2 %v9016_v2  ;;  %v9023_v7 = vld [vmem:[%s13417_s2 + $0xf0] sm:$0xff]  ;;  %v9022_v11 = vld [vmem:[%s13417_s2 + $0xe8] sm:$0xff] }
   0x5   :  { %3922 = vmatpush.bf16.msra.mxu3 %v9024_v3  ;;  %v8997_v12 = vld [vmem:[%s13417_s2 + $0x20] sm:$0xff]  ;;  %v8996_v16 = vld [vmem:[%s13417_s2 + $0x18] sm:$0xff]  ;;  %v8995_v20 = vld [vmem:[%s13417_s2 + $0x10] sm:$0xff] }
   0x6   :  { %3881 = vmatpush.bf16.msra.mxu0 %v8999_v4  ;;  %v9005_v13 = vld [vmem:[%s13417_s2 + $0x60] sm:$0xff]  ;;  %v9004_v17 = vld [vmem:[%s13417_s2 + $0x58] sm:$0xff]  ;;  %v9003_v21 = vld [vmem:[%s13417_s2 + $0x50] sm:$0xff] }
   0x7   :  { %3895 = vmatpush.bf16.msra.mxu1 %v9007_v5  ;;  %v9013_v14 = vld [vmem:[%s13417_s2 + $0xa0] sm:$0xff]  ;;  %v9012_v18 = vld [vmem:[%s13417_s2 + $0x98] sm:$0xff]  ;;  %v9011_v23 = vld [vmem:[%s13417_s2 + $0x90] sm:$0xff] }
   0x8   :  { %3909 = vmatpush.bf16.msra.mxu2 %v9015_v6  ;;  %v9021_v15 = vld [vmem:[%s13417_s2 + $0xe0] sm:$0xff]  ;;  %v9020_v19 = vld [vmem:[%s13417_s2 + $0xd8] sm:$0xff]  ;;  %v9019_v24 = vld [vmem:[%s13417_s2 + $0xd0] sm:$0xff] }
   0x9   :  { %3923 = vmatpush.bf16.msra.mxu3 %v9023_v7  ;;  %v9684_v22 = vld [vmem:[%s13418_s1] sm:$0xff]  ;;  %v8994_v25 = vld [vmem:[%s13417_s2 + $0x8] sm:$0xff]  ;;  %v81_v30 = vld [vmem:[%s13419_s0 + $0x1b0] sm:$0xff] }
   0xa   :  { %3882 = vmatpush.bf16.msra.mxu0 %v8998_v8  ;;  %v9002_v26 = vld [vmem:[%s13417_s2 + $0x48] sm:$0xff]  ;;  %v149_v27 = vperm.slane %v9684_v22, 0  ;;  %v27_v29 = vld [vmem:[%s13419_s0] sm:$0xff]  ;;  %v151_v31 = vperm.slane %v9684_v22, 2  ;;  %v29_v33 = vld [vmem:[%s13419_s0 + $0x10] sm:$0xff]  ;;  %v150_v35 = vperm.slane %v9684_v22, 1 }
   0xb   :  { %3896 = vmatpush.bf16.msra.mxu1 %v9006_v9  ;;  %v9010_v28 = vld [vmem:[%s13417_s2 + $0x88] sm:$0xff]  ;;  %v83_v34 = vld [vmem:[%s13419_s0 + $0x1c0] sm:$0xff]  ;;  %v82_v37 = vld [vmem:[%s13419_s0 + $0x1b8] sm:$0xff]  ;;  %v152_v41 = vperm.slane %v9684_v22, 3 }
   0xc   :  { %3910 = vmatpush.bf16.msra.mxu2 %v9014_v10  ;;  %v9018_v32 = vld [vmem:[%s13417_s2 + $0xc8] sm:$0xff]  ;;  %v8993_v38 = vld [vmem:[%s13417_s2] sm:$0xff]  ;;  %v257_v39 = vmul.f32 %v149_v27, %v27_v29  ;;  %v311_v40 = vmul.f32 %v149_v27, %v81_v30  ;;  %v259_v43 = vmul.f32 %v151_v31, %v29_v33  ;;  %v313_v44 = vmul.f32 %v151_v31, %v83_v34  ;;  %v30_v45 = vld [vmem:[%s13419_s0 + $0x18] sm:$0xff] }
   0xd   :  { %3924 = vmatpush.bf16.msra.mxu3 %v9022_v11  ;;  %v28_v36 = vld [vmem:[%s13419_s0 + $0x8] sm:$0xff]  ;;  %v9001_v42 = vld [vmem:[%s13417_s2 + $0x40] sm:$0xff]  ;;  %v9032_v48 = vld [vmem:[%s13417_s2 + $0x138] sm:$0xff]  ;;  %v312_v50 = vmul.f32 %v150_v35, %v82_v37  ;;  %v260_v55 = vmul.f32 %v152_v41, %v30_v45  ;;  %v154_v27 = vperm.slane %v9684_v22, 5  ;;  %v156_v30 = vperm.slane %v9684_v22, 7 }
   0xe   :  { %3883 = vmatpush.bf16.msra.mxu0 %v8997_v12  ;;  %v84_v46 = vld [vmem:[%s13419_s0 + $0x1c8] sm:$0xff]  ;;  %v9009_v47 = vld [vmem:[%s13417_s2 + $0x80] sm:$0xff]  ;;  %v258_v49 = vmul.f32 %v150_v35, %v28_v36  ;;  %v9040_v51 = vld [vmem:[%s13417_s2 + $0x178] sm:$0xff]  ;;  %v365_v54 = vpack.c.bf16 %v311_v40, %v257_v39  ;;  %v367_v58 = vpack.c.bf16 %v313_v44, %v259_v43 }
   0xf   :  { %3897 = vmatpush.bf16.msra.mxu1 %v9005_v13  ;;  %v9048_v52 = vld [vmem:[%s13417_s2 + $0x1b8] sm:$0xff]  ;;  %v9017_v53 = vld [vmem:[%s13417_s2 + $0xc0] sm:$0xff]  ;;  %v314_v56 = vmul.f32 %v152_v41, %v84_v46  ;;  %v9031_v59 = vld [vmem:[%s13417_s2 + $0x130] sm:$0xff] }
  0x10   :  { %3911 = vmatpush.bf16.msra.mxu2 %v9013_v14  ;;  %v9056_v57 = vld [vmem:[%s13417_s2 + $0x1f8] sm:$0xff]  ;;  %v366_v60 = vpack.c.bf16 %v312_v50, %v258_v49  ;;  %v9039_v61 = vld [vmem:[%s13417_s2 + $0x170] sm:$0xff]  ;;  %v9030_v1 = vld [vmem:[%s13417_s2 + $0x128] sm:$0xff] }
  0x11   :  { %3925 = vmatpush.bf16.msra.mxu3 %v9021_v15  ;;  %v9047_v62 = vld [vmem:[%s13417_s2 + $0x1b0] sm:$0xff]  ;;  %v368_v63 = vpack.c.bf16 %v314_v56, %v260_v55  ;;  %v9038_v2 = vld [vmem:[%s13417_s2 + $0x168] sm:$0xff]  ;;  %v9029_v5 = vld [vmem:[%s13417_s2 + $0x120] sm:$0xff] }
  0x12   :  { %3884 = vmatpush.bf16.msra.mxu0 %v8996_v16  ;;  %v9055_v0 = vld [vmem:[%s13417_s2 + $0x1f0] sm:$0xff]  ;;  %v9046_v3 = vld [vmem:[%s13417_s2 + $0x1a8] sm:$0xff]  ;;  %v9037_v6 = vld [vmem:[%s13417_s2 + $0x160] sm:$0xff] }
  0x13   :  { %3898 = vmatpush.bf16.msra.mxu1 %v9004_v17  ;;  %v9054_v4 = vld [vmem:[%s13417_s2 + $0x1e8] sm:$0xff]  ;;  %v9045_v7 = vld [vmem:[%s13417_s2 + $0x1a0] sm:$0xff]  ;;  %v9028_v9 = vld [vmem:[%s13417_s2 + $0x118] sm:$0xff] }
  0x14   :  { %3912 = vmatpush.bf16.msra.mxu2 %v9012_v18  ;;  %v9053_v8 = vld [vmem:[%s13417_s2 + $0x1e0] sm:$0xff]  ;;  %v9036_v10 = vld [vmem:[%s13417_s2 + $0x158] sm:$0xff]  ;;  %v9027_v13 = vld [vmem:[%s13417_s2 + $0x110] sm:$0xff] }
  0x15   :  { %3926 = vmatpush.bf16.msra.mxu3 %v9020_v19  ;;  %v9044_v11 = vld [vmem:[%s13417_s2 + $0x198] sm:$0xff]  ;;  %v9035_v14 = vld [vmem:[%s13417_s2 + $0x150] sm:$0xff]  ;;  %v9026_v17 = vld [vmem:[%s13417_s2 + $0x108] sm:$0xff] }
  0x16   :  { %3885 = vmatpush.bf16.msra.mxu0 %v8995_v20  ;;  %v9052_v12 = vld [vmem:[%s13417_s2 + $0x1d8] sm:$0xff]  ;;  %v9043_v15 = vld [vmem:[%s13417_s2 + $0x190] sm:$0xff]  ;;  %v9034_v18 = vld [vmem:[%s13417_s2 + $0x148] sm:$0xff] }
  0x17   :  { %3899 = vmatpush.bf16.msra.mxu1 %v9003_v21  ;;  %v9051_v16 = vld [vmem:[%s13417_s2 + $0x1d0] sm:$0xff]  ;;  %v9042_v19 = vld [vmem:[%s13417_s2 + $0x188] sm:$0xff]  ;;  %v31_v20 = vld [vmem:[%s13419_s0 + $0x20] sm:$0xff]  ;;  %v153_v21 = vperm.slane %v9684_v22, 4 }
  0x18   :  { %3913 = vmatpush.bf16.msra.mxu2 %v9011_v23  ;;  %v155_v23 = vperm.slane %v9684_v22, 6  ;;  %v86_v29 = vld [vmem:[%s13419_s0 + $0x1d8] sm:$0xff]  ;;  %v9050_v31 = vld [vmem:[%s13417_s2 + $0x1c8] sm:$0xff]  ;;  %v9025_v34 = vld [vmem:[%s13417_s2 + $0x100] sm:$0xff] }
  0x19   :  { %3927 = vmatpush.bf16.msra.mxu3 %v9019_v24  ;;  %v85_v24 = vld [vmem:[%s13419_s0 + $0x1d0] sm:$0xff]  ;;  %v88_v33 = vld [vmem:[%s13419_s0 + $0x1e8] sm:$0xff]  ;;  %v261_v35 = vmul.f32 %v153_v21, %v31_v20  ;;  %v9041_v39 = vld [vmem:[%s13417_s2 + $0x180] sm:$0xff]  ;;  %v316_v41 = vmul.f32 %v154_v27, %v86_v29 }
  0x1a   :  { %3886 = vmatpush.bf16.msra.mxu0 %v8994_v25  ;;  %v33_v25 = vld [vmem:[%s13419_s0 + $0x30] sm:$0xff]  ;;  %v315_v22 = vmul.f32 %v153_v21, %v85_v24  ;;  %v9072_v43 = vld [vmem:[%s13417_s2 + $0x278] sm:$0xff]  ;;  %v318_v45 = vmul.f32 %v156_v30, %v88_v33  ;;  %v36_v20 = vld [vmem:[%s13419_s0 + $0x48] sm:$0xff] }
  0x1b   :  { %3900 = vmatpush.bf16.msra.mxu1 %v9002_v26  ;;  %v87_v26 = vld [vmem:[%s13419_s0 + $0x1e0] sm:$0xff]  ;;  %v263_v36 = vmul.f32 %v155_v23, %v33_v25  ;;  %v9080_v46 = vld [vmem:[%s13417_s2 + $0x2b8] sm:$0xff]  ;;  %v9079_v55 = vld [vmem:[%s13417_s2 + $0x2b0] sm:$0xff] }
  0x1c   :  { %3914 = vmatpush.bf16.msra.mxu2 %v9010_v28  ;;  %v32_v28 = vld [vmem:[%s13419_s0 + $0x28] sm:$0xff]  ;;  %v317_v37 = vmul.f32 %v155_v23, %v87_v26  ;;  %v9088_v50 = vld [vmem:[%s13417_s2 + $0x2f8] sm:$0xff]  ;;  %v9087_v56 = vld [vmem:[%s13417_s2 + $0x2f0] sm:$0xff] }
  0x1d   :  { %3928 = vmatpush.bf16.msra.mxu3 %v9018_v32  ;;  %v34_v32 = vld [vmem:[%s13419_s0 + $0x38] sm:$0xff]  ;;  %v262_v40 = vmul.f32 %v154_v27, %v32_v28  ;;  %v9082_v24 = vld [vmem:[%s13417_s2 + $0x2c8] sm:$0xff]  ;;  %v9057_v27 = vld [vmem:[%s13417_s2 + $0x200] sm:$0xff] }
  0x1e   :  { %3887 = vmatpush.bf16.msra.mxu0 %v8993_v38  ;;  %v9033_v38 = vld [vmem:[%s13417_s2 + $0x140] sm:$0xff]  ;;  %v264_v44 = vmul.f32 %v156_v30, %v34_v32  ;;  %v371_v49 = vpack.c.bf16 %v317_v37, %v263_v36  ;;  %v90_v21 = vld [vmem:[%s13419_s0 + $0x1f8] sm:$0xff]  ;;  %v92_v26 = vld [vmem:[%s13419_s0 + $0x208] sm:$0xff] }
  0x1f   :  { %3901 = vmatpush.bf16.msra.mxu1 %v9001_v42  ;;  %v9064_v42 = vld [vmem:[%s13417_s2 + $0x238] sm:$0xff]  ;;  %v9065_v32 = vld [vmem:[%s13417_s2 + $0x240] sm:$0xff] }
  0x20   :  { %3915 = vmatpush.bf16.msra.mxu2 %v9009_v47  ;;  %v9049_v47 = vld [vmem:[%s13417_s2 + $0x1c0] sm:$0xff]  ;;  %v38_v25 = vld [vmem:[%s13419_s0 + $0x58] sm:$0xff] }
  0x21   :  { %3929 = vmatpush.bf16.msra.mxu3 %v9017_v53  ;;  %3888 = vmatmul.bf16.vlgmr.msra.gmra.mxu0 %v365_v54  ;;  %v9063_v53 = vld [vmem:[%s13417_s2 + $0x230] sm:$0xff]  ;;  %v9073_v33 = vld [vmem:[%s13417_s2 + $0x280] sm:$0xff]  ;;  %v9104_v36 = vld [vmem:[%s13417_s2 + $0x378] sm:$0xff] }
  0x22   :  { %3936 = vmatpush.bf16.msrb.mxu0 %v9032_v48  ;;  %3902 = vmatmul.bf16.vlgmr.msra.gmra.mxu1 %v366_v60  ;;  %v369_v48 = vpack.c.bf16 %v315_v22, %v261_v35  ;;  %v9071_v54 = vld [vmem:[%s13417_s2 + $0x270] sm:$0xff]  ;;  %v9086_v60 = vld [vmem:[%s13417_s2 + $0x2e8] sm:$0xff]  ;;  %v9096_v22 = vld [vmem:[%s13417_s2 + $0x338] sm:$0xff] }
  0x23   :  { %3950 = vmatpush.bf16.msrb.mxu1 %v9040_v51  ;;  %3916 = vmatmul.bf16.vlgmr.msra.gmra.mxu2 %v367_v58  ;;  %v370_v51 = vpack.c.bf16 %v316_v41, %v262_v40  ;;  %v9070_v58 = vld [vmem:[%s13417_s2 + $0x268] sm:$0xff]  ;;  %v9081_v40 = vld [vmem:[%s13417_s2 + $0x2c0] sm:$0xff] }
  0x24   :  { %3964 = vmatpush.bf16.msrb.mxu2 %v9048_v52  ;;  %3930 = vmatmul.bf16.vlgmr.msra.gmra.mxu3 %v368_v63  ;;  %v372_v52 = vpack.c.bf16 %v318_v45, %v264_v44  ;;  %v9077_v63 = vld [vmem:[%s13417_s2 + $0x2a0] sm:$0xff] }
  0x25   :  { %3978 = vmatpush.bf16.msrb.mxu3 %v9056_v57  ;;  %v9062_v57 = vld [vmem:[%s13417_s2 + $0x228] sm:$0xff] }
  0x26   :  { %3937 = vmatpush.bf16.msrb.mxu0 %v9031_v59  ;;  %v9078_v59 = vld [vmem:[%s13417_s2 + $0x2a8] sm:$0xff] }
  0x27   :  { %3951 = vmatpush.bf16.msrb.mxu1 %v9039_v61  ;;  %v9061_v61 = vld [vmem:[%s13417_s2 + $0x220] sm:$0xff] }
  0x28   :  { %3965 = vmatpush.bf16.msrb.mxu2 %v9047_v62  ;;  %v9069_v62 = vld [vmem:[%s13417_s2 + $0x260] sm:$0xff] }
  0x29   :  { %3979 = vmatpush.bf16.msrb.mxu3 %v9055_v0  ;;  %v9085_v0 = vld [vmem:[%s13417_s2 + $0x2e0] sm:$0xff] }
  0x2a   :  { %3938 = vmatpush.bf16.msrb.mxu0 %v9030_v1  ;;  %v9060_v1 = vld [vmem:[%s13417_s2 + $0x218] sm:$0xff] }
  0x2b   :  { %3952 = vmatpush.bf16.msrb.mxu1 %v9038_v2  ;;  %v9068_v2 = vld [vmem:[%s13417_s2 + $0x258] sm:$0xff] }
  0x2c   :  { %3966 = vmatpush.bf16.msrb.mxu2 %v9046_v3  ;;  %v9076_v3 = vld [vmem:[%s13417_s2 + $0x298] sm:$0xff] }
  0x2d   :  { %3980 = vmatpush.bf16.msrb.mxu3 %v9054_v4  ;;  %v9084_v4 = vld [vmem:[%s13417_s2 + $0x2d8] sm:$0xff] }
  0x2e   :  { %3939 = vmatpush.bf16.msrb.mxu0 %v9029_v5  ;;  %v9059_v5 = vld [vmem:[%s13417_s2 + $0x210] sm:$0xff] }
  0x2f   :  { %3953 = vmatpush.bf16.msrb.mxu1 %v9037_v6  ;;  %v9067_v6 = vld [vmem:[%s13417_s2 + $0x250] sm:$0xff] }
  0x30   :  { %3967 = vmatpush.bf16.msrb.mxu2 %v9045_v7  ;;  %v9075_v7 = vld [vmem:[%s13417_s2 + $0x290] sm:$0xff] }
  0x31   :  { %3981 = vmatpush.bf16.msrb.mxu3 %v9053_v8  ;;  %v9940_v8 = vld [vmem:[%s13418_s1 + $0x8] sm:$0xff] }
  0x32   :  { %3940 = vmatpush.bf16.msrb.mxu0 %v9028_v9  ;;  %v9083_v9 = vld [vmem:[%s13417_s2 + $0x2d0] sm:$0xff]  ;;  %v160_v23 = vperm.slane %v9940_v8, 3 }
  0x33   :  { %3954 = vmatpush.bf16.msrb.mxu1 %v9036_v10  ;;  %v9058_v10 = vld [vmem:[%s13417_s2 + $0x208] sm:$0xff] }
  0x34   :  { %3968 = vmatpush.bf16.msrb.mxu2 %v9044_v11  ;;  %v9066_v11 = vld [vmem:[%s13417_s2 + $0x248] sm:$0xff]  ;;  %v268_v37 = vmul.f32 %v160_v23, %v38_v25  ;;  %v9105_v25 = vld [vmem:[%s13417_s2 + $0x380] sm:$0xff] }
  0x35   :  { %3982 = vmatpush.bf16.msrb.mxu3 %v9052_v12  ;;  %v9074_v12 = vld [vmem:[%s13417_s2 + $0x288] sm:$0xff] }
  0x36   :  { %3941 = vmatpush.bf16.msrb.mxu0 %v9027_v13  ;;  %v35_v13 = vld [vmem:[%s13419_s0 + $0x40] sm:$0xff] }
  0x37   :  { %3955 = vmatpush.bf16.msrb.mxu1 %v9035_v14  ;;  %v157_v14 = vperm.slane %v9940_v8, 0 }
  0x38   :  { %3969 = vmatpush.bf16.msrb.mxu2 %v9043_v15  ;;  %v159_v15 = vperm.slane %v9940_v8, 2 }
  0x39   :  { %3983 = vmatpush.bf16.msrb.mxu3 %v9051_v16  ;;  %v89_v16 = vld [vmem:[%s13419_s0 + $0x1f0] sm:$0xff]  ;;  %v265_v28 = vmul.f32 %v157_v14, %v35_v13  ;;  %v40_v13 = vld [vmem:[%s13419_s0 + $0x68] sm:$0xff] }
  0x3a   :  { %3942 = vmatpush.bf16.msrb.mxu0 %v9026_v17  ;;  %v37_v17 = vld [vmem:[%s13419_s0 + $0x50] sm:$0xff]  ;;  %v319_v29 = vmul.f32 %v157_v14, %v89_v16  ;;  %v94_v14 = vld [vmem:[%s13419_s0 + $0x218] sm:$0xff]  ;;  %v9114_v16 = vld [vmem:[%s13417_s2 + $0x3c8] sm:$0xff] }
  0x3b   :  { %3956 = vmatpush.bf16.msrb.mxu1 %v9034_v18  ;;  %v91_v18 = vld [vmem:[%s13419_s0 + $0x200] sm:$0xff]  ;;  %v267_v30 = vmul.f32 %v159_v15, %v37_v17  ;;  %v42_v17 = vld [vmem:[%s13419_s0 + $0x78] sm:$0xff] }
  0x3c   :  { %3970 = vmatpush.bf16.msrb.mxu2 %v9042_v19  ;;  %v158_v19 = vperm.slane %v9940_v8, 1  ;;  %v373_v41 = vpack.c.bf16 %v319_v29, %v265_v28  ;;  %v9128_v28 = vld [vmem:[%s13417_s2 + $0x438] sm:$0xff] }
  0x3d   :  { %3984 = vmatpush.bf16.msrb.mxu3 %v9050_v31  ;;  %v321_v31 = vmul.f32 %v159_v15, %v91_v18  ;;  %v164_v15 = vperm.slane %v9940_v8, 7  ;;  %v96_v18 = vld [vmem:[%s13419_s0 + $0x228] sm:$0xff]  ;;  %v9136_v29 = vld [vmem:[%s13417_s2 + $0x478] sm:$0xff] }
  0x3e   :  { %3943 = vmatpush.bf16.msrb.mxu0 %v9025_v34  ;;  %v266_v34 = vmul.f32 %v158_v19, %v36_v20  ;;  %v320_v35 = vmul.f32 %v158_v19, %v90_v21  ;;  %v9089_v19 = vld [vmem:[%s13417_s2 + $0x300] sm:$0xff] }
  0x3f   :  { %3957 = vmatpush.bf16.msrb.mxu1 %v9033_v38  ;;  %v322_v38 = vmul.f32 %v160_v23, %v92_v26 }
  0x40   :  { %3971 = vmatpush.bf16.msrb.mxu2 %v9041_v39  ;;  %v9112_v39 = vld [vmem:[%s13417_s2 + $0x3b8] sm:$0xff]  ;;  %v374_v44 = vpack.c.bf16 %v320_v35, %v266_v34 }
  0x41   :  { %3985 = vmatpush.bf16.msrb.mxu3 %v9049_v47  ;;  %3944 = vmatmul.bf16.vlgmr.msrb.gmra.mxu0 %v369_v48  ;;  %v376_v45 = vpack.c.bf16 %v322_v38, %v268_v37  ;;  %v9103_v47 = vld [vmem:[%s13417_s2 + $0x370] sm:$0xff] }
  0x42   :  { %3992 = vmatpush.bf16.msra.mxu0 %v9064_v42  ;;  %3958 = vmatmul.bf16.vlgmr.msrb.gmra.mxu1 %v370_v51  ;;  %v375_v42 = vpack.c.bf16 %v321_v31, %v267_v30  ;;  %v9111_v48 = vld [vmem:[%s13417_s2 + $0x3b0] sm:$0xff]  ;;  %v9102_v51 = vld [vmem:[%s13417_s2 + $0x368] sm:$0xff]  ;;  %v272_v30 = vmul.f32 %v164_v15, %v42_v17  ;;  %v326_v31 = vmul.f32 %v164_v15, %v96_v18  ;;  %v9129_v17 = vld [vmem:[%s13417_s2 + $0x440] sm:$0xff] }
  0x43   :  { %4006 = vmatpush.bf16.msra.mxu1 %v9072_v43  ;;  %3972 = vmatmul.bf16.vlgmr.msrb.gmra.mxu2 %v371_v49  ;;  %v9120_v43 = vld [vmem:[%s13417_s2 + $0x3f8] sm:$0xff]  ;;  %v9119_v49 = vld [vmem:[%s13417_s2 + $0x3f0] sm:$0xff]  ;;  %v9137_v18 = vld [vmem:[%s13417_s2 + $0x480] sm:$0xff] }
  0x44   :  { %4020 = vmatpush.bf16.msra.mxu2 %v9080_v46  ;;  %3986 = vmatmul.bf16.vlgmr.msrb.gmra.mxu3 %v372_v52  ;;  %v9095_v46 = vld [vmem:[%s13417_s2 + $0x330] sm:$0xff]  ;;  %v9110_v52 = vld [vmem:[%s13417_s2 + $0x3a8] sm:$0xff]  ;;  %v380_v37 = vpack.c.bf16 %v326_v31, %v272_v30 }
  0x45   :  { %4034 = vmatpush.bf16.msra.mxu3 %v9088_v50  ;;  %v9094_v50 = vld [vmem:[%s13417_s2 + $0x328] sm:$0xff]  ;;  %v9127_v38 = vld [vmem:[%s13417_s2 + $0x430] sm:$0xff] }
  0x46   :  { %3993 = vmatpush.bf16.msra.mxu0 %v9063_v53  ;;  %v9118_v53 = vld [vmem:[%s13417_s2 + $0x3e8] sm:$0xff] }
  0x47   :  { %4007 = vmatpush.bf16.msra.mxu1 %v9071_v54  ;;  %v9093_v54 = vld [vmem:[%s13417_s2 + $0x320] sm:$0xff] }
  0x48   :  { %4021 = vmatpush.bf16.msra.mxu2 %v9079_v55  ;;  %v9101_v55 = vld [vmem:[%s13417_s2 + $0x360] sm:$0xff] }
  0x49   :  { %4035 = vmatpush.bf16.msra.mxu3 %v9087_v56  ;;  %v9109_v56 = vld [vmem:[%s13417_s2 + $0x3a0] sm:$0xff] }
  0x4a   :  { %3994 = vmatpush.bf16.msra.mxu0 %v9062_v57  ;;  %v9117_v57 = vld [vmem:[%s13417_s2 + $0x3e0] sm:$0xff] }
  0x4b   :  { %4008 = vmatpush.bf16.msra.mxu1 %v9070_v58  ;;  %v9092_v58 = vld [vmem:[%s13417_s2 + $0x318] sm:$0xff] }
  0x4c   :  { %4022 = vmatpush.bf16.msra.mxu2 %v9078_v59  ;;  %v9100_v59 = vld [vmem:[%s13417_s2 + $0x358] sm:$0xff] }
  0x4d   :  { %4036 = vmatpush.bf16.msra.mxu3 %v9086_v60  ;;  %v9108_v60 = vld [vmem:[%s13417_s2 + $0x398] sm:$0xff] }
  0x4e   :  { %3995 = vmatpush.bf16.msra.mxu0 %v9061_v61  ;;  %v9116_v61 = vld [vmem:[%s13417_s2 + $0x3d8] sm:$0xff] }
  0x4f   :  { %4009 = vmatpush.bf16.msra.mxu1 %v9069_v62  ;;  %v9091_v62 = vld [vmem:[%s13417_s2 + $0x310] sm:$0xff] }
  0x50   :  { %4023 = vmatpush.bf16.msra.mxu2 %v9077_v63  ;;  %v9099_v63 = vld [vmem:[%s13417_s2 + $0x350] sm:$0xff] }
  0x51   :  { %4037 = vmatpush.bf16.msra.mxu3 %v9085_v0  ;;  %v9107_v0 = vld [vmem:[%s13417_s2 + $0x390] sm:$0xff] }
  0x52   :  { %3996 = vmatpush.bf16.msra.mxu0 %v9060_v1  ;;  %v9115_v1 = vld [vmem:[%s13417_s2 + $0x3d0] sm:$0xff] }
  0x53   :  { %4010 = vmatpush.bf16.msra.mxu1 %v9068_v2  ;;  %v9090_v2 = vld [vmem:[%s13417_s2 + $0x308] sm:$0xff] }
  0x54   :  { %4024 = vmatpush.bf16.msra.mxu2 %v9076_v3  ;;  %v9098_v3 = vld [vmem:[%s13417_s2 + $0x348] sm:$0xff] }
  0x55   :  { %4038 = vmatpush.bf16.msra.mxu3 %v9084_v4  ;;  %v9106_v4 = vld [vmem:[%s13417_s2 + $0x388] sm:$0xff] }
  0x56   :  { %3997 = vmatpush.bf16.msra.mxu0 %v9059_v5  ;;  %v39_v5 = vld [vmem:[%s13419_s0 + $0x60] sm:$0xff] }
  0x57   :  { %4011 = vmatpush.bf16.msra.mxu1 %v9067_v6  ;;  %v161_v6 = vperm.slane %v9940_v8, 4 }
  0x58   :  { %4025 = vmatpush.bf16.msra.mxu2 %v9075_v7  ;;  %v163_v7 = vperm.slane %v9940_v8, 6 }
  0x59   :  { %4039 = vmatpush.bf16.msra.mxu3 %v9083_v9  ;;  %v93_v9 = vld [vmem:[%s13419_s0 + $0x210] sm:$0xff]  ;;  %v269_v20 = vmul.f32 %v161_v6, %v39_v5  ;;  %v44_v5 = vld [vmem:[%s13419_s0 + $0x88] sm:$0xff] }
  0x5a   :  { %3998 = vmatpush.bf16.msra.mxu0 %v9058_v10  ;;  %v41_v10 = vld [vmem:[%s13419_s0 + $0x70] sm:$0xff] }
  0x5b   :  { %4012 = vmatpush.bf16.msra.mxu1 %v9066_v11  ;;  %v95_v11 = vld [vmem:[%s13419_s0 + $0x220] sm:$0xff]  ;;  %v271_v21 = vmul.f32 %v163_v7, %v41_v10  ;;  %v46_v10 = vld [vmem:[%s13419_s0 + $0x98] sm:$0xff] }
  0x5c   :  { %4026 = vmatpush.bf16.msra.mxu2 %v9074_v12  ;;  %v162_v12 = vperm.slane %v9940_v8, 5  ;;  %v323_v8 = vmul.f32 %v161_v6, %v93_v9  ;;  %v325_v23 = vmul.f32 %v163_v7, %v95_v11  ;;  %v98_v6 = vld [vmem:[%s13419_s0 + $0x238] sm:$0xff]  ;;  %v9146_v9 = vld [vmem:[%s13417_s2 + $0x4c8] sm:$0xff] }
  0x5d   :  { %4040 = vmatpush.bf16.msra.mxu3 %v9082_v24  ;;  %v9097_v24 = vld [vmem:[%s13417_s2 + $0x340] sm:$0xff]  ;;  %v100_v11 = vld [vmem:[%s13419_s0 + $0x248] sm:$0xff] }
  0x5e   :  { %3999 = vmatpush.bf16.msra.mxu0 %v9057_v27  ;;  %v270_v26 = vmul.f32 %v162_v12, %v40_v13  ;;  %v324_v27 = vmul.f32 %v162_v12, %v94_v14  ;;  %v377_v34 = vpack.c.bf16 %v323_v8, %v269_v20  ;;  %v379_v35 = vpack.c.bf16 %v325_v23, %v271_v21  ;;  %v9121_v12 = vld [vmem:[%s13417_s2 + $0x400] sm:$0xff]  ;;  %v9160_v8 = vld [vmem:[%s13417_s2 + $0x538] sm:$0xff] }
  0x5f   :  { %4013 = vmatpush.bf16.msra.mxu1 %v9065_v32  ;;  %v9144_v32 = vld [vmem:[%s13417_s2 + $0x4b8] sm:$0xff] }
  0x60   :  { %4027 = vmatpush.bf16.msra.mxu2 %v9073_v33  ;;  %v9113_v33 = vld [vmem:[%s13417_s2 + $0x3c0] sm:$0xff]  ;;  %v9168_v21 = vld [vmem:[%s13417_s2 + $0x578] sm:$0xff] }
  0x61   :  { %4041 = vmatpush.bf16.msra.mxu3 %v9081_v40  ;;  %4000 = vmatmul.bf16.vlgmr.msra.gmra.mxu0 %v373_v41  ;;  %v9143_v40 = vld [vmem:[%s13417_s2 + $0x4b0] sm:$0xff] }
  0x62   :  { %4048 = vmatpush.bf16.msrb.mxu0 %v9096_v22  ;;  %4014 = vmatmul.bf16.vlgmr.msra.gmra.mxu1 %v374_v44  ;;  %v9152_v22 = vld [vmem:[%s13417_s2 + $0x4f8] sm:$0xff]  ;;  %v9151_v41 = vld [vmem:[%s13417_s2 + $0x4f0] sm:$0xff]  ;;  %v9142_v44 = vld [vmem:[%s13417_s2 + $0x4a8] sm:$0xff] }
  0x63   :  { %4062 = vmatpush.bf16.msrb.mxu1 %v9104_v36  ;;  %4028 = vmatmul.bf16.vlgmr.msra.gmra.mxu2 %v375_v42  ;;  %v378_v36 = vpack.c.bf16 %v324_v27, %v270_v26  ;;  %v9126_v42 = vld [vmem:[%s13417_s2 + $0x428] sm:$0xff]  ;;  %v9145_v26 = vld [vmem:[%s13417_s2 + $0x4c0] sm:$0xff] }
  0x64   :  { %4076 = vmatpush.bf16.msrb.mxu2 %v9112_v39  ;;  %4042 = vmatmul.bf16.vlgmr.msra.gmra.mxu3 %v376_v45  ;;  %v9135_v39 = vld [vmem:[%s13417_s2 + $0x470] sm:$0xff]  ;;  %v9150_v45 = vld [vmem:[%s13417_s2 + $0x4e8] sm:$0xff] }
  0x65   :  { %4090 = vmatpush.bf16.msrb.mxu3 %v9120_v43  ;;  %v9134_v43 = vld [vmem:[%s13417_s2 + $0x468] sm:$0xff] }
  0x66   :  { %4049 = vmatpush.bf16.msrb.mxu0 %v9095_v46  ;;  %v9125_v46 = vld [vmem:[%s13417_s2 + $0x420] sm:$0xff] }
  0x67   :  { %4063 = vmatpush.bf16.msrb.mxu1 %v9103_v47  ;;  %v9133_v47 = vld [vmem:[%s13417_s2 + $0x460] sm:$0xff] }
  0x68   :  { %4077 = vmatpush.bf16.msrb.mxu2 %v9111_v48  ;;  %v9141_v48 = vld [vmem:[%s13417_s2 + $0x4a0] sm:$0xff] }
  0x69   :  { %4091 = vmatpush.bf16.msrb.mxu3 %v9119_v49  ;;  %v9149_v49 = vld [vmem:[%s13417_s2 + $0x4e0] sm:$0xff] }
  0x6a   :  { %4050 = vmatpush.bf16.msrb.mxu0 %v9094_v50  ;;  %v9124_v50 = vld [vmem:[%s13417_s2 + $0x418] sm:$0xff] }
  0x6b   :  { %4064 = vmatpush.bf16.msrb.mxu1 %v9102_v51  ;;  %v9132_v51 = vld [vmem:[%s13417_s2 + $0x458] sm:$0xff] }
  0x6c   :  { %4078 = vmatpush.bf16.msrb.mxu2 %v9110_v52  ;;  %v9140_v52 = vld [vmem:[%s13417_s2 + $0x498] sm:$0xff] }
  0x6d   :  { %4092 = vmatpush.bf16.msrb.mxu3 %v9118_v53  ;;  %v9148_v53 = vld [vmem:[%s13417_s2 + $0x4d8] sm:$0xff] }
  0x6e   :  { %4051 = vmatpush.bf16.msrb.mxu0 %v9093_v54  ;;  %v9123_v54 = vld [vmem:[%s13417_s2 + $0x410] sm:$0xff] }
  0x6f   :  { %4065 = vmatpush.bf16.msrb.mxu1 %v9101_v55  ;;  %v9131_v55 = vld [vmem:[%s13417_s2 + $0x450] sm:$0xff] }
  0x70   :  { %4079 = vmatpush.bf16.msrb.mxu2 %v9109_v56  ;;  %v9139_v56 = vld [vmem:[%s13417_s2 + $0x490] sm:$0xff] }
  0x71   :  { %4093 = vmatpush.bf16.msrb.mxu3 %v9117_v57  ;;  %v10193_v57 = vld [vmem:[%s13418_s1 + $0x10] sm:$0xff] }
  0x72   :  { %4052 = vmatpush.bf16.msrb.mxu0 %v9092_v58  ;;  %v9147_v58 = vld [vmem:[%s13417_s2 + $0x4d0] sm:$0xff]  ;;  %v168_v7 = vperm.slane %v10193_v57, 3 }
  0x73   :  { %4066 = vmatpush.bf16.msrb.mxu1 %v9100_v59  ;;  %v9122_v59 = vld [vmem:[%s13417_s2 + $0x408] sm:$0xff] }
  0x74   :  { %4080 = vmatpush.bf16.msrb.mxu2 %v9108_v60  ;;  %v9130_v60 = vld [vmem:[%s13417_s2 + $0x448] sm:$0xff]  ;;  %v276_v23 = vmul.f32 %v168_v7, %v46_v10  ;;  %v172_v10 = vperm.slane %v10193_v57, 7 }
  0x75   :  { %4094 = vmatpush.bf16.msrb.mxu3 %v9116_v61  ;;  %v9138_v61 = vld [vmem:[%s13417_s2 + $0x488] sm:$0xff] }
  0x76   :  { %4053 = vmatpush.bf16.msrb.mxu0 %v9091_v62  ;;  %v43_v62 = vld [vmem:[%s13419_s0 + $0x80] sm:$0xff] }
  0x77   :  { %4067 = vmatpush.bf16.msrb.mxu1 %v9099_v63  ;;  %v165_v63 = vperm.slane %v10193_v57, 0 }
  0x78   :  { %4081 = vmatpush.bf16.msrb.mxu2 %v9107_v0  ;;  %v167_v0 = vperm.slane %v10193_v57, 2 }
  0x79   :  { %4095 = vmatpush.bf16.msrb.mxu3 %v9115_v1  ;;  %v97_v1 = vld [vmem:[%s13419_s0 + $0x230] sm:$0xff]  ;;  %v273_v13 = vmul.f32 %v165_v63, %v43_v62  ;;  %v9162_v62 = vld [vmem:[%s13417_s2 + $0x548] sm:$0xff] }
  0x7a   :  { %4054 = vmatpush.bf16.msrb.mxu0 %v9090_v2  ;;  %v45_v2 = vld [vmem:[%s13419_s0 + $0x90] sm:$0xff]  ;;  %v327_v14 = vmul.f32 %v165_v63, %v97_v1  ;;  %v9170_v63 = vld [vmem:[%s13417_s2 + $0x588] sm:$0xff]  ;;  %v169_v1 = vperm.slane %v10193_v57, 4 }
  0x7b   :  { %4068 = vmatpush.bf16.msrb.mxu1 %v9098_v3  ;;  %v99_v3 = vld [vmem:[%s13419_s0 + $0x240] sm:$0xff]  ;;  %v275_v15 = vmul.f32 %v167_v0, %v45_v2  ;;  %v171_v2 = vperm.slane %v10193_v57, 6 }
  0x7c   :  { %4082 = vmatpush.bf16.msrb.mxu2 %v9106_v4  ;;  %v166_v4 = vperm.slane %v10193_v57, 1  ;;  %v381_v27 = vpack.c.bf16 %v327_v14, %v273_v13  ;;  %v104_v13 = vld [vmem:[%s13419_s0 + $0x268] sm:$0xff]  ;;  %v9153_v14 = vld [vmem:[%s13417_s2 + $0x500] sm:$0xff] }
  0x7d   :  { %4096 = vmatpush.bf16.msrb.mxu3 %v9114_v16  ;;  %v329_v16 = vmul.f32 %v167_v0, %v99_v3  ;;  %v47_v0 = vld [vmem:[%s13419_s0 + $0xa0] sm:$0xff]  ;;  %v101_v3 = vld [vmem:[%s13419_s0 + $0x250] sm:$0xff] }
  0x7e   :  { %4055 = vmatpush.bf16.msrb.mxu0 %v9089_v19  ;;  %v274_v19 = vmul.f32 %v166_v4, %v44_v5  ;;  %v328_v20 = vmul.f32 %v166_v4, %v98_v6  ;;  %v49_v4 = vld [vmem:[%s13419_s0 + $0xb0] sm:$0xff]  ;;  %v103_v5 = vld [vmem:[%s13419_s0 + $0x260] sm:$0xff]  ;;  %v170_v6 = vperm.slane %v10193_v57, 5  ;;  %v331_v57 = vmul.f32 %v169_v1, %v101_v3  ;;  %v9194_v3 = vld [vmem:[%s13417_s2 + $0x648] sm:$0xff] }
  0x7f   :  { %4069 = vmatpush.bf16.msrb.mxu1 %v9097_v24  ;;  %v330_v24 = vmul.f32 %v168_v7, %v100_v11  ;;  %v48_v7 = vld [vmem:[%s13419_s0 + $0xa8] sm:$0xff] }
  0x80   :  { %4083 = vmatpush.bf16.msrb.mxu2 %v9105_v25  ;;  %v9176_v25 = vld [vmem:[%s13417_s2 + $0x5b8] sm:$0xff]  ;;  %v382_v30 = vpack.c.bf16 %v328_v20, %v274_v19  ;;  %v9178_v11 = vld [vmem:[%s13417_s2 + $0x5c8] sm:$0xff]  ;;  %v9169_v19 = vld [vmem:[%s13417_s2 + $0x580] sm:$0xff]  ;;  %v278_v20 = vmul.f32 %v170_v6, %v48_v7 }
  0x81   :  { %4097 = vmatpush.bf16.msrb.mxu3 %v9113_v33  ;;  %4056 = vmatmul.bf16.vlgmr.msrb.gmra.mxu0 %v377_v34  ;;  %v384_v31 = vpack.c.bf16 %v330_v24, %v276_v23  ;;  %v9167_v33 = vld [vmem:[%s13417_s2 + $0x570] sm:$0xff]  ;;  %v9200_v23 = vld [vmem:[%s13417_s2 + $0x678] sm:$0xff] }
  0x82   :  { %4104 = vmatpush.bf16.msra.mxu0 %v9128_v28  ;;  %4070 = vmatmul.bf16.vlgmr.msrb.gmra.mxu1 %v378_v36  ;;  %v383_v28 = vpack.c.bf16 %v329_v16, %v275_v15  ;;  %v9175_v34 = vld [vmem:[%s13417_s2 + $0x5b0] sm:$0xff]  ;;  %v9437_v36 = vld [vmem:[%s13420_s3] ss:$0 sm:$0xff]  ;;  %v277_v15 = vmul.f32 %v169_v1, %v47_v0  ;;  %v279_v16 = vmul.f32 %v171_v2, %v49_v4  ;;  %v10462_v0 = vld [vmem:[%s13418_s1 + $0x18] sm:$0xff] }
  0x83   :  { %4118 = vmatpush.bf16.msra.mxu1 %v9136_v29  ;;  %4084 = vmatmul.bf16.vlgmr.msrb.gmra.mxu2 %v379_v35  ;;  %v9184_v29 = vld [vmem:[%s13417_s2 + $0x5f8] sm:$0xff]  ;;  %v9183_v35 = vld [vmem:[%s13417_s2 + $0x5f0] sm:$0xff]  ;;  %v9202_v4 = vld [vmem:[%s13417_s2 + $0x688] sm:$0xff]  ;;  %v175_v7 = vperm.slane %v10462_v0, 2 }
  0x84   :  { %4132 = vmatpush.bf16.msra.mxu2 %v9144_v32  ;;  %4098 = vmatmul.bf16.vlgmr.msrb.gmra.mxu3 %v380_v37  ;;  %v9159_v32 = vld [vmem:[%s13417_s2 + $0x530] sm:$0xff]  ;;  %v9166_v37 = vld [vmem:[%s13417_s2 + $0x568] sm:$0xff] }
  0x85   :  { %4146 = vmatpush.bf16.msra.mxu3 %v9152_v22  ;;  %v9158_v22 = vld [vmem:[%s13417_s2 + $0x528] sm:$0xff]  ;;  %v9211_v1 = vld [vmem:[%s13417_s2 + $0x6d0] sm:$0xff] }
  0x86   :  { %4105 = vmatpush.bf16.msra.mxu0 %v9127_v38  ;;  %v9174_v38 = vld [vmem:[%s13417_s2 + $0x5a8] sm:$0xff] }
  0x87   :  { %4119 = vmatpush.bf16.msra.mxu1 %v9135_v39  ;;  %v9182_v39 = vld [vmem:[%s13417_s2 + $0x5e8] sm:$0xff] }
  0x88   :  { %4133 = vmatpush.bf16.msra.mxu2 %v9143_v40 }
  0x89   :  { %4147 = vmatpush.bf16.msra.mxu3 %v9151_v41  ;;  %v9157_v41 = vld [vmem:[%s13417_s2 + $0x520] sm:$0xff] }
  0x8a   :  { %4106 = vmatpush.bf16.msra.mxu0 %v9126_v42 }
  0x8b   :  { %4120 = vmatpush.bf16.msra.mxu1 %v9134_v43  ;;  %v9165_v43 = vld [vmem:[%s13417_s2 + $0x560] sm:$0xff] }
  0x8c   :  { %4134 = vmatpush.bf16.msra.mxu2 %v9142_v44  ;;  %v9173_v44 = vld [vmem:[%s13417_s2 + $0x5a0] sm:$0xff] }
  0x8d   :  { %4148 = vmatpush.bf16.msra.mxu3 %v9150_v45 }
  0x8e   :  { %4107 = vmatpush.bf16.msra.mxu0 %v9125_v46 }
  0x8f   :  { %4121 = vmatpush.bf16.msra.mxu1 %v9133_v47  ;;  %v9181_v47 = vld [vmem:[%s13417_s2 + $0x5e0] sm:$0xff] }
  0x90   :  { %4135 = vmatpush.bf16.msra.mxu2 %v9141_v48  ;;  %v9156_v48 = vld [vmem:[%s13417_s2 + $0x518] sm:$0xff] }
  0x91   :  { %4149 = vmatpush.bf16.msra.mxu3 %v9149_v49  ;;  %v9164_v49 = vld [vmem:[%s13417_s2 + $0x558] sm:$0xff] }
  0x92   :  { %4108 = vmatpush.bf16.msra.mxu0 %v9124_v50  ;;  %v9172_v50 = vld [vmem:[%s13417_s2 + $0x598] sm:$0xff] }
  0x93   :  { %4122 = vmatpush.bf16.msra.mxu1 %v9132_v51 }
  0x94   :  { %4136 = vmatpush.bf16.msra.mxu2 %v9140_v52  ;;  %v9180_v52 = vld [vmem:[%s13417_s2 + $0x5d8] sm:$0xff] }
  0x95   :  { %4150 = vmatpush.bf16.msra.mxu3 %v9148_v53 }
  0x96   :  { %4109 = vmatpush.bf16.msra.mxu0 %v9123_v54  ;;  %v9155_v54 = vld [vmem:[%s13417_s2 + $0x510] sm:$0xff] }
  0x97   :  { %4123 = vmatpush.bf16.msra.mxu1 %v9131_v55  ;;  %v9163_v55 = vld [vmem:[%s13417_s2 + $0x550] sm:$0xff] }
  0x98   :  { %4137 = vmatpush.bf16.msra.mxu2 %v9139_v56  ;;  %v9171_v56 = vld [vmem:[%s13417_s2 + $0x590] sm:$0xff] }
  0x99   :  { %4151 = vmatpush.bf16.msra.mxu3 %v9147_v58 }
  0x9a   :  { %4110 = vmatpush.bf16.msra.mxu0 %v9122_v59 }
  0x9b   :  { %4124 = vmatpush.bf16.msra.mxu1 %v9130_v60  ;;  %v9179_v60 = vld [vmem:[%s13417_s2 + $0x5d0] sm:$0xff] }
  0x9c   :  { %4138 = vmatpush.bf16.msra.mxu2 %v9138_v61  ;;  %v9154_v61 = vld [vmem:[%s13417_s2 + $0x508] sm:$0xff] }
  0x9d   :  { %4152 = vmatpush.bf16.msra.mxu3 %v9146_v9  ;;  %v102_v9 = vld [vmem:[%s13419_s0 + $0x258] sm:$0xff] }
  0x9e   :  { %4111 = vmatpush.bf16.msra.mxu0 %v9121_v12  ;;  %v3889_v40 = vpop.f32.mrf.mxu0  ;;  %v50_v12 = vld [vmem:[%s13419_s0 + $0xb8] sm:$0xff] }
  0x9f   :  { %4125 = vmatpush.bf16.msra.mxu1 %v9129_v17  ;;  %v3890_v42 = vadd.f32 %v9437_v36, %v3889_v40  ;;  %v3903_v45 = vpop.f32.mrf.mxu1  ;;  %v333_v17 = vmul.f32 %v171_v2, %v103_v5  ;;  %v280_v24 = vmul.f32 %v172_v10, %v50_v12  ;;  %v9207_v36 = vld [vmem:[%s13417_s2 + $0x6b0] sm:$0xff]  ;;  %v9198_v40 = vld [vmem:[%s13417_s2 + $0x668] sm:$0xff]  ;;  %v51_v5 = vld [vmem:[%s13419_s0 + $0xc0] sm:$0xff]  ;;  %v174_v12 = vperm.slane %v10462_v0, 1 }
  0xa0   :  { %4139 = vmatpush.bf16.msra.mxu2 %v9137_v18  ;;  %v9161_v18 = vld [vmem:[%s13417_s2 + $0x540] sm:$0xff]  ;;  %v9186_v2 = vld [vmem:[%s13417_s2 + $0x608] sm:$0xff] }
  0xa1   :  { %4153 = vmatpush.bf16.msra.mxu3 %v9145_v26  ;;  %4112 = vmatmul.bf16.vlgmr.msra.gmra.mxu0 %v381_v27  ;;  %v3904_v46 = vadd.f32 %v3903_v45, %v3890_v42  ;;  %v9208_v26 = vld [vmem:[%s13417_s2 + $0x6b8] sm:$0xff]  ;;  %v9177_v27 = vld [vmem:[%s13417_s2 + $0x5c0] sm:$0xff] }
  0xa2   :  { %4160 = vmatpush.bf16.msrb.mxu0 %v9160_v8  ;;  %4126 = vmatmul.bf16.vlgmr.msra.gmra.mxu1 %v382_v30  ;;  %v332_v8 = vmul.f32 %v170_v6, %v102_v9  ;;  %v387_v30 = vpack.c.bf16 %v333_v17, %v279_v16  ;;  %v173_v6 = vperm.slane %v10462_v0, 0  ;;  %v105_v9 = vld [vmem:[%s13419_s0 + $0x270] sm:$0xff]  ;;  %v54_v16 = vld [vmem:[%s13419_s0 + $0xd8] sm:$0xff]  ;;  %v108_v17 = vld [vmem:[%s13419_s0 + $0x288] sm:$0xff] }
  0xa3   :  { %4174 = vmatpush.bf16.msrb.mxu1 %v9168_v21  ;;  %4140 = vmatmul.bf16.vlgmr.msra.gmra.mxu2 %v383_v28  ;;  %v9192_v21 = vld [vmem:[%s13417_s2 + $0x638] sm:$0xff] }
  0xa4   :  { %4188 = vmatpush.bf16.msrb.mxu2 %v9176_v25  ;;  %4154 = vmatmul.bf16.vlgmr.msra.gmra.mxu3 %v384_v31  ;;  %v334_v25 = vmul.f32 %v172_v10, %v104_v13  ;;  %v9216_v31 = vld [vmem:[%s13417_s2 + $0x6f8] sm:$0xff]  ;;  %v53_v10 = vld [vmem:[%s13419_s0 + $0xd0] sm:$0xff]  ;;  %v52_v13 = vld [vmem:[%s13419_s0 + $0xc8] sm:$0xff] }
  0xa5   :  { %4202 = vmatpush.bf16.msrb.mxu3 %v9184_v29  ;;  %v385_v29 = vpack.c.bf16 %v331_v57, %v277_v15  ;;  %v176_v15 = vperm.slane %v10462_v0, 3  ;;  %v9210_v57 = vld [vmem:[%s13417_s2 + $0x6c8] sm:$0xff] }
  0xa6   :  { %4161 = vmatpush.bf16.msrb.mxu0 %v9159_v32  ;;  %v3917_v51 = vpop.f32.mrf.mxu2  ;;  %v10388_v28 = vpop.f32.mrf.mxu0  ;;  %v386_v32 = vpack.c.bf16 %v332_v8, %v278_v20  ;;  %v335_v20 = vmul.f32 %v173_v6, %v105_v9  ;;  %v283_v8 = vmul.f32 %v175_v7, %v53_v10  ;;  %v9227_v9 = vld [vmem:[%s13417_s2 + $0x750] sm:$0xff] }
  0xa7   :  { %4175 = vmatpush.bf16.msrb.mxu1 %v9167_v33  ;;  %v3918_v53 = vadd.f32 %v3917_v51, %v3904_v46  ;;  %v3931_v58 = vpop.f32.mrf.mxu3  ;;  %v10393_v33 = vpop.f32.mrf.mxu1  ;;  %v9189_v46 = vld [vmem:[%s13417_s2 + $0x620] sm:$0xff]  ;;  %v9235_v10 = vld [vmem:[%s13417_s2 + $0x790] sm:$0xff] }
  0xa8   :  { %4189 = vmatpush.bf16.msrb.mxu2 %v9175_v34  ;;  %v388_v34 = vpack.c.bf16 %v334_v25, %v280_v24  ;;  %v9213_v51 = vld [vmem:[%s13417_s2 + $0x6e0] sm:$0xff]  ;;  %v282_v25 = vmul.f32 %v174_v12, %v52_v13  ;;  %v9226_v13 = vld [vmem:[%s13417_s2 + $0x748] sm:$0xff] }
  0xa9   :  { %4203 = vmatpush.bf16.msrb.mxu3 %v9183_v35  ;;  %v10322_v59 = vadd.f32 %v3931_v58, %v3918_v53  ;;  %v9191_v35 = vld [vmem:[%s13417_s2 + $0x630] sm:$0xff]  ;;  %v9196_v53 = vld [vmem:[%s13417_s2 + $0x658] sm:$0xff]  ;;  %v9201_v24 = vld [vmem:[%s13417_s2 + $0x680] sm:$0xff] }
  0xaa   :  { %4162 = vmatpush.bf16.msrb.mxu0 %v9158_v22  ;;  %v9199_v22 = vld [vmem:[%s13417_s2 + $0x670] sm:$0xff]  ;;  %v9212_v58 = vld [vmem:[%s13417_s2 + $0x6d8] sm:$0xff] }
  0xab   :  { %4176 = vmatpush.bf16.msrb.mxu1 %v9166_v37  ;;  %v9215_v37 = vld [vmem:[%s13417_s2 + $0x6f0] sm:$0xff] }
  0xac   :  { %4190 = vmatpush.bf16.msrb.mxu2 %v9174_v38 }
  0xad   :  { %4204 = vmatpush.bf16.msrb.mxu3 %v9182_v39  ;;  %v9190_v39 = vld [vmem:[%s13417_s2 + $0x628] sm:$0xff] }
  0xae   :  { %4163 = vmatpush.bf16.msrb.mxu0 %v9157_v41  ;;  %v10407_v38 = vpop.f32.mrf.mxu2  ;;  %v9206_v41 = vld [vmem:[%s13417_s2 + $0x6a8] sm:$0xff] }
  0xaf   :  { %4177 = vmatpush.bf16.msrb.mxu1 %v9165_v43  ;;  %v10418_v42 = vpop.f32.mrf.mxu3  ;;  %v9214_v43 = vld [vmem:[%s13417_s2 + $0x6e8] sm:$0xff] }
  0xb0   :  { %4191 = vmatpush.bf16.msrb.mxu2 %v9173_v44 }
  0xb1   :  { %4205 = vmatpush.bf16.msrb.mxu3 %v9181_v47  ;;  %v9197_v47 = vld [vmem:[%s13417_s2 + $0x660] sm:$0xff] }
  0xb2   :  { %4164 = vmatpush.bf16.msrb.mxu0 %v9156_v48  ;;  %v9205_v48 = vld [vmem:[%s13417_s2 + $0x6a0] sm:$0xff] }
  0xb3   :  { %4178 = vmatpush.bf16.msrb.mxu1 %v9164_v49 }
  0xb4   :  { %4192 = vmatpush.bf16.msrb.mxu2 %v9172_v50 }
  0xb5   :  { %4206 = vmatpush.bf16.msrb.mxu3 %v9180_v52  ;;  %v9188_v52 = vld [vmem:[%s13417_s2 + $0x618] sm:$0xff] }
  0xb6   :  { %4165 = vmatpush.bf16.msrb.mxu0 %v9155_v54  ;;  %v9204_v54 = vld [vmem:[%s13417_s2 + $0x698] sm:$0xff] }
  0xb7   :  { %4179 = vmatpush.bf16.msrb.mxu1 %v9163_v55 }
  0xb8   :  { %4193 = vmatpush.bf16.msrb.mxu2 %v9171_v56 }
  0xb9   :  { %4207 = vmatpush.bf16.msrb.mxu3 %v9179_v60 }
  0xba   :  { %4166 = vmatpush.bf16.msrb.mxu0 %v9154_v61  ;;  %v9187_v61 = vld [vmem:[%s13417_s2 + $0x610] sm:$0xff] }
  0xbb   :  { %4180 = vmatpush.bf16.msrb.mxu1 %v9162_v62  ;;  %v9195_v62 = vld [vmem:[%s13417_s2 + $0x650] sm:$0xff] }
  0xbc   :  { %4194 = vmatpush.bf16.msrb.mxu2 %v9170_v63  ;;  %v9203_v63 = vld [vmem:[%s13417_s2 + $0x690] sm:$0xff] }
  0xbd   :  { %4208 = vmatpush.bf16.msrb.mxu3 %v9178_v11  ;;  %v107_v11 = vld [vmem:[%s13419_s0 + $0x280] sm:$0xff] }
  0xbe   :  { %4167 = vmatpush.bf16.msrb.mxu0 %v9153_v14  ;;  %v3945_v44 = vpop.f32.mrf.mxu0  ;;  %v106_v14 = vld [vmem:[%s13419_s0 + $0x278] sm:$0xff] }
  0xbf   :  { %4181 = vmatpush.bf16.msrb.mxu1 %v9161_v18  ;;  %v3946_v45 = vadd.f32 %v3945_v44, %v10322_v59  ;;  %v3959_v49 = vpop.f32.mrf.mxu1  ;;  %v9185_v18 = vld [vmem:[%s13417_s2 + $0x600] sm:$0xff]  ;;  %v9231_v44 = vld [vmem:[%s13417_s2 + $0x770] sm:$0xff] }
  0xc0   :  { %4195 = vmatpush.bf16.msrb.mxu2 %v9169_v19  ;;  %v281_v19 = vmul.f32 %v173_v6, %v51_v5 }
  0xc1   :  { %4209 = vmatpush.bf16.msrb.mxu3 %v9177_v27  ;;  %4168 = vmatmul.bf16.vlgmr.msrb.gmra.mxu0 %v385_v29  ;;  %v3960_v50 = vadd.f32 %v3959_v49, %v3946_v45  ;;  %v9224_v27 = vld [vmem:[%s13417_s2 + $0x738] sm:$0xff]  ;;  %v9239_v45 = vld [vmem:[%s13417_s2 + $0x7b0] sm:$0xff]  ;;  %v9230_v49 = vld [vmem:[%s13417_s2 + $0x768] sm:$0xff] }
  0xc2   :  { %4216 = vmatpush.bf16.msra.mxu0 %v9192_v21  ;;  %4182 = vmatmul.bf16.vlgmr.msrb.gmra.mxu1 %v386_v32  ;;  %v337_v21 = vmul.f32 %v175_v7, %v107_v11  ;;  %v9232_v29 = vld [vmem:[%s13417_s2 + $0x778] sm:$0xff]  ;;  %v9219_v7 = vld [vmem:[%s13417_s2 + $0x710] sm:$0xff] }
  0xc3   :  { %4230 = vmatpush.bf16.msra.mxu1 %v9200_v23  ;;  %4196 = vmatmul.bf16.vlgmr.msrb.gmra.mxu2 %v387_v30  ;;  %v9193_v23 = vld [vmem:[%s13417_s2 + $0x640] sm:$0xff]  ;;  %v284_v30 = vmul.f32 %v176_v15, %v54_v16  ;;  %v9240_v32 = vld [vmem:[%s13417_s2 + $0x7b8] sm:$0xff]  ;;  %v9243_v11 = vld [vmem:[%s13417_s2 + $0x7d0] sm:$0xff]  ;;  %v179_v16 = vperm.slane %v10462_v0, 6 }
  0xc4   :  { %4244 = vmatpush.bf16.msra.mxu2 %v9208_v26  ;;  %4210 = vmatmul.bf16.vlgmr.msrb.gmra.mxu3 %v388_v34  ;;  %v336_v26 = vmul.f32 %v174_v12, %v106_v14  ;;  %v9209_v34 = vld [vmem:[%s13417_s2 + $0x6c0] sm:$0xff]  ;;  %v9218_v12 = vld [vmem:[%s13417_s2 + $0x708] sm:$0xff] }
  0xc5   :  { %4258 = vmatpush.bf16.msra.mxu3 %v9216_v31  ;;  %v338_v31 = vmul.f32 %v176_v15, %v108_v17  ;;  %v9234_v14 = vld [vmem:[%s13417_s2 + $0x788] sm:$0xff]  ;;  %v55_v15 = vld [vmem:[%s13419_s0 + $0xe0] sm:$0xff]  ;;  %v109_v17 = vld [vmem:[%s13419_s0 + $0x290] sm:$0xff] }
  0xc6   :  { %4217 = vmatpush.bf16.msra.mxu0 %v9191_v35  ;;  %v3973_v55 = vpop.f32.mrf.mxu2  ;;  %v389_v35 = vpack.c.bf16 %v335_v20, %v281_v19  ;;  %v111_v19 = vld [vmem:[%s13419_s0 + $0x2a0] sm:$0xff]  ;;  %v178_v20 = vperm.slane %v10462_v0, 5 }
  0xc7   :  { %4231 = vmatpush.bf16.msra.mxu1 %v9199_v22  ;;  %v3974_v56 = vadd.f32 %v3973_v55, %v3960_v50  ;;  %v3987_v59 = vpop.f32.mrf.mxu3  ;;  %v391_v22 = vpack.c.bf16 %v337_v21, %v283_v8  ;;  %v9238_v50 = vld [vmem:[%s13417_s2 + $0x7a8] sm:$0xff]  ;;  %v9221_v55 = vld [vmem:[%s13417_s2 + $0x720] sm:$0xff]  ;;  %v110_v21 = vld [vmem:[%s13419_s0 + $0x298] sm:$0xff] }
  0xc8   :  { %4245 = vmatpush.bf16.msra.mxu2 %v9207_v36  ;;  %v10528_v36 = vpop.f32.mrf.mxu0  ;;  %v56_v8 = vld [vmem:[%s13419_s0 + $0xe8] sm:$0xff] }
  0xc9   :  { %4259 = vmatpush.bf16.msra.mxu3 %v9215_v37  ;;  %v10448_v60 = vadd.f32 %v3987_v59, %v3974_v56  ;;  %v9248_v37 = vld [vmem:[%s13417_s2 + $0x7f8] sm:$0xff]  ;;  %v9237_v59 = vld [vmem:[%s13417_s2 + $0x7a0] sm:$0xff] }
  0xca   :  { %4218 = vmatpush.bf16.msra.mxu0 %v9190_v39  ;;  %v390_v39 = vpack.c.bf16 %v336_v26, %v282_v25  ;;  %v58_v25 = vld [vmem:[%s13419_s0 + $0xf8] sm:$0xff]  ;;  %v112_v26 = vld [vmem:[%s13419_s0 + $0x2a8] sm:$0xff] }
  0xcb   :  { %4232 = vmatpush.bf16.msra.mxu1 %v9198_v40  ;;  %v10533_v40 = vpop.f32.mrf.mxu1 }
  0xcc   :  { %4246 = vmatpush.bf16.msra.mxu2 %v9206_v41  ;;  %v392_v41 = vpack.c.bf16 %v338_v31, %v284_v30  ;;  %v341_v31 = vmul.f32 %v179_v16, %v111_v19  ;;  %v9251_v19 = vld [vmem:[%s13417_s2 + $0x810] sm:$0xff] }
  0xcd   :  { %4260 = vmatpush.bf16.msra.mxu3 %v9214_v43  ;;  %v9223_v43 = vld [vmem:[%s13417_s2 + $0x730] sm:$0xff] }
  0xce   :  { %4219 = vmatpush.bf16.msra.mxu0 %v9189_v46  ;;  %v9247_v46 = vld [vmem:[%s13417_s2 + $0x7f0] sm:$0xff] }
  0xcf   :  { %4233 = vmatpush.bf16.msra.mxu1 %v9197_v47  ;;  %v9222_v47 = vld [vmem:[%s13417_s2 + $0x728] sm:$0xff] }
  0xd0   :  { %4247 = vmatpush.bf16.msra.mxu2 %v9205_v48  ;;  %v10550_v48 = vpop.f32.mrf.mxu2 }
  0xd1   :  { %4261 = vmatpush.bf16.msra.mxu3 %v9213_v51  ;;  %v10558_v51 = vpop.f32.mrf.mxu3 }
  0xd2   :  { %4220 = vmatpush.bf16.msra.mxu0 %v9188_v52  ;;  %v9246_v52 = vld [vmem:[%s13417_s2 + $0x7e8] sm:$0xff] }
  0xd3   :  { %4234 = vmatpush.bf16.msra.mxu1 %v9196_v53 }
  0xd4   :  { %4248 = vmatpush.bf16.msra.mxu2 %v9204_v54 }
  0xd5   :  { %4262 = vmatpush.bf16.msra.mxu3 %v9212_v58  ;;  %v9229_v58 = vld [vmem:[%s13417_s2 + $0x760] sm:$0xff] }
  0xd6   :  { %4221 = vmatpush.bf16.msra.mxu0 %v9187_v61 }
  0xd7   :  { %4235 = vmatpush.bf16.msra.mxu1 %v9195_v62  ;;  %v9220_v62 = vld [vmem:[%s13417_s2 + $0x718] sm:$0xff] }
  0xd8   :  { %4249 = vmatpush.bf16.msra.mxu2 %v9203_v63  ;;  %v9228_v63 = vld [vmem:[%s13417_s2 + $0x758] sm:$0xff] }
  0xd9   :  { %4263 = vmatpush.bf16.msra.mxu3 %v9211_v1  ;;  %v9236_v1 = vld [vmem:[%s13417_s2 + $0x798] sm:$0xff] }
  0xda   :  { %4222 = vmatpush.bf16.msra.mxu0 %v9186_v2 }
  0xdb   :  { %4236 = vmatpush.bf16.msra.mxu1 %v9194_v3 }
  0xdc   :  { %4250 = vmatpush.bf16.msra.mxu2 %v9202_v4  ;;  %v9244_v4 = vld [vmem:[%s13417_s2 + $0x7d8] sm:$0xff] }
  0xdd   :  { %4264 = vmatpush.bf16.msra.mxu3 %v9210_v57  ;;  %v177_v57 = vperm.slane %v10462_v0, 4 }
  0xde   :  { %4223 = vmatpush.bf16.msra.mxu0 %v9185_v18  ;;  %v4001_v53 = vpop.f32.mrf.mxu0  ;;  %v57_v18 = vld [vmem:[%s13419_s0 + $0xf0] sm:$0xff] }
  0xdf   :  { %4237 = vmatpush.bf16.msra.mxu1 %v9193_v23  ;;  %v4002_v54 = vadd.f32 %v4001_v53, %v10448_v60  ;;  %v4015_v56 = vpop.f32.mrf.mxu1  ;;  %v9245_v60 = vld [vmem:[%s13417_s2 + $0x7e0] sm:$0xff]  ;;  %v180_v23 = vperm.slane %v10462_v0, 7  ;;  %v339_v0 = vmul.f32 %v177_v57, %v109_v17  ;;  %v287_v30 = vmul.f32 %v179_v16, %v57_v18  ;;  %v9276_v16 = vld [vmem:[%s13417_s2 + $0x8d8] sm:$0xff] }
  0xe0   :  { %4251 = vmatpush.bf16.msra.mxu2 %v9201_v24  ;;  %v9242_v24 = vld [vmem:[%s13417_s2 + $0x7c8] sm:$0xff] }
  0xe1   :  { %4265 = vmatpush.bf16.msra.mxu3 %v9209_v34  ;;  %4224 = vmatmul.bf16.vlgmr.msra.gmra.mxu0 %v389_v35  ;;  %v4016_v61 = vadd.f32 %v4015_v56, %v4002_v54  ;;  %v9233_v34 = vld [vmem:[%s13417_s2 + $0x780] sm:$0xff]  ;;  %v286_v35 = vmul.f32 %v178_v20, %v56_v8  ;;  %v9263_v56 = vld [vmem:[%s13417_s2 + $0x870] sm:$0xff] }
  0xe2   :  { %4272 = vmatpush.bf16.msrb.mxu0 %v9224_v27  ;;  %4238 = vmatmul.bf16.vlgmr.msra.gmra.mxu1 %v390_v39  ;;  %v9217_v27 = vld [vmem:[%s13417_s2 + $0x700] sm:$0xff]  ;;  %v9264_v39 = vld [vmem:[%s13417_s2 + $0x878] sm:$0xff]  ;;  %v9267_v8 = vld [vmem:[%s13417_s2 + $0x890] sm:$0xff] }
  0xe3   :  { %4286 = vmatpush.bf16.msrb.mxu1 %v9232_v29  ;;  %4252 = vmatmul.bf16.vlgmr.msra.gmra.mxu2 %v391_v22  ;;  %v285_v29 = vmul.f32 %v177_v57, %v55_v15  ;;  %v340_v22 = vmul.f32 %v178_v20, %v110_v21  ;;  %v9259_v20 = vld [vmem:[%s13417_s2 + $0x850] sm:$0xff]  ;;  %v10737_v21 = vld [vmem:[%s13418_s1 + $0x20] sm:$0xff] }
  0xe4   :  { %4300 = vmatpush.bf16.msrb.mxu2 %v9240_v32  ;;  %4266 = vmatmul.bf16.vlgmr.msra.gmra.mxu3 %v392_v41  ;;  %v9225_v32 = vld [vmem:[%s13417_s2 + $0x740] sm:$0xff]  ;;  %v288_v41 = vmul.f32 %v180_v23, %v58_v25  ;;  %v9258_v25 = vld [vmem:[%s13417_s2 + $0x848] sm:$0xff] }
  0xe5   :  { %4314 = vmatpush.bf16.msrb.mxu3 %v9248_v37  ;;  %v9256_v37 = vld [vmem:[%s13417_s2 + $0x838] sm:$0xff] }
  0xe6   :  { %4273 = vmatpush.bf16.msrb.mxu0 %v9223_v43  ;;  %v4029_v2 = vpop.f32.mrf.mxu2  ;;  %v342_v43 = vmul.f32 %v180_v23, %v112_v26  ;;  %v9275_v23 = vld [vmem:[%s13417_s2 + $0x8d0] sm:$0xff]  ;;  %v9266_v26 = vld [vmem:[%s13417_s2 + $0x888] sm:$0xff] }
  0xe7   :  { %4287 = vmatpush.bf16.msrb.mxu1 %v9231_v44  ;;  %v4030_v3 = vadd.f32 %v4029_v2, %v4016_v61  ;;  %v4043_v5 = vpop.f32.mrf.mxu3  ;;  %v9272_v44 = vld [vmem:[%s13417_s2 + $0x8b8] sm:$0xff]  ;;  %v10668_v53 = vpop.f32.mrf.mxu1  ;;  %v9254_v61 = vld [vmem:[%s13417_s2 + $0x828] sm:$0xff] }
  0xe8   :  { %4301 = vmatpush.bf16.msrb.mxu2 %v9239_v45  ;;  %v9241_v45 = vld [vmem:[%s13417_s2 + $0x7c0] sm:$0xff]  ;;  %v396_v54 = vpack.c.bf16 %v342_v43, %v288_v41  ;;  %v9278_v2 = vld [vmem:[%s13417_s2 + $0x8e8] sm:$0xff]  ;;  %v62_v41 = vld [vmem:[%s13419_s0 + $0x118] sm:$0xff] }
  0xe9   :  { %4315 = vmatpush.bf16.msrb.mxu3 %v9247_v46  ;;  %v10588_v6 = vadd.f32 %v4043_v5, %v4030_v3  ;;  %v393_v46 = vpack.c.bf16 %v339_v0, %v285_v29  ;;  %v9253_v5 = vld [vmem:[%s13417_s2 + $0x820] sm:$0xff]  ;;  %v181_v29 = vperm.slane %v10737_v21, 0  ;;  %v183_v0 = vperm.slane %v10737_v21, 2  ;;  %v116_v43 = vld [vmem:[%s13419_s0 + $0x2c8] sm:$0xff] }
  0xea   :  { %4274 = vmatpush.bf16.msrb.mxu0 %v9222_v47  ;;  %v395_v47 = vpack.c.bf16 %v341_v31, %v287_v30  ;;  %v113_v30 = vld [vmem:[%s13419_s0 + $0x2b0] sm:$0xff] }
  0xeb   :  { %4288 = vmatpush.bf16.msrb.mxu1 %v9230_v49  ;;  %v10663_v49 = vpop.f32.mrf.mxu0  ;;  %v61_v31 = vld [vmem:[%s13419_s0 + $0x110] sm:$0xff] }
  0xec   :  { %4302 = vmatpush.bf16.msrb.mxu2 %v9238_v50  ;;  %v9280_v50 = vld [vmem:[%s13417_s2 + $0x8f8] sm:$0xff] }
  0xed   :  { %4316 = vmatpush.bf16.msrb.mxu3 %v9246_v52  ;;  %v394_v52 = vpack.c.bf16 %v340_v22, %v286_v35  ;;  %v60_v35 = vld [vmem:[%s13419_s0 + $0x108] sm:$0xff]  ;;  %v114_v22 = vld [vmem:[%s13419_s0 + $0x2b8] sm:$0xff] }
  0xee   :  { %4275 = vmatpush.bf16.msrb.mxu0 %v9221_v55  ;;  %v9255_v55 = vld [vmem:[%s13417_s2 + $0x830] sm:$0xff] }
  0xef   :  { %4289 = vmatpush.bf16.msrb.mxu1 %v9229_v58  ;;  %v9271_v58 = vld [vmem:[%s13417_s2 + $0x8b0] sm:$0xff] }
  0xf0   :  { %4303 = vmatpush.bf16.msrb.mxu2 %v9237_v59  ;;  %v9279_v59 = vld [vmem:[%s13417_s2 + $0x8f0] sm:$0xff] }
  0xf1   :  { %4317 = vmatpush.bf16.msrb.mxu3 %v9245_v60  ;;  %v10685_v60 = vpop.f32.mrf.mxu2 }
  0xf2   :  { %4276 = vmatpush.bf16.msrb.mxu0 %v9220_v62  ;;  %v9262_v62 = vld [vmem:[%s13417_s2 + $0x868] sm:$0xff] }
  0xf3   :  { %4290 = vmatpush.bf16.msrb.mxu1 %v9228_v63  ;;  %v9270_v63 = vld [vmem:[%s13417_s2 + $0x8a8] sm:$0xff] }
  0xf4   :  { %4304 = vmatpush.bf16.msrb.mxu2 %v9236_v1  ;;  %v10693_v1 = vpop.f32.mrf.mxu3 }
  0xf5   :  { %4318 = vmatpush.bf16.msrb.mxu3 %v9244_v4 }
  0xf6   :  { %4277 = vmatpush.bf16.msrb.mxu0 %v9219_v7 }
  0xf7   :  { %4291 = vmatpush.bf16.msrb.mxu1 %v9227_v9  ;;  %v9261_v9 = vld [vmem:[%s13417_s2 + $0x860] sm:$0xff] }
  0xf8   :  { %4305 = vmatpush.bf16.msrb.mxu2 %v9235_v10  ;;  %v9269_v10 = vld [vmem:[%s13417_s2 + $0x8a0] sm:$0xff] }
  0xf9   :  { %4319 = vmatpush.bf16.msrb.mxu3 %v9243_v11 }
  0xfa   :  { %4278 = vmatpush.bf16.msrb.mxu0 %v9218_v12  ;;  %v9252_v12 = vld [vmem:[%s13417_s2 + $0x818] sm:$0xff] }
  0xfb   :  { %4292 = vmatpush.bf16.msrb.mxu1 %v9226_v13  ;;  %v9260_v13 = vld [vmem:[%s13417_s2 + $0x858] sm:$0xff] }
  0xfc   :  { %4306 = vmatpush.bf16.msrb.mxu2 %v9234_v14  ;;  %v9268_v14 = vld [vmem:[%s13417_s2 + $0x898] sm:$0xff] }
  0xfd   :  { %4320 = vmatpush.bf16.msrb.mxu3 %v9242_v24  ;;  %v9250_v24 = vld [vmem:[%s13417_s2 + $0x808] sm:$0xff] }
  0xfe   :  { %4279 = vmatpush.bf16.msrb.mxu0 %v9217_v27  ;;  %v4057_v3 = vpop.f32.mrf.mxu0  ;;  %v59_v27 = vld [vmem:[%s13419_s0 + $0x100] sm:$0xff] }
  0xff   :  { %4293 = vmatpush.bf16.msrb.mxu1 %v9225_v32  ;;  %v4058_v4 = vadd.f32 %v4057_v3, %v10588_v6  ;;  %v4071_v7 = vpop.f32.mrf.mxu1  ;;  %v9277_v6 = vld [vmem:[%s13417_s2 + $0x8e0] sm:$0xff] }
 0x100   :  { %4307 = vmatpush.bf16.msrb.mxu2 %v9233_v34  ;;  %v115_v32 = vld [vmem:[%s13419_s0 + $0x2c0] sm:$0xff]  ;;  %v182_v34 = vperm.slane %v10737_v21, 1 }
 0x101   :  { %4321 = vmatpush.bf16.msrb.mxu3 %v9241_v45  ;;  %4280 = vmatmul.bf16.vlgmr.msrb.gmra.mxu0 %v393_v46  ;;  %v4072_v11 = vadd.f32 %v4071_v7, %v4058_v4  ;;  %v289_v45 = vmul.f32 %v181_v29, %v59_v27  ;;  %v343_v46 = vmul.f32 %v181_v29, %v113_v30  ;;  %v9312_v7 = vld [vmem:[%s13417_s2 + $0x9f8] sm:$0xff]  ;;  %v9301_v27 = vld [vmem:[%s13417_s2 + $0x9a0] sm:$0xff] }
 0x102   :  { %4328 = vmatpush.bf16.msra.mxu0 %v9256_v37  ;;  %4294 = vmatmul.bf16.vlgmr.msrb.gmra.mxu1 %v394_v52  ;;  %v184_v37 = vperm.slane %v10737_v21, 3  ;;  %v9257_v52 = vld [vmem:[%s13417_s2 + $0x840] sm:$0xff]  ;;  %v9292_v30 = vld [vmem:[%s13417_s2 + $0x958] sm:$0xff] }
 0x103   :  { %4342 = vmatpush.bf16.msra.mxu1 %v9264_v39  ;;  %4308 = vmatmul.bf16.vlgmr.msrb.gmra.mxu2 %v395_v47  ;;  %v9274_v39 = vld [vmem:[%s13417_s2 + $0x8c8] sm:$0xff]  ;;  %v291_v47 = vmul.f32 %v183_v0, %v61_v31  ;;  %v397_v3 = vpack.c.bf16 %v343_v46, %v289_v45  ;;  %v9300_v31 = vld [vmem:[%s13417_s2 + $0x998] sm:$0xff] }
 0x104   :  { %4356 = vmatpush.bf16.msra.mxu2 %v9272_v44  ;;  %4322 = vmatmul.bf16.vlgmr.msrb.gmra.mxu3 %v396_v54  ;;  %v9249_v44 = vld [vmem:[%s13417_s2 + $0x800] sm:$0xff]  ;;  %v9282_v45 = vld [vmem:[%s13417_s2 + $0x908] sm:$0xff] }
 0x105   :  { %4370 = vmatpush.bf16.msra.mxu3 %v9280_v50  ;;  %v345_v50 = vmul.f32 %v183_v0, %v115_v32  ;;  %v9265_v54 = vld [vmem:[%s13417_s2 + $0x880] sm:$0xff]  ;;  %v9284_v0 = vld [vmem:[%s13417_s2 + $0x918] sm:$0xff]  ;;  %v9290_v46 = vld [vmem:[%s13417_s2 + $0x948] sm:$0xff] }
 0x106   :  { %4329 = vmatpush.bf16.msra.mxu0 %v9255_v55  ;;  %v4085_v15 = vpop.f32.mrf.mxu2  ;;  %v290_v55 = vmul.f32 %v182_v34, %v60_v35  ;;  %v9308_v35 = vld [vmem:[%s13417_s2 + $0x9d8] sm:$0xff] }
 0x107   :  { %4343 = vmatpush.bf16.msra.mxu1 %v9263_v56  ;;  %v4086_v57 = vadd.f32 %v4085_v15, %v4072_v11  ;;  %v4099_v17 = vpop.f32.mrf.mxu3  ;;  %v344_v56 = vmul.f32 %v182_v34, %v114_v22  ;;  %v399_v4 = vpack.c.bf16 %v345_v50, %v291_v47  ;;  %v9286_v15 = vld [vmem:[%s13417_s2 + $0x928] sm:$0xff]  ;;  %v63_v50 = vld [vmem:[%s13419_s0 + $0x120] sm:$0xff] }
 0x108   :  { %4357 = vmatpush.bf16.msra.mxu2 %v9271_v58  ;;  %v9288_v58 = vld [vmem:[%s13417_s2 + $0x938] sm:$0xff]  ;;  %v9298_v47 = vld [vmem:[%s13417_s2 + $0x988] sm:$0xff] }
 0x109   :  { %4371 = vmatpush.bf16.msra.mxu3 %v9279_v59  ;;  %v10723_v18 = vadd.f32 %v4099_v17, %v4086_v57  ;;  %v9296_v59 = vld [vmem:[%s13417_s2 + $0x978] sm:$0xff]  ;;  %v9302_v17 = vld [vmem:[%s13417_s2 + $0x9a8] sm:$0xff] }
 0x10a   :  { %4330 = vmatpush.bf16.msra.mxu0 %v9254_v61  ;;  %v292_v61 = vmul.f32 %v184_v37, %v62_v41  ;;  %v9291_v41 = vld [vmem:[%s13417_s2 + $0x950] sm:$0xff] }
 0x10b   :  { %4344 = vmatpush.bf16.msra.mxu1 %v9262_v62  ;;  %v346_v62 = vmul.f32 %v184_v37, %v116_v43  ;;  %v9299_v43 = vld [vmem:[%s13417_s2 + $0x990] sm:$0xff] }
 0x10c   :  { %4358 = vmatpush.bf16.msra.mxu2 %v9270_v63  ;;  %v9304_v63 = vld [vmem:[%s13417_s2 + $0x9b8] sm:$0xff] }
 0x10d   :  { %4372 = vmatpush.bf16.msra.mxu3 %v9278_v2  ;;  %v9273_v2 = vld [vmem:[%s13417_s2 + $0x8c0] sm:$0xff]  ;;  %v400_v11 = vpack.c.bf16 %v346_v62, %v292_v61  ;;  %v64_v61 = vld [vmem:[%s13419_s0 + $0x128] sm:$0xff]  ;;  %v118_v62 = vld [vmem:[%s13419_s0 + $0x2d8] sm:$0xff] }
 0x10e   :  { %4331 = vmatpush.bf16.msra.mxu0 %v9253_v5  ;;  %v10803_v5 = vpop.f32.mrf.mxu0  ;;  %v10825_v57 = vpop.f32.mrf.mxu2 }
 0x10f   :  { %4345 = vmatpush.bf16.msra.mxu1 %v9261_v9  ;;  %v398_v9 = vpack.c.bf16 %v344_v56, %v290_v55  ;;  %v117_v55 = vld [vmem:[%s13419_s0 + $0x2d0] sm:$0xff] }
 0x110   :  { %4359 = vmatpush.bf16.msra.mxu2 %v9269_v10  ;;  %v10808_v10 = vpop.f32.mrf.mxu1  ;;  %v65_v56 = vld [vmem:[%s13419_s0 + $0x130] sm:$0xff] }
 0x111   :  { %4373 = vmatpush.bf16.msra.mxu3 %v9277_v6  ;;  %v9287_v6 = vld [vmem:[%s13417_s2 + $0x930] sm:$0xff] }
 0x112   :  { %4332 = vmatpush.bf16.msra.mxu0 %v9252_v12  ;;  %v9295_v12 = vld [vmem:[%s13417_s2 + $0x970] sm:$0xff] }
 0x113   :  { %4346 = vmatpush.bf16.msra.mxu1 %v9260_v13  ;;  %v9303_v13 = vld [vmem:[%s13417_s2 + $0x9b0] sm:$0xff] }
 0x114   :  { %4360 = vmatpush.bf16.msra.mxu2 %v9268_v14  ;;  %v9311_v14 = vld [vmem:[%s13417_s2 + $0x9f0] sm:$0xff] }
 0x115   :  { %4374 = vmatpush.bf16.msra.mxu3 %v9276_v16  ;;  %v9294_v16 = vld [vmem:[%s13417_s2 + $0x968] sm:$0xff] }
 0x116   :  { %4333 = vmatpush.bf16.msra.mxu0 %v9251_v19  ;;  %v10833_v19 = vpop.f32.mrf.mxu3 }
 0x117   :  { %4347 = vmatpush.bf16.msra.mxu1 %v9259_v20  ;;  %v9310_v20 = vld [vmem:[%s13417_s2 + $0x9e8] sm:$0xff] }
 0x118   :  { %4361 = vmatpush.bf16.msra.mxu2 %v9267_v8 }
 0x119   :  { %4375 = vmatpush.bf16.msra.mxu3 %v9275_v23 }
 0x11a   :  { %4334 = vmatpush.bf16.msra.mxu0 %v9250_v24  ;;  %v9285_v24 = vld [vmem:[%s13417_s2 + $0x920] sm:$0xff] }
 0x11b   :  { %4348 = vmatpush.bf16.msra.mxu1 %v9258_v25 }
 0x11c   :  { %4362 = vmatpush.bf16.msra.mxu2 %v9266_v26  ;;  %v9293_v26 = vld [vmem:[%s13417_s2 + $0x960] sm:$0xff] }
 0x11d   :  { %4376 = vmatpush.bf16.msra.mxu3 %v9274_v39  ;;  %v9283_v39 = vld [vmem:[%s13417_s2 + $0x910] sm:$0xff] }
 0x11e   :  { %4335 = vmatpush.bf16.msra.mxu0 %v9249_v44  ;;  %v4113_v8 = vpop.f32.mrf.mxu0  ;;  %v9307_v44 = vld [vmem:[%s13417_s2 + $0x9d0] sm:$0xff] }
 0x11f   :  { %4349 = vmatpush.bf16.msra.mxu1 %v9257_v52  ;;  %v4114_v23 = vadd.f32 %v4113_v8, %v10723_v18  ;;  %v4127_v25 = vpop.f32.mrf.mxu1  ;;  %v9309_v18 = vld [vmem:[%s13417_s2 + $0x9e0] sm:$0xff]  ;;  %v185_v52 = vperm.slane %v10737_v21, 4 }
 0x120   :  { %4363 = vmatpush.bf16.msra.mxu2 %v9265_v54  ;;  %v187_v54 = vperm.slane %v10737_v21, 6 }
 0x121   :  { %4377 = vmatpush.bf16.msra.mxu3 %v9273_v2  ;;  %4336 = vmatmul.bf16.vlgmr.msra.gmra.mxu0 %v397_v3  ;;  %v4128_v29 = vadd.f32 %v4127_v25, %v4114_v23  ;;  %v9306_v2 = vld [vmem:[%s13417_s2 + $0x9c8] sm:$0xff]  ;;  %v66_v3 = vld [vmem:[%s13419_s0 + $0x138] sm:$0xff] }
 0x122   :  { %4384 = vmatpush.bf16.msrb.mxu0 %v9288_v58  ;;  %4350 = vmatmul.bf16.vlgmr.msra.gmra.mxu1 %v398_v9  ;;  %v119_v58 = vld [vmem:[%s13419_s0 + $0x2e0] sm:$0xff]  ;;  %v293_v9 = vmul.f32 %v185_v52, %v63_v50  ;;  %v9336_v23 = vld [vmem:[%s13417_s2 + $0xab8] sm:$0xff] }
 0x123   :  { %4398 = vmatpush.bf16.msrb.mxu1 %v9296_v59  ;;  %4364 = vmatmul.bf16.vlgmr.msra.gmra.mxu2 %v399_v4  ;;  %v186_v59 = vperm.slane %v10737_v21, 5  ;;  %v120_v4 = vld [vmem:[%s13419_s0 + $0x2e8] sm:$0xff]  ;;  %v9325_v50 = vld [vmem:[%s13417_s2 + $0xa60] sm:$0xff] }
 0x124   :  { %4412 = vmatpush.bf16.msrb.mxu2 %v9304_v63  ;;  %4378 = vmatmul.bf16.vlgmr.msra.gmra.mxu3 %v400_v11  ;;  %v188_v63 = vperm.slane %v10737_v21, 7  ;;  %v347_v21 = vmul.f32 %v185_v52, %v117_v55  ;;  %v295_v11 = vmul.f32 %v187_v54, %v65_v56  ;;  %v9333_v52 = vld [vmem:[%s13417_s2 + $0xaa0] sm:$0xff]  ;;  %v9316_v55 = vld [vmem:[%s13417_s2 + $0xa18] sm:$0xff] }
 0x125   :  { %4426 = vmatpush.bf16.msrb.mxu3 %v9312_v7  ;;  %v9281_v7 = vld [vmem:[%s13417_s2 + $0x900] sm:$0xff]  ;;  %v9324_v56 = vld [vmem:[%s13417_s2 + $0xa58] sm:$0xff] }
 0x126   :  { %4385 = vmatpush.bf16.msrb.mxu0 %v9287_v6  ;;  %v4141_v32 = vpop.f32.mrf.mxu2  ;;  %v349_v6 = vmul.f32 %v187_v54, %v119_v58  ;;  %v350_v8 = vmul.f32 %v188_v63, %v120_v4  ;;  %v401_v25 = vpack.c.bf16 %v347_v21, %v293_v9  ;;  %v9332_v58 = vld [vmem:[%s13417_s2 + $0xa98] sm:$0xff]  ;;  %v9314_v4 = vld [vmem:[%s13417_s2 + $0xa08] sm:$0xff]  ;;  %v67_v21 = vld [vmem:[%s13419_s0 + $0x140] sm:$0xff] }
 0x127   :  { %4399 = vmatpush.bf16.msrb.mxu1 %v9295_v12  ;;  %v4142_v34 = vadd.f32 %v4141_v32, %v4128_v29  ;;  %v4155_v22 = vpop.f32.mrf.mxu3  ;;  %v9289_v12 = vld [vmem:[%s13417_s2 + $0x940] sm:$0xff]  ;;  %v9344_v29 = vld [vmem:[%s13417_s2 + $0xaf8] sm:$0xff]  ;;  %v9327_v32 = vld [vmem:[%s13417_s2 + $0xa70] sm:$0xff] }
 0x128   :  { %4413 = vmatpush.bf16.msrb.mxu2 %v9303_v13  ;;  %v9297_v13 = vld [vmem:[%s13417_s2 + $0x980] sm:$0xff]  ;;  %v9330_v9 = vld [vmem:[%s13417_s2 + $0xa88] sm:$0xff] }
 0x129   :  { %4427 = vmatpush.bf16.msrb.mxu3 %v9311_v14  ;;  %v10863_v37 = vadd.f32 %v4155_v22, %v4142_v34  ;;  %v294_v14 = vmul.f32 %v186_v59, %v64_v61  ;;  %v9335_v34 = vld [vmem:[%s13417_s2 + $0xab0] sm:$0xff]  ;;  %v9318_v22 = vld [vmem:[%s13417_s2 + $0xa28] sm:$0xff] }
 0x12a   :  { %4386 = vmatpush.bf16.msrb.mxu0 %v9286_v15  ;;  %v348_v15 = vmul.f32 %v186_v59, %v118_v62  ;;  %v9340_v59 = vld [vmem:[%s13417_s2 + $0xad8] sm:$0xff]  ;;  %v9315_v61 = vld [vmem:[%s13417_s2 + $0xa10] sm:$0xff] }
 0x12b   :  { %4400 = vmatpush.bf16.msrb.mxu1 %v9294_v16  ;;  %v9320_v16 = vld [vmem:[%s13417_s2 + $0xa38] sm:$0xff]  ;;  %v9323_v62 = vld [vmem:[%s13417_s2 + $0xa50] sm:$0xff] }
 0x12c   :  { %4414 = vmatpush.bf16.msrb.mxu2 %v9302_v17  ;;  %v9328_v17 = vld [vmem:[%s13417_s2 + $0xa78] sm:$0xff] }
 0x12d   :  { %4428 = vmatpush.bf16.msrb.mxu3 %v9310_v20  ;;  %v296_v20 = vmul.f32 %v188_v63, %v66_v3  ;;  %v9331_v63 = vld [vmem:[%s13417_s2 + $0xa90] sm:$0xff] }
 0x12e   :  { %4387 = vmatpush.bf16.msrb.mxu0 %v9285_v24  ;;  %v9305_v24 = vld [vmem:[%s13417_s2 + $0x9c0] sm:$0xff]  ;;  %v9339_v3 = vld [vmem:[%s13417_s2 + $0xad0] sm:$0xff] }
 0x12f   :  { %4401 = vmatpush.bf16.msrb.mxu1 %v9293_v26  ;;  %v403_v26 = vpack.c.bf16 %v349_v6, %v295_v11 }
 0x130   :  { %4415 = vmatpush.bf16.msrb.mxu2 %v9301_v27  ;;  %v10938_v27 = vpop.f32.mrf.mxu0 }
 0x131   :  { %4429 = vmatpush.bf16.msrb.mxu3 %v9309_v18  ;;  %v402_v18 = vpack.c.bf16 %v348_v15, %v294_v14  ;;  %v123_v14 = vld [vmem:[%s13419_s0 + $0x300] sm:$0xff] }
 0x132   :  { %4388 = vmatpush.bf16.msrb.mxu0 %v9284_v0  ;;  %v10943_v0 = vpop.f32.mrf.mxu1 }
 0x133   :  { %4402 = vmatpush.bf16.msrb.mxu1 %v9292_v30  ;;  %v404_v30 = vpack.c.bf16 %v350_v8, %v296_v20  ;;  %v9338_v8 = vld [vmem:[%s13417_s2 + $0xac8] sm:$0xff] }
 0x134   :  { %4416 = vmatpush.bf16.msrb.mxu2 %v9300_v31  ;;  %v9319_v31 = vld [vmem:[%s13417_s2 + $0xa30] sm:$0xff] }
 0x135   :  { %4430 = vmatpush.bf16.msrb.mxu3 %v9308_v35  ;;  %v9343_v35 = vld [vmem:[%s13417_s2 + $0xaf0] sm:$0xff] }
 0x136   :  { %4389 = vmatpush.bf16.msrb.mxu0 %v9283_v39  ;;  %v9326_v39 = vld [vmem:[%s13417_s2 + $0xa68] sm:$0xff] }
 0x137   :  { %4403 = vmatpush.bf16.msrb.mxu1 %v9291_v41  ;;  %v9334_v41 = vld [vmem:[%s13417_s2 + $0xaa8] sm:$0xff] }
 0x138   :  { %4417 = vmatpush.bf16.msrb.mxu2 %v9299_v43  ;;  %v9342_v43 = vld [vmem:[%s13417_s2 + $0xae8] sm:$0xff] }
 0x139   :  { %4431 = vmatpush.bf16.msrb.mxu3 %v9307_v44 }
 0x13a   :  { %4390 = vmatpush.bf16.msrb.mxu0 %v9282_v45 }
 0x13b   :  { %4404 = vmatpush.bf16.msrb.mxu1 %v9290_v46  ;;  %v9317_v46 = vld [vmem:[%s13417_s2 + $0xa20] sm:$0xff] }
 0x13c   :  { %4418 = vmatpush.bf16.msrb.mxu2 %v9298_v47 }
 0x13d   :  { %4432 = vmatpush.bf16.msrb.mxu3 %v9306_v2  ;;  %v11008_v2 = vld [vmem:[%s13418_s1 + $0x28] sm:$0xff] }
 0x13e   :  { %4391 = vmatpush.bf16.msrb.mxu0 %v9281_v7  ;;  %v4169_v44 = vpop.f32.mrf.mxu0  ;;  %v9322_v7 = vld [vmem:[%s13417_s2 + $0xa48] sm:$0xff]  ;;  %v189_v11 = vperm.slane %v11008_v2, 0  ;;  %v191_v6 = vperm.slane %v11008_v2, 2  ;;  %v190_v15 = vperm.slane %v11008_v2, 1  ;;  %v192_v20 = vperm.slane %v11008_v2, 3 }
 0x13f   :  { %4405 = vmatpush.bf16.msrb.mxu1 %v9289_v12  ;;  %v4170_v45 = vadd.f32 %v4169_v44, %v10863_v37  ;;  %v4183_v47 = vpop.f32.mrf.mxu1  ;;  %v9341_v37 = vld [vmem:[%s13417_s2 + $0xae0] sm:$0xff]  ;;  %v121_v12 = vld [vmem:[%s13419_s0 + $0x2f0] sm:$0xff]  ;;  %v9368_v44 = vld [vmem:[%s13417_s2 + $0xbb8] sm:$0xff] }
 0x140   :  { %4419 = vmatpush.bf16.msrb.mxu2 %v9297_v13  ;;  %v69_v13 = vld [vmem:[%s13419_s0 + $0x150] sm:$0xff] }
 0x141   :  { %4433 = vmatpush.bf16.msrb.mxu3 %v9305_v24  ;;  %4392 = vmatmul.bf16.vlgmr.msrb.gmra.mxu0 %v401_v25  ;;  %v10979_v54 = vadd.f32 %v4183_v47, %v4170_v45  ;;  %v124_v24 = vld [vmem:[%s13419_s0 + $0x308] sm:$0xff]  ;;  %v9313_v25 = vld [vmem:[%s13417_s2 + $0xa00] sm:$0xff] }
 0x142   :  { %4440 = vmatpush.bf16.msra.mxu0 %v9320_v16  ;;  %4406 = vmatmul.bf16.vlgmr.msrb.gmra.mxu1 %v402_v18  ;;  %v68_v16 = vld [vmem:[%s13419_s0 + $0x148] sm:$0xff]  ;;  %v299_v18 = vmul.f32 %v191_v6, %v69_v13  ;;  %v9337_v45 = vld [vmem:[%s13417_s2 + $0xac0] sm:$0xff]  ;;  %v9372_v13 = vld [vmem:[%s13417_s2 + $0xbd8] sm:$0xff] }
 0x143   :  { %4454 = vmatpush.bf16.msra.mxu1 %v9328_v17  ;;  %4420 = vmatmul.bf16.vlgmr.msrb.gmra.mxu2 %v403_v26  ;;  %v122_v17 = vld [vmem:[%s13419_s0 + $0x2f8] sm:$0xff]  ;;  %v297_v26 = vmul.f32 %v189_v11, %v67_v21  ;;  %v9373_v21 = vld [vmem:[%s13417_s2 + $0xbe0] sm:$0xff] }
 0x144   :  { %4468 = vmatpush.bf16.msra.mxu2 %v9336_v23  ;;  %4434 = vmatmul.bf16.vlgmr.msrb.gmra.mxu3 %v404_v30  ;;  %v70_v23 = vld [vmem:[%s13419_s0 + $0x158] sm:$0xff]  ;;  %v353_v30 = vmul.f32 %v191_v6, %v123_v14  ;;  %v9347_v14 = vld [vmem:[%s13417_s2 + $0xb10] sm:$0xff] }
 0x145   :  { %4482 = vmatpush.bf16.msra.mxu3 %v9344_v29  ;;  %v351_v29 = vmul.f32 %v189_v11, %v121_v12  ;;  %v9348_v11 = vld [vmem:[%s13417_s2 + $0xb18] sm:$0xff] }
 0x146   :  { %4441 = vmatpush.bf16.msra.mxu0 %v9319_v31  ;;  %v9321_v31 = vld [vmem:[%s13417_s2 + $0xa40] sm:$0xff]  ;;  %v407_v47 = vpack.c.bf16 %v353_v30, %v299_v18  ;;  %v9356_v6 = vld [vmem:[%s13417_s2 + $0xb58] sm:$0xff]  ;;  %v73_v18 = vld [vmem:[%s13419_s0 + $0x170] sm:$0xff] }
 0x147   :  { %4455 = vmatpush.bf16.msra.mxu1 %v9327_v32  ;;  %v9329_v32 = vld [vmem:[%s13417_s2 + $0xa80] sm:$0xff]  ;;  %v9364_v12 = vld [vmem:[%s13417_s2 + $0xb98] sm:$0xff] }
 0x148   :  { %4469 = vmatpush.bf16.msra.mxu2 %v9335_v34  ;;  %v298_v34 = vmul.f32 %v190_v15, %v68_v16  ;;  %v9363_v16 = vld [vmem:[%s13417_s2 + $0xb90] sm:$0xff]  ;;  %v127_v30 = vld [vmem:[%s13419_s0 + $0x320] sm:$0xff] }
 0x149   :  { %4483 = vmatpush.bf16.msra.mxu3 %v9343_v35  ;;  %v352_v35 = vmul.f32 %v190_v15, %v122_v17  ;;  %v9355_v15 = vld [vmem:[%s13417_s2 + $0xb50] sm:$0xff] }
 0x14a   :  { %4442 = vmatpush.bf16.msra.mxu0 %v9318_v22  ;;  %v9352_v22 = vld [vmem:[%s13417_s2 + $0xb38] sm:$0xff]  ;;  %v9371_v17 = vld [vmem:[%s13417_s2 + $0xbd0] sm:$0xff] }
 0x14b   :  { %4456 = vmatpush.bf16.msra.mxu1 %v9326_v39  ;;  %v9360_v39 = vld [vmem:[%s13417_s2 + $0xb78] sm:$0xff] }
 0x14c   :  { %4470 = vmatpush.bf16.msra.mxu2 %v9334_v41  ;;  %v300_v41 = vmul.f32 %v192_v20, %v70_v23  ;;  %v9362_v23 = vld [vmem:[%s13417_s2 + $0xb88] sm:$0xff] }
 0x14d   :  { %4484 = vmatpush.bf16.msra.mxu3 %v9342_v43  ;;  %v354_v43 = vmul.f32 %v192_v20, %v124_v24  ;;  %v9346_v20 = vld [vmem:[%s13417_s2 + $0xb08] sm:$0xff]  ;;  %v71_v24 = vld [vmem:[%s13419_s0 + $0x160] sm:$0xff] }
 0x14e   :  { %4443 = vmatpush.bf16.msra.mxu0 %v9317_v46  ;;  %v405_v46 = vpack.c.bf16 %v351_v29, %v297_v26  ;;  %v195_v26 = vperm.slane %v11008_v2, 6  ;;  %v125_v29 = vld [vmem:[%s13419_s0 + $0x310] sm:$0xff] }
 0x14f   :  { %4457 = vmatpush.bf16.msra.mxu1 %v9325_v50  ;;  %v9376_v50 = vld [vmem:[%s13417_s2 + $0xbf8] sm:$0xff] }
 0x150   :  { %4471 = vmatpush.bf16.msra.mxu2 %v9333_v52  ;;  %v406_v52 = vpack.c.bf16 %v352_v35, %v298_v34  ;;  %v126_v34 = vld [vmem:[%s13419_s0 + $0x318] sm:$0xff]  ;;  %v196_v35 = vperm.slane %v11008_v2, 7 }
 0x151   :  { %4485 = vmatpush.bf16.msra.mxu3 %v9341_v37  ;;  %v408_v37 = vpack.c.bf16 %v354_v43, %v300_v41  ;;  %v128_v41 = vld [vmem:[%s13419_s0 + $0x328] sm:$0xff]  ;;  %v9345_v43 = vld [vmem:[%s13417_s2 + $0xb00] sm:$0xff] }
 0x152   :  { %4444 = vmatpush.bf16.msra.mxu0 %v9316_v55  ;;  %v9351_v55 = vld [vmem:[%s13417_s2 + $0xb30] sm:$0xff] }
 0x153   :  { %4458 = vmatpush.bf16.msra.mxu1 %v9324_v56  ;;  %v9359_v56 = vld [vmem:[%s13417_s2 + $0xb70] sm:$0xff] }
 0x154   :  { %4472 = vmatpush.bf16.msra.mxu2 %v9332_v58  ;;  %v9367_v58 = vld [vmem:[%s13417_s2 + $0xbb0] sm:$0xff] }
 0x155   :  { %4486 = vmatpush.bf16.msra.mxu3 %v9340_v59  ;;  %v9375_v59 = vld [vmem:[%s13417_s2 + $0xbf0] sm:$0xff] }
 0x156   :  { %4445 = vmatpush.bf16.msra.mxu0 %v9315_v61  ;;  %v9350_v61 = vld [vmem:[%s13417_s2 + $0xb28] sm:$0xff] }
 0x157   :  { %4459 = vmatpush.bf16.msra.mxu1 %v9323_v62  ;;  %v9358_v62 = vld [vmem:[%s13417_s2 + $0xb68] sm:$0xff] }
 0x158   :  { %4473 = vmatpush.bf16.msra.mxu2 %v9331_v63  ;;  %v9366_v63 = vld [vmem:[%s13417_s2 + $0xba8] sm:$0xff] }
 0x159   :  { %4487 = vmatpush.bf16.msra.mxu3 %v9339_v3  ;;  %v9374_v3 = vld [vmem:[%s13417_s2 + $0xbe8] sm:$0xff] }
 0x15a   :  { %4446 = vmatpush.bf16.msra.mxu0 %v9314_v4  ;;  %v9349_v4 = vld [vmem:[%s13417_s2 + $0xb20] sm:$0xff] }
 0x15b   :  { %4460 = vmatpush.bf16.msra.mxu1 %v9322_v7  ;;  %v9357_v7 = vld [vmem:[%s13417_s2 + $0xb60] sm:$0xff] }
 0x15c   :  { %4474 = vmatpush.bf16.msra.mxu2 %v9330_v9  ;;  %v9365_v9 = vld [vmem:[%s13417_s2 + $0xba0] sm:$0xff] }
 0x15d   :  { %4488 = vmatpush.bf16.msra.mxu3 %v9338_v8  ;;  %v9354_v8 = vld [vmem:[%s13417_s2 + $0xb48] sm:$0xff] }
 0x15e   :  { %4447 = vmatpush.bf16.msra.mxu0 %v9313_v25  ;;  %v193_v25 = vperm.slane %v11008_v2, 4 }
 0x15f   :  { %4461 = vmatpush.bf16.msra.mxu1 %v9321_v31  ;;  %v194_v31 = vperm.slane %v11008_v2, 5 }
 0x160   :  { %4475 = vmatpush.bf16.msra.mxu2 %v9329_v32  ;;  %v72_v32 = vld [vmem:[%s13419_s0 + $0x168] sm:$0xff]  ;;  %v355_v2 = vmul.f32 %v193_v25, %v125_v29  ;;  %v9404_v29 = vld [vmem:[%s13417_s2 + $0xcd8] sm:$0xff] }
 0x161   :  { %4489 = vmatpush.bf16.msra.mxu3 %v9337_v45  ;;  %4448 = vmatmul.bf16.vlgmr.msra.gmra.mxu0 %v405_v46  ;;  %v303_v45 = vmul.f32 %v195_v26, %v73_v18  ;;  %v357_v46 = vmul.f32 %v195_v26, %v127_v30  ;;  %v9396_v26 = vld [vmem:[%s13417_s2 + $0xc98] sm:$0xff]  ;;  %v9379_v18 = vld [vmem:[%s13417_s2 + $0xc10] sm:$0xff] }
 0x162   :  { %4496 = vmatpush.bf16.msrb.mxu0 %v9352_v22  ;;  %4462 = vmatmul.bf16.vlgmr.msra.gmra.mxu1 %v406_v52  ;;  %v9370_v22 = vld [vmem:[%s13417_s2 + $0xbc8] sm:$0xff]  ;;  %v302_v52 = vmul.f32 %v194_v31, %v72_v32  ;;  %v11255_v30 = vld [vmem:[%s13418_s1 + $0x30] sm:$0x3f] }
 0x163   :  { %4510 = vmatpush.bf16.msrb.mxu1 %v9360_v39  ;;  %4476 = vmatmul.bf16.vlgmr.msra.gmra.mxu2 %v407_v47  ;;  %v74_v39 = vld [vmem:[%s13419_s0 + $0x178] sm:$0xff]  ;;  %v9353_v47 = vld [vmem:[%s13417_s2 + $0xb40] sm:$0xff]  ;;  %v9395_v32 = vld [vmem:[%s13417_s2 + $0xc90] sm:$0xff] }
 0x164   :  { %4524 = vmatpush.bf16.msrb.mxu2 %v9368_v44  ;;  %4490 = vmatmul.bf16.vlgmr.msra.gmra.mxu3 %v408_v37  ;;  %v301_v44 = vmul.f32 %v193_v25, %v71_v24  ;;  %v356_v37 = vmul.f32 %v194_v31, %v126_v34  ;;  %v9380_v24 = vld [vmem:[%s13417_s2 + $0xc18] sm:$0xff]  ;;  %v9387_v31 = vld [vmem:[%s13417_s2 + $0xc50] sm:$0xff] }
 0x165   :  { %4538 = vmatpush.bf16.msrb.mxu3 %v9376_v50  ;;  %v9361_v50 = vld [vmem:[%s13417_s2 + $0xb80] sm:$0xff]  ;;  %v9388_v25 = vld [vmem:[%s13417_s2 + $0xc58] sm:$0xff]  ;;  %v9403_v34 = vld [vmem:[%s13417_s2 + $0xcd0] sm:$0xff] }
 0x166   :  { %4497 = vmatpush.bf16.msrb.mxu0 %v9351_v55  ;;  %v9384_v55 = vld [vmem:[%s13417_s2 + $0xc38] sm:$0xff] }
 0x167   :  { %4511 = vmatpush.bf16.msrb.mxu1 %v9359_v56  ;;  %v9392_v56 = vld [vmem:[%s13417_s2 + $0xc78] sm:$0xff] }
 0x168   :  { %4525 = vmatpush.bf16.msrb.mxu2 %v9367_v58  ;;  %v304_v58 = vmul.f32 %v196_v35, %v74_v39  ;;  %v9394_v39 = vld [vmem:[%s13417_s2 + $0xc88] sm:$0xff] }
 0x169   :  { %4539 = vmatpush.bf16.msrb.mxu3 %v9375_v59  ;;  %v358_v59 = vmul.f32 %v196_v35, %v128_v41  ;;  %v9378_v35 = vld [vmem:[%s13417_s2 + $0xc08] sm:$0xff]  ;;  %v197_v41 = vperm.slane %v11255_v30, 0 }
 0x16a   :  { %4498 = vmatpush.bf16.msrb.mxu0 %v9350_v61  ;;  %v9400_v61 = vld [vmem:[%s13417_s2 + $0xcb8] sm:$0xff] }
 0x16b   :  { %4512 = vmatpush.bf16.msrb.mxu1 %v9358_v62  ;;  %v9369_v62 = vld [vmem:[%s13417_s2 + $0xbc0] sm:$0xff] }
 0x16c   :  { %4526 = vmatpush.bf16.msrb.mxu2 %v9366_v63  ;;  %v409_v63 = vpack.c.bf16 %v355_v2, %v301_v44  ;;  %v129_v44 = vld [vmem:[%s13419_s0 + $0x330] sm:$0xff] }
 0x16d   :  { %4540 = vmatpush.bf16.msrb.mxu3 %v9374_v3  ;;  %v411_v3 = vpack.c.bf16 %v357_v46, %v303_v45  ;;  %v77_v2 = vld [vmem:[%s13419_s0 + $0x190] sm:$0xff]  ;;  %v199_v45 = vperm.slane %v11255_v30, 2  ;;  %v198_v46 = vperm.slane %v11255_v30, 1 }
 0x16e   :  { %4499 = vmatpush.bf16.msrb.mxu0 %v9349_v4  ;;  %v9408_v4 = vld [vmem:[%s13417_s2 + $0xcf8] sm:$0xff] }
 0x16f   :  { %4513 = vmatpush.bf16.msrb.mxu1 %v9357_v7  ;;  %v410_v7 = vpack.c.bf16 %v356_v37, %v302_v52  ;;  %v130_v52 = vld [vmem:[%s13419_s0 + $0x338] sm:$0xff]  ;;  %v200_v37 = vperm.slane %v11255_v30, 3 }
 0x170   :  { %4527 = vmatpush.bf16.msrb.mxu2 %v9365_v9  ;;  %v412_v9 = vpack.c.bf16 %v358_v59, %v304_v58  ;;  %v359_v58 = vmul.f32 %v197_v41, %v129_v44  ;;  %v78_v59 = vld [vmem:[%s13419_s0 + $0x198] sm:$0xff]  ;;  %v201_v44 = vperm.slane %v11255_v30, 4 }
 0x171   :  { %4541 = vmatpush.bf16.msrb.mxu3 %v9373_v21  ;;  %v9383_v21 = vld [vmem:[%s13417_s2 + $0xc30] sm:$0xff] }
 0x172   :  { %4500 = vmatpush.bf16.msrb.mxu0 %v9348_v11  ;;  %v9391_v11 = vld [vmem:[%s13417_s2 + $0xc70] sm:$0xff] }
 0x173   :  { %4514 = vmatpush.bf16.msrb.mxu1 %v9356_v6  ;;  %v9399_v6 = vld [vmem:[%s13417_s2 + $0xcb0] sm:$0xff] }
 0x174   :  { %4528 = vmatpush.bf16.msrb.mxu2 %v9364_v12  ;;  %v9407_v12 = vld [vmem:[%s13417_s2 + $0xcf0] sm:$0xff] }
 0x175   :  { %4542 = vmatpush.bf16.msrb.mxu3 %v9372_v13  ;;  %v9382_v13 = vld [vmem:[%s13417_s2 + $0xc28] sm:$0xff] }
 0x176   :  { %4501 = vmatpush.bf16.msrb.mxu0 %v9347_v14  ;;  %v9390_v14 = vld [vmem:[%s13417_s2 + $0xc68] sm:$0xff] }
 0x177   :  { %4515 = vmatpush.bf16.msrb.mxu1 %v9355_v15  ;;  %v9398_v15 = vld [vmem:[%s13417_s2 + $0xca8] sm:$0xff] }
 0x178   :  { %4529 = vmatpush.bf16.msrb.mxu2 %v9363_v16  ;;  %v9406_v16 = vld [vmem:[%s13417_s2 + $0xce8] sm:$0xff] }
 0x179   :  { %4543 = vmatpush.bf16.msrb.mxu3 %v9371_v17  ;;  %v9381_v17 = vld [vmem:[%s13417_s2 + $0xc20] sm:$0xff] }
 0x17a   :  { %4502 = vmatpush.bf16.msrb.mxu0 %v9346_v20  ;;  %v9389_v20 = vld [vmem:[%s13417_s2 + $0xc60] sm:$0xff] }
 0x17b   :  { %4516 = vmatpush.bf16.msrb.mxu1 %v9354_v8  ;;  %v9397_v8 = vld [vmem:[%s13417_s2 + $0xca0] sm:$0xff] }
 0x17c   :  { %4530 = vmatpush.bf16.msrb.mxu2 %v9362_v23  ;;  %v9405_v23 = vld [vmem:[%s13417_s2 + $0xce0] sm:$0xff] }
 0x17d   :  { %4544 = vmatpush.bf16.msrb.mxu3 %v9370_v22  ;;  %v9386_v22 = vld [vmem:[%s13417_s2 + $0xc48] sm:$0xff] }
 0x17e   :  { %4503 = vmatpush.bf16.msrb.mxu0 %v9345_v43  ;;  %v75_v43 = vld [vmem:[%s13419_s0 + $0x180] sm:$0xff] }
 0x17f   :  { %4517 = vmatpush.bf16.msrb.mxu1 %v9353_v47  ;;  %v131_v47 = vld [vmem:[%s13419_s0 + $0x340] sm:$0xff] }
 0x180   :  { %4531 = vmatpush.bf16.msrb.mxu2 %v9361_v50  ;;  %v76_v50 = vld [vmem:[%s13419_s0 + $0x188] sm:$0xff] }
 0x181   :  { %4545 = vmatpush.bf16.msrb.mxu3 %v9369_v62  ;;  %4504 = vmatmul.bf16.vlgmr.msrb.gmra.mxu0 %v409_v63  ;;  %v9377_v62 = vld [vmem:[%s13417_s2 + $0xc00] sm:$0xff]  ;;  %v307_v63 = vmul.f32 %v199_v45, %v77_v2 }
 0x182   :  { %4552 = vmatpush.bf16.msra.mxu0 %v9384_v55  ;;  %4518 = vmatmul.bf16.vlgmr.msrb.gmra.mxu1 %v410_v7  ;;  %v9402_v55 = vld [vmem:[%s13417_s2 + $0xcc8] sm:$0xff]  ;;  %v360_v7 = vmul.f32 %v198_v46, %v130_v52 }
 0x183   :  { %4566 = vmatpush.bf16.msra.mxu1 %v9392_v56  ;;  %4532 = vmatmul.bf16.vlgmr.msrb.gmra.mxu2 %v411_v3  ;;  %v305_v56 = vmul.f32 %v197_v41, %v75_v43  ;;  %v361_v3 = vmul.f32 %v199_v45, %v131_v47  ;;  %v9419_v41 = vld [vmem:[%s13417_s2 + $0xd50] sm:$0xff]  ;;  %v79_v45 = vld [vmem:[%s13419_s0 + $0x1a0] sm:$0xff]  ;;  %v202_v47 = vperm.slane %v11255_v30, 5  ;;  %v80_v52 = vld [vmem:[%s13419_s0 + $0x1a8] sm:$0xff] }
 0x184   :  { %4580 = vmatpush.bf16.msra.mxu2 %v9400_v61  ;;  %4546 = vmatmul.bf16.vlgmr.msrb.gmra.mxu3 %v412_v9  ;;  %v132_v61 = vld [vmem:[%s13419_s0 + $0x348] sm:$0xff]  ;;  %v9385_v9 = vld [vmem:[%s13417_s2 + $0xc40] sm:$0xff] }
 0x185   :  { %4594 = vmatpush.bf16.msra.mxu3 %v9408_v4  ;;  %v306_v4 = vmul.f32 %v198_v46, %v76_v50  ;;  %v133_v46 = vld [vmem:[%s13419_s0 + $0x350] sm:$0xff]  ;;  %v9418_v50 = vld [vmem:[%s13417_s2 + $0xd48] sm:$0xff] }
 0x186   :  { %4553 = vmatpush.bf16.msra.mxu0 %v9383_v21  ;;  %v9393_v21 = vld [vmem:[%s13417_s2 + $0xc80] sm:$0xff] }
 0x187   :  { %4567 = vmatpush.bf16.msra.mxu1 %v9391_v11  ;;  %v9416_v11 = vld [vmem:[%s13417_s2 + $0xd38] sm:$0xff] }
 0x188   :  { %4581 = vmatpush.bf16.msra.mxu2 %v9399_v6  ;;  %v9424_v6 = vld [vmem:[%s13417_s2 + $0xd78] sm:$0xff] }
 0x189   :  { %4595 = vmatpush.bf16.msra.mxu3 %v9407_v12  ;;  %v308_v12 = vmul.f32 %v200_v37, %v78_v59  ;;  %v363_v59 = vmul.f32 %v201_v44, %v133_v46 }
 0x18a   :  { %4554 = vmatpush.bf16.msra.mxu0 %v9382_v13  ;;  %v362_v13 = vmul.f32 %v200_v37, %v132_v61  ;;  %v134_v37 = vld [vmem:[%s13419_s0 + $0x358] sm:$0xff]  ;;  %v310_v61 = vmul.f32 %v202_v47, %v80_v52 }
 0x18b   :  { %4568 = vmatpush.bf16.msra.mxu1 %v9390_v14  ;;  %v9401_v14 = vld [vmem:[%s13417_s2 + $0xcc0] sm:$0xff] }
 0x18c   :  { %4582 = vmatpush.bf16.msra.mxu2 %v9398_v15  ;;  %v413_v15 = vpack.c.bf16 %v359_v58, %v305_v56  ;;  %v4185_v56 = vpop.f32.mrf.mxu1  ;;  %v309_v58 = vmul.f32 %v201_v44, %v79_v45 }
 0x18d   :  { %4596 = vmatpush.bf16.msra.mxu3 %v9406_v16  ;;  %v415_v16 = vpack.c.bf16 %v361_v3, %v307_v63  ;;  %v9417_v3 = vld [vmem:[%s13417_s2 + $0xd40] sm:$0xff] }
 0x18e   :  { %4555 = vmatpush.bf16.msra.mxu0 %v9381_v17  ;;  %v414_v17 = vpack.c.bf16 %v360_v7, %v306_v4  ;;  %v417_v7 = vpack.c.bf16 %v363_v59, %v309_v58 }
 0x18f   :  { %4569 = vmatpush.bf16.msra.mxu1 %v9389_v20  ;;  %v416_v20 = vpack.c.bf16 %v362_v13, %v308_v12 }
 0x190   :  { %4583 = vmatpush.bf16.msra.mxu2 %v9397_v8  ;;  %v9415_v8 = vld [vmem:[%s13417_s2 + $0xd30] sm:$0xff] }
 0x191   :  { %4597 = vmatpush.bf16.msra.mxu3 %v9405_v23  ;;  %v9423_v23 = vld [vmem:[%s13417_s2 + $0xd70] sm:$0xff] }
 0x192   :  { %4556 = vmatpush.bf16.msra.mxu0 %v9380_v24  ;;  %v9414_v24 = vld [vmem:[%s13417_s2 + $0xd28] sm:$0xff] }
 0x193   :  { %4570 = vmatpush.bf16.msra.mxu1 %v9388_v25  ;;  %v9422_v25 = vld [vmem:[%s13417_s2 + $0xd68] sm:$0xff] }
 0x194   :  { %4584 = vmatpush.bf16.msra.mxu2 %v9396_v26  ;;  %v9464_v26 = vld [vmem:[%s13420_s3] ss:$0 sm:$0xff]  ;;  %v4239_v12 = vpop.f32.mrf.mxu1 }
 0x195   :  { %4598 = vmatpush.bf16.msra.mxu3 %v9404_v29  ;;  %v3892_v29 = vadd.f32 %v9464_v26, %v10388_v28  ;;  %v9420_v28 = vld [vmem:[%s13417_s2 + $0xd58] sm:$0xff] }
 0x196   :  { %4557 = vmatpush.bf16.msra.mxu0 %v9379_v18  ;;  %v9413_v18 = vld [vmem:[%s13417_s2 + $0xd20] sm:$0xff] }
 0x197   :  { %4571 = vmatpush.bf16.msra.mxu1 %v9387_v31  ;;  %v9421_v31 = vld [vmem:[%s13417_s2 + $0xd60] sm:$0xff] }
 0x198   :  { %4585 = vmatpush.bf16.msra.mxu2 %v9395_v32  ;;  %v3906_v32 = vadd.f32 %v10393_v33, %v3892_v29  ;;  %v9411_v33 = vld [vmem:[%s13417_s2 + $0xd10] sm:$0xff] }
 0x199   :  { %4599 = vmatpush.bf16.msra.mxu3 %v9403_v34  ;;  %v11347_v34 = vpop.f32.mrf.mxu2 }
 0x19a   :  { %4558 = vmatpush.bf16.msra.mxu0 %v9378_v35  ;;  %v9412_v35 = vld [vmem:[%s13417_s2 + $0xd18] sm:$0xff] }
 0x19b   :  { %4572 = vmatpush.bf16.msra.mxu1 %v9386_v22  ;;  %v3920_v22 = vadd.f32 %v10407_v38, %v3906_v32  ;;  %v9410_v38 = vld [vmem:[%s13417_s2 + $0xd08] sm:$0xff] }
 0x19c   :  { %4586 = vmatpush.bf16.msra.mxu2 %v9394_v39  ;;  %v11356_v39 = vpop.f32.mrf.mxu3 }
 0x19d   :  { %4600 = vmatpush.bf16.msra.mxu3 %v9402_v55  ;;  %v3934_v43 = vadd.f32 %v10418_v42, %v3920_v22  ;;  %v4171_v55 = vpop.f32.mrf.mxu0 }
 0x19e   :  { %4559 = vmatpush.bf16.msra.mxu0 %v9377_v62  ;;  %v364_v62 = vmul.f32 %v202_v47, %v134_v37 }
 0x19f   :  { %4573 = vmatpush.bf16.msra.mxu1 %v9385_v9  ;;  %v3948_v42 = vadd.f32 %v10528_v36, %v3934_v43  ;;  %v9409_v36 = vld [vmem:[%s13417_s2 + $0xd00] sm:$0xff] }
 0x1a0   :  { %4587 = vmatpush.bf16.msra.mxu2 %v9393_v21  ;;  %v418_v9 = vpack.c.bf16 %v364_v62, %v310_v61 }
 0x1a1   :  { %4601 = vmatpush.bf16.msra.mxu3 %v9401_v14  ;;  %4560 = vmatmul.bf16.vlgmr.msra.gmra.mxu0 %v413_v15  ;;  %v4197_v2 = vpop.f32.mrf.mxu2  ;;  %v3962_v63 = vadd.f32 %v10533_v40, %v3948_v42 }
 0x1a2   :  { %4608 = vmatpush.bf16.msrb.mxu0 %v9416_v11  ;;  %4574 = vmatmul.bf16.vlgmr.msra.gmra.mxu1 %v414_v17  ;;  %v4241_v17 = vpop.f32.mrf.mxu1 }
 0x1a3   :  { %4622 = vmatpush.bf16.msrb.mxu1 %v9424_v6  ;;  %4588 = vmatmul.bf16.vlgmr.msra.gmra.mxu2 %v415_v16  ;;  %v3976_v4 = vadd.f32 %v10550_v48, %v3962_v63 }
 0x1a4   :  { %4602 = vmatmul.bf16.vlgmr.msra.gmra.mxu3 %v416_v20  ;;  %v4211_v30 = vpop.f32.mrf.mxu3 }
 0x1a5   :  { %v4225_v11 = vpop.f32.mrf.mxu0  ;;  %v3990_v6 = vadd.f32 %v10558_v51, %v3976_v4 }
 0x1a6   :  { %4609 = vmatpush.bf16.msrb.mxu0 %v9415_v8 }
 0x1a7   :  { %4623 = vmatpush.bf16.msrb.mxu1 %v9423_v23  ;;  %v4004_v40 = vadd.f32 %v10663_v49, %v3990_v6 }
 0x1a9   :  { %v4199_v21 = vpop.f32.mrf.mxu2  ;;  %v4018_v14 = vadd.f32 %v10668_v53, %v4004_v40 }
 0x1aa   :  { %4610 = vmatpush.bf16.msrb.mxu0 %v9414_v24  ;;  %v4295_v26 = vpop.f32.mrf.mxu1 }
 0x1ab   :  { %4624 = vmatpush.bf16.msrb.mxu1 %v9422_v25  ;;  %v4032_v16 = vadd.f32 %v10685_v60, %v4018_v14 }
 0x1ac   :  { %v4213_v13 = vpop.f32.mrf.mxu3 }
 0x1ad   :  { %v4227_v48 = vpop.f32.mrf.mxu0  ;;  %v4046_v8 = vadd.f32 %v10693_v1, %v4032_v16 }
 0x1ae   :  { %4611 = vmatpush.bf16.msrb.mxu0 %v9413_v18 }
 0x1af   :  { %4625 = vmatpush.bf16.msrb.mxu1 %v9421_v31  ;;  %v4060_v23 = vadd.f32 %v10803_v5, %v4046_v8 }
 0x1b1   :  { %v4253_v15 = vpop.f32.mrf.mxu2  ;;  %v4074_v25 = vadd.f32 %v10808_v10, %v4060_v23 }
 0x1b2   :  { %4612 = vmatpush.bf16.msrb.mxu0 %v9412_v35  ;;  %v4297_v32 = vpop.f32.mrf.mxu1 }
 0x1b3   :  { %4626 = vmatpush.bf16.msrb.mxu1 %v9420_v28  ;;  %v4088_v49 = vadd.f32 %v10825_v57, %v4074_v25 }
 0x1b4   :  { %v4267_v20 = vpop.f32.mrf.mxu3 }
 0x1b5   :  { %v4281_v51 = vpop.f32.mrf.mxu0  ;;  %v4102_v53 = vadd.f32 %v10833_v19, %v4088_v49 }
 0x1b6   :  { %4613 = vmatpush.bf16.msrb.mxu0 %v9411_v33  ;;  %v4198_v33 = vadd.f32 %v4197_v2, %v10979_v54 }
 0x1b7   :  { %4627 = vmatpush.bf16.msrb.mxu1 %v9419_v41  ;;  %v4116_v60 = vadd.f32 %v10938_v27, %v4102_v53 }
 0x1b8   :  { %v4212_v19 = vadd.f32 %v4211_v30, %v4198_v33 }
 0x1b9   :  { %v4255_v24 = vpop.f32.mrf.mxu2  ;;  %v4130_v1 = vadd.f32 %v10943_v0, %v4116_v60 }
 0x1ba   :  { %4614 = vmatpush.bf16.msrb.mxu0 %v9410_v38  ;;  %v4351_v57 = vpop.f32.mrf.mxu1  ;;  %v4226_v38 = vadd.f32 %v4225_v11, %v4212_v19 }
 0x1bb   :  { %4628 = vmatpush.bf16.msrb.mxu1 %v9418_v50  ;;  %v4144_v5 = vadd.f32 %v11347_v34, %v4130_v1 }
 0x1bc   :  { %v4269_v29 = vpop.f32.mrf.mxu3  ;;  %v4240_v47 = vadd.f32 %v4239_v12, %v4226_v38 }
 0x1bd   :  { %v4283_v31 = vpop.f32.mrf.mxu0  ;;  %v4158_v10 = vadd.f32 %v11356_v39, %v4144_v5 }
 0x1be   :  { %4615 = vmatpush.bf16.msrb.mxu0 %v9409_v36  ;;  %v4254_v34 = vadd.f32 %v4253_v15, %v4240_v47 }
 0x1bf   :  { %4629 = vmatpush.bf16.msrb.mxu1 %v9417_v3  ;;  %v4172_v41 = vadd.f32 %v4171_v55, %v4158_v10 }
 0x1c0   :  { %v4268_v37 = vadd.f32 %v4267_v20, %v4254_v34 }
 0x1c1   :  { %4616 = vmatmul.bf16.vlgmr.msrb.gmra.mxu0 %v417_v7  ;;  %v4309_v18 = vpop.f32.mrf.mxu2  ;;  %v4186_v44 = vadd.f32 %v4185_v56, %v4172_v41 }
 0x1c2   :  { %4630 = vmatmul.bf16.vlgmr.msrb.gmra.mxu1 %v418_v9  ;;  %v4353_v42 = vpop.f32.mrf.mxu1  ;;  %v4282_v54 = vadd.f32 %v4281_v51, %v4268_v37 }
 0x1c3   :  { %v4200_v45 = vadd.f32 %v4199_v21, %v4186_v44 }
 0x1c4   :  { %v4323_v35 = vpop.f32.mrf.mxu3  ;;  %v4296_v30 = vadd.f32 %v4295_v26, %v4282_v54 }
 0x1c5   :  { %v4337_v22 = vpop.f32.mrf.mxu0  ;;  %v4214_v50 = vadd.f32 %v4213_v13, %v4200_v45 }
 0x1c6   :  { %v4310_v61 = vadd.f32 %v4309_v18, %v4296_v30 }
 0x1c7   :  { %v4228_v52 = vadd.f32 %v4227_v48, %v4214_v50 }
 0x1c8   :  { %v4324_v4 = vadd.f32 %v4323_v35, %v4310_v61 }
 0x1c9   :  { %v4311_v28 = vpop.f32.mrf.mxu2  ;;  %v4242_v59 = vadd.f32 %v4241_v17, %v4228_v52 }
 0x1ca   :  { %v4407_v2 = vpop.f32.mrf.mxu1  ;;  %v4338_v11 = vadd.f32 %v4337_v22, %v4324_v4 }
 0x1cb   :  { %v4256_v55 = vadd.f32 %v4255_v24, %v4242_v59 }
 0x1cc   :  { %v4325_v43 = vpop.f32.mrf.mxu3  ;;  %v4352_v12 = vadd.f32 %v4351_v57, %v4338_v11 }
 0x1cd   :  { %v4339_v46 = vpop.f32.mrf.mxu0  ;;  %v4270_v56 = vadd.f32 %v4269_v29, %v4256_v55 }
 0x1cf   :  { %v4284_v63 = vadd.f32 %v4283_v31, %v4270_v56 }
 0x1d1   :  { %v4365_v27 = vpop.f32.mrf.mxu2  ;;  %v4298_v21 = vadd.f32 %v4297_v32, %v4284_v63 }
 0x1d2   :  { %v4409_v7 = vpop.f32.mrf.mxu1  ;;  %v4366_v15 = vadd.f32 %v4365_v27, %v4352_v12 }
 0x1d3   :  { %v4312_v6 = vadd.f32 %v4311_v28, %v4298_v21 }
 0x1d4   :  { %v4379_v0 = vpop.f32.mrf.mxu3 }
 0x1d5   :  { %v4393_v39 = vpop.f32.mrf.mxu0  ;;  %v4326_v14 = vadd.f32 %v4325_v43, %v4312_v6  ;;  %v4380_v20 = vadd.f32 %v4379_v0, %v4366_v15 }
 0x1d7   :  { %v4340_v48 = vadd.f32 %v4339_v46, %v4326_v14  ;;  %v4394_v23 = vadd.f32 %v4393_v39, %v4380_v20 }
 0x1d9   :  { %v4367_v58 = vpop.f32.mrf.mxu2  ;;  %v4354_v8 = vadd.f32 %v4353_v42, %v4340_v48  ;;  %v4408_v26 = vadd.f32 %v4407_v2, %v4394_v23 }
 0x1db   :  { %v4368_v51 = vadd.f32 %v4367_v58, %v4354_v8 }
 0x1dc   :  { %v4381_v36 = vpop.f32.mrf.mxu3 }
 0x1dd   :  { %v4395_v3 = vpop.f32.mrf.mxu0  ;;  %v4382_v53 = vadd.f32 %v4381_v36, %v4368_v51  ;;  %v9573_v51 = vmov 32.0  }
 0x1de   :  { %9442 = vrcp.f32 %v9573_v51 }
 0x1df   :  { %v4463_v16 = vpop.f32.mrf.mxu1  ;;  %v4396_v60 = vadd.f32 %v4395_v3, %v4382_v53 }
 0x1e1   :  { %v4421_v62 = vpop.f32.mrf.mxu2  ;;  %v4410_v1 = vadd.f32 %v4409_v7, %v4396_v60 }
 0x1e2   :  { %v4422_v18 = vadd.f32 %v4421_v62, %v4408_v26 }
 0x1e4   :  { %v4435_v9 = vpop.f32.mrf.mxu3 }
 0x1e5   :  { %v4449_v13 = vpop.f32.mrf.mxu0  ;;  %v4436_v31 = vadd.f32 %v4435_v9, %v4422_v18 }
 0x1e7   :  { %v4465_v49 = vpop.f32.mrf.mxu1  ;;  %v4450_v5 = vadd.f32 %v4449_v13, %v4436_v31 }
 0x1e9   :  { %v4423_v40 = vpop.f32.mrf.mxu2  ;;  %v4464_v33 = vadd.f32 %v4463_v16, %v4450_v5 }
 0x1ea   :  { %v4424_v22 = vadd.f32 %v4423_v40, %v4410_v1 }
 0x1ec   :  { %v4437_v17 = vpop.f32.mrf.mxu3 }
 0x1ed   :  { %v4451_v25 = vpop.f32.mrf.mxu0  ;;  %v4438_v57 = vadd.f32 %v4437_v17, %v4424_v22 }
 0x1ef   :  { %v4452_v19 = vadd.f32 %v4451_v25, %v4438_v57  ;;  %v9443_v25 = vpop.eup %9442  ;;  %v9426_v57 = vld [vmem:[%s13422_s4 + $0x8] sm:$0xff] }
 0x1f0   :  { %v4644_v26 = vmul.f32 32.0, %v9443_v25  ;;  %vm4648_vm1 = vweird.f32 %v9443_v25  ;;  %4724 = vmatpush.bf16.msrb.mxu2 %v9426_v57  ;;  %v9428_v57 = vld [vmem:[%s13423_s6 + $0x8] sm:$0xff] }
 0x1f1   :  { %v4477_v24 = vpop.f32.mrf.mxu2  ;;  %v4466_v46 = vadd.f32 %v4465_v49, %v4452_v19 }
 0x1f2   :  { %v4478_v41 = vadd.f32 %v4477_v24, %v4464_v33  ;;  %v4645_v49 = vsub.f32 1.0, %v4644_v26 }
 0x1f4   :  { %v4491_v29 = vpop.f32.mrf.mxu3 }
 0x1f5   :  { %v4492_v38 = vadd.f32 %v4491_v29, %v4478_v41  ;;  %v4646_v29 = vmul.f32 %v9443_v25, %v4645_v49 }
 0x1f7   :  { %v4647_v53 = vadd.f32 %v9443_v25, %v4646_v29  ;;  %v9430_v29 = vld [vmem:[%s13423_s6 + $0x18] sm:$0xff] }
 0x1f9   :  { %v4479_v32 = vpop.f32.mrf.mxu2  ;;  %v4649_v18 = vsel %vm4648_vm1, %v9443_v25, %v4647_v53 }
 0x1fa   :  { %v4480_v42 = vadd.f32 %v4479_v32, %v4466_v46 }
 0x1fc   :  { %v4493_v10 = vpop.f32.mrf.mxu3 }
 0x1fd   :  { %v4494_v52 = vadd.f32 %v4493_v10, %v4480_v42 }
 0x1fe   :  { %v4505_v35 = vpop.f32.mrf.mxu0 }
 0x1ff   :  { %v4519_v28 = vpop.f32.mrf.mxu1  ;;  %v4506_v47 = vadd.f32 %v4505_v35, %v4492_v38 }
 0x201   :  { %v4520_v0 = vadd.f32 %v4519_v28, %v4506_v47 }
 0x206   :  { %v4533_v43 = vpop.f32.mrf.mxu2  ;;  %v4507_v44 = vpop.f32.mrf.mxu0 }
 0x207   :  { %v4521_v27 = vpop.f32.mrf.mxu1  ;;  %v4547_v45 = vpop.f32.mrf.mxu3  ;;  %v4534_v37 = vadd.f32 %v4533_v43, %v4520_v0  ;;  %v4508_v39 = vadd.f32 %v4507_v44, %v4494_v52  ;;  %v9425_v44 = vld [vmem:[%s13422_s4] sm:$0xff] }
 0x208   :  { %4725 = vmatpush.bf16.msrb.mxu2 %v9425_v44 }
 0x209   :  { %v4548_v54 = vadd.f32 %v4547_v45, %v4534_v37  ;;  %v4522_v2 = vadd.f32 %v4521_v27, %v4508_v39 }
 0x20e   :  { %v4535_v50 = vpop.f32.mrf.mxu2 }
 0x20f   :  { %v4549_v59 = vpop.f32.mrf.mxu3  ;;  %v4536_v30 = vadd.f32 %v4535_v50, %v4522_v2  ;;  %v9438_v2 = vld [vmem:[%s13420_s3 + $0x1] ss:$0 sm:$0xff] }
 0x211   :  { %v4550_v3 = vadd.f32 %v4549_v59, %v4536_v30 }
 0x21e   :  { %v4561_v34 = vpop.f32.mrf.mxu0 }
 0x21f   :  { %v4575_v58 = vpop.f32.mrf.mxu1  ;;  %v4562_v55 = vadd.f32 %v4561_v34, %v4548_v54 }
 0x221   :  { %v4576_v61 = vadd.f32 %v4575_v58, %v4562_v55 }
 0x226   :  { %v4589_v36 = vpop.f32.mrf.mxu2  ;;  %v4563_v56 = vpop.f32.mrf.mxu0 }
 0x227   :  { %v4577_v62 = vpop.f32.mrf.mxu1  ;;  %v4603_v63 = vpop.f32.mrf.mxu3  ;;  %v4590_v4 = vadd.f32 %v4589_v36, %v4576_v61  ;;  %v4564_v7 = vadd.f32 %v4563_v56, %v4550_v3  ;;  %v9439_v56 = vld [vmem:[%s13420_s3 + $0x2] ss:$0 sm:$0xff] }
 0x229   :  { %v4604_v9 = vadd.f32 %v4603_v63, %v4590_v4  ;;  %v4578_v6 = vadd.f32 %v4577_v62, %v4564_v7 }
 0x22e   :  { %v4591_v21 = vpop.f32.mrf.mxu2 }
 0x22f   :  { %v4592_v13 = vadd.f32 %v4591_v21, %v4578_v6  ;;  %v4605_v15 = vpop.f32.mrf.mxu3 }
 0x231   :  { %v4606_v48 = vadd.f32 %v4605_v15, %v4592_v13  ;;  %v9433_v15 = vld [vmem:[%s13423_s6 + $0x30] sm:$0xff] }
 0x23e   :  { %v4617_v11 = vpop.f32.mrf.mxu0 }
 0x23f   :  { %v4618_v12 = vadd.f32 %v4617_v11, %v4604_v9  ;;  %v4631_v40 = vpop.f32.mrf.mxu1  ;;  %v9440_v9 = vld [vmem:[%s13421_s5] ss:$0 sm:$0xff] }
 0x241   :  { %v4632_v14 = vadd.f32 %v4631_v40, %v4618_v12  ;;  %v9434_v12 = vld [vmem:[%s13423_s6 + $0x38] sm:$0xff] }
 0x242   :  { %4878 = vmatpush.bf16.msrb.mxu3 %v9434_v12 }
 0x243   :  { %v4637_v16 = vsel %vm13425_vm0, %v4632_v14, 0.0 }
 0x244   :  { %4638 = vadd.xlane.f32.xlu0 %v4637_v16 }
 0x246   :  { %v4619_v17 = vpop.f32.mrf.mxu0  ;;  %4879 = vmatpush.bf16.msrb.mxu3 %v9433_v15 }
 0x247   :  { %v4620_v20 = vadd.f32 %v4619_v17, %v4606_v48  ;;  %v4633_v8 = vpop.f32.mrf.mxu1 }
 0x249   :  { %v4634_v23 = vadd.f32 %v4633_v8, %v4620_v20  ;;  %v9432_v20 = vld [vmem:[%s13423_s6 + $0x28] sm:$0xff] }
 0x24a   :  { %4880 = vmatpush.bf16.msrb.mxu3 %v9432_v20 }
 0x24b   :  { %v4640_v24 = vsel %vm13425_vm0, %v4634_v23, 0.0 }
 0x24c   :  { %4641 = vadd.xlane.f32.xlu0 %v4640_v24  ;;  %v9431_v24 = vld [vmem:[%s13423_s6 + $0x20] sm:$0xff] }
 0x24e   :  { %4881 = vmatpush.bf16.msrb.mxu3 %v9431_v24 }
 0x252   :  { %4882 = vmatpush.bf16.msrb.mxu3 %v9430_v29 }
 0x2b7   :  { %v4639_v60 = vpop.xlane.xlu0 %4638 }
 0x2b8   :  { %v4650_v31 = vmul.f32 %v4649_v18, %v4639_v60 }
 0x2ba   :  { %v4652_v32 = vsub.f32 %v4632_v14, %v4650_v31 }
 0x2bc   :  { %v4654_v35 = vmul.f32 %v4652_v32, %v4652_v32 }
 0x2be   :  { %v4656_v1 = vsel %vm13425_vm0, %v4654_v35, 0.0 }
 0x2bf   :  { %4657 = vadd.xlane.f32.xlu1 %v4656_v1  ;;  %v4642_v5 = vpop.xlane.xlu0 %4641 }
 0x2c0   :  { %v4651_v28 = vmul.f32 %v4649_v18, %v4642_v5 }
 0x2c2   :  { %v4653_v22 = vsub.f32 %v4634_v23, %v4651_v28 }
 0x2c4   :  { %v4655_v10 = vmul.f32 %v4653_v22, %v4653_v22 }
 0x2c6   :  { %v4659_v33 = vsel %vm13425_vm0, %v4655_v10, 0.0 }
 0x2c7   :  { %4660 = vadd.xlane.f32.xlu1 %v4659_v33 }
 0x332   :  { %v4658_v41 = vpop.xlane.xlu1 %4657 }
 0x333   :  { %v4662_v43 = vmul.f32 %v4658_v41, %v4649_v18 }
 0x335   :  { %v4664_v19 = vadd.f32 1e-06, %v4662_v43 }
 0x337   :  { %9444 = vrsqrt.f32 %v4664_v19  ;;  %vm4672_vm3 = vweird.f32 %v4664_v19 }
 0x33a   :  { %v4661_v38 = vpop.xlane.xlu1 %4660 }
 0x33b   :  { %v4663_v27 = vmul.f32 %v4661_v38, %v4649_v18 }
 0x33d   :  { %v9445_v45 = vpop.eup %9444  ;;  %v4665_v46 = vadd.f32 1e-06, %v4663_v27 }
 0x33e   :  { %v4667_v47 = vmul.f32 %v9445_v45, %v4664_v19  ;;  %vm4673_vm2 = vweird.f32 %v9445_v45 }
 0x33f   :  { %9446 = vrsqrt.f32 %v4665_v46  ;;  %vm4674_vm4 = vmor %vm4672_vm3, %vm4673_vm2  ;;  %vm4682_vm6 = vweird.f32 %v4665_v46 }
 0x340   :  { %v4668_v42 = vmul.f32 %v9445_v45, %v4667_v47 }
 0x342   :  { %v4669_v0 = vmul.f32 0.5, %v4668_v42 }
 0x344   :  { %v4670_v50 = vsub.f32 1.5, %v4669_v0 }
 0x345   :  { %v9447_v34 = vpop.eup %9446 }
 0x346   :  { %v4671_v52 = vmul.f32 %v9445_v45, %v4670_v50  ;;  %v4677_v37 = vmul.f32 %v9447_v34, %v4665_v46  ;;  %vm4683_vm5 = vweird.f32 %v9447_v34  ;;  %v9427_v46 = vld [vmem:[%s13423_s6] sm:$0xff] }
 0x347   :  { %vm4684_vm7 = vmor %vm4682_vm6, %vm4683_vm5 }
 0x348   :  { %v4678_v58 = vmul.f32 %v9447_v34, %v4677_v37  ;;  %v4675_v39 = vsel %vm4674_vm4, %v9445_v45, %v4671_v52 }
 0x349   :  { %v4686_v55 = vmul.f32 %v4675_v39, %v4652_v32  ;;  %v9429_v32 = vld [vmem:[%s13423_s6 + $0x10] sm:$0xff] }
 0x34a   :  { %v4679_v59 = vmul.f32 0.5, %v4678_v58  ;;  %4883 = vmatpush.bf16.msrb.mxu3 %v9429_v32  ;;  %v9441_v32 = vld [vmem:[%s13420_s3 + $0x3] ss:$0 sm:$0xff] }
 0x34b   :  { %v4689_v61 = vmul.f32 %v9438_v2, %v4686_v55 }
 0x34c   :  { %v4680_v54 = vsub.f32 1.5, %v4679_v59 }
 0x34d   :  { %v4692_v3 = vadd.f32 %v9439_v56, %v4689_v61 }
 0x34e   :  { %v4681_v36 = vmul.f32 %v9447_v34, %v4680_v54  ;;  %4884 = vmatpush.bf16.msrb.mxu3 %v9428_v57 }
 0x350   :  { %v4685_v30 = vsel %vm4684_vm7, %v9447_v34, %v4681_v36 }
 0x351   :  { %v4687_v62 = vmul.f32 %v4685_v30, %v4653_v22 }
 0x352   :  { %4885 = vmatpush.bf16.msrb.mxu3 %v9427_v46 }
 0x353   :  { %v4690_v63 = vmul.f32 %v9438_v2, %v4687_v62 }
 0x355   :  { %v4693_v4 = vadd.f32 %v9439_v56, %v4690_v63 }
 0x357   :  { %v4694_v7 = vpack.c.bf16 %v4693_v4, %v4692_v3 }
 0x359   :  { %8688 = vmatmul.msk.bf16.vlgmr.msrb.gmra.mxu2 %vm13425_vm0, %v4694_v7 }
 0x3dc   :  { %v4727_v21 = vpop.f32.mrf.mxu2 }
 0x3dd   :  { %v11428_v11 = vadd.f32 %v9440_v9, %v4727_v21 }
 0x3df   :  { %v11431_v6 = vmul.f32 0.70710677, %v11428_v11 }
 0x3e1   :  { %v4736_v40 = vand.u32 2147483647, %v11431_v6  ;;  %vm4802_vm1 = vcmp.lt.f32.partialorder %v11431_v6, 0.0 }
 0x3e3   :  { %v4738_v13 = vmul.f32 0.3275911, %v4736_v40  ;;  %v4790_v22 = vsub.f32 0.0, %v4736_v40 }
 0x3e4   :  { %v4729_v14 = vpop.f32.mrf.mxu2 }
 0x3e5   :  { %v4740_v16 = vadd.f32 1.0, %v4738_v13  ;;  %v11440_v48 = vadd.f32 %v9440_v9, %v4729_v14  ;;  %v4792_v44 = vmul.f32 %v4790_v22, %v4736_v40 }
 0x3e7   :  { %9448 = vrcp.f32 %v4740_v16  ;;  %v11443_v17 = vmul.f32 0.70710677, %v11440_v48  ;;  %v4753_v53 = vand.u32 2147483648, %v4740_v16  ;;  %v4751_v60 = vand.u32 2147483647, %v4740_v16 }
 0x3e8   :  { %vm4747_vm9 = vweird.f32 %v4740_v16  ;;  %v4794_v50 = vmul.f32 1.442695, %v4792_v44 }
 0x3e9   :  { %v4737_v8 = vand.u32 2147483647, %v11443_v17  ;;  %v4754_v35 = vor.u32 1.1754944e-38, %v4753_v53  ;;  %vm4752_vm11 = vcmp.eq.f32.partialorder %v4751_v60, 8.507059e+37  ;;  %vm4803_vm2 = vcmp.lt.f32.partialorder %v11443_v17, 0.0 }
 0x3eb   :  { %v4739_v23 = vmul.f32 0.3275911, %v4737_v8  ;;  %v4791_v58 = vsub.f32 0.0, %v4737_v8 }
 0x3ed   :  { %v9449_v51 = vpop.eup %9448  ;;  %v4741_v26 = vadd.f32 1.0, %v4739_v23  ;;  %v4793_v55 = vmul.f32 %v4791_v58, %v4737_v8 }
 0x3ee   :  { %v4743_v25 = vmul.f32 %v9449_v51, %v4740_v16  ;;  %vm4748_vm8 = vweird.f32 %v9449_v51 }
 0x3ef   :  { %9450 = vrcp.f32 %v4741_v26  ;;  %vm4749_vm10 = vmor %vm4747_vm9, %vm4748_vm8  ;;  %v4768_v19 = vand.u32 2147483648, %v4741_v26  ;;  %v4766_v27 = vand.u32 2147483647, %v4741_v26  ;;  %vm4762_vm13 = vweird.f32 %v4741_v26 }
 0x3f0   :  { %v4744_v49 = vsub.f32 1.0, %v4743_v25  ;;  %9452 = vpow2.f32 %v4794_v50  ;;  %v4796_v62 = vmul.f32 1.442695, %v4793_v55  ;;  %v4733_v25 = vmul.f32 0.5, %v11440_v48 }
 0x3f1   :  { %v4769_v0 = vor.u32 1.1754944e-38, %v4768_v19  ;;  %vm4767_vm15 = vcmp.eq.f32.partialorder %v4766_v27, 8.507059e+37  ;;  %v9574_v19 = vmov 1.0|1.0  }
 0x3f2   :  { %v4745_v18 = vmul.f32 %v9449_v51, %v4744_v49  ;;  %9454 = vpow2.f32 %v4796_v62 }
 0x3f4   :  { %v4746_v31 = vadd.f32 %v9449_v51, %v4745_v18  ;;  %v4932_v18 = vlaneseq }
 0x3f5   :  { %v9451_v1 = vpop.eup %9450 }
 0x3f6   :  { %v4750_v5 = vsel %vm4749_vm10, %v9449_v51, %v4746_v31  ;;  %v4758_v10 = vmul.f32 %v9451_v1, %v4741_v26  ;;  %vm4763_vm12 = vweird.f32 %v9451_v1  ;;  %v9453_v63 = vpop.eup %9452  ;;  %v4732_v51 = vmul.f32 0.5, %v11428_v11 }
 0x3f7   :  { %v4755_v28 = vsel %vm4752_vm11, %v4754_v35, %v4750_v5  ;;  %vm4764_vm14 = vmor %vm4762_vm13, %vm4763_vm12  ;;  %v4933_v60 = vshrl.u32 %v4932_v18, 7  ;;  %v11471_v35 = vand.u32 127, %v4932_v18 }
 0x3f8   :  { %v4772_v33 = vmul.f32 1.0614054, %v4755_v28  ;;  %v4759_v41 = vsub.f32 1.0, %v4758_v10  ;;  %v9455_v14 = vpop.eup %9454 }
 0x3f9   :  { %v4935_v31 = vadd.s32 16, %v4933_v60  ;;  %v4936_v6 = vadd.s32 24, %v4933_v60  ;;  %v4934_v22 = vadd.s32 8, %v4933_v60  ;;  %v11505_v57 = vmul.u32 216, %v4933_v60 }
 0x3fa   :  { %v4774_v43 = vadd.f32 -1.4531521, %v4772_v33  ;;  %v4760_v38 = vmul.f32 %v9451_v1, %v4759_v41  ;;  %v4941_v58 = vadd.s32 384, %v11471_v35  ;;  %v4950_v18 = vadd.s32 1536, %v11471_v35 }
 0x3fb   :  { %v11473_v17 = vmul.u32 216, %v4935_v31  ;;  %v11475_v11 = vmul.u32 216, %v4936_v6  ;;  %v11507_v41 = vmul.u32 216, %v4934_v22  ;;  %v11516_v44 = vadd.s32 216, %v11505_v57 }
 0x3fc   :  { %v4776_v45 = vmul.f32 %v4774_v43, %v4755_v28  ;;  %v4761_v47 = vadd.f32 %v9451_v1, %v4760_v38  ;;  %v11510_v43 = vadd.s32 256, %v11471_v35  ;;  %v4949_v60 = vadd.s32 1408, %v11471_v35 }
 0x3fd   :  { %v11481_v5 = vadd.s32 216, %v11475_v11  ;;  %vm5104_vm3 = vcmp.ge.s32.totalorder %v11471_v35, %v11473_v17  ;;  %vm5158_vm4 = vcmp.ge.s32.totalorder %v11471_v35, %v11475_v11  ;;  %v11519_v38 = vadd.s32 216, %v11507_v41 }
 0x3fe   :  { %v4778_v42 = vadd.f32 1.4214138, %v4776_v45  ;;  %v4765_v34 = vsel %vm4764_vm14, %v9451_v1, %v4761_v47  ;;  %v11478_v1 = vadd.s32 216, %v11473_v17  ;;  %v11531_v45 = vadd.s32 512, %v11471_v35 }
 0x3ff   :  { %v4770_v37 = vsel %vm4767_vm15, %v4769_v0, %v4765_v34  ;;  %vm5378_vm6 = vcmp.lt.s32.totalorder %v11471_v35, %v11481_v5  ;;  %vm4996_vm15 = vcmp.ge.s32.totalorder %v11471_v35, %v11505_v57  ;;  %v4951_v31 = vadd.s32 1664, %v11471_v35 }
 0x400   :  { %v4780_v52 = vmul.f32 %v4778_v42, %v4755_v28  ;;  %v4773_v39 = vmul.f32 1.0614054, %v4770_v37  ;;  %vm5324_vm5 = vcmp.lt.s32.totalorder %v11471_v35, %v11478_v1  ;;  %vm5594_vm11 = vmand %vm5158_vm4, %vm5378_vm6  ;;  %vm5216_vm4 = vcmp.lt.s32.totalorder %v11471_v35, %v11516_v44 }
 0x401   :  { %vm5540_vm7 = vmand %vm5104_vm3, %vm5324_vm5  ;;  %vm5270_vm5 = vcmp.lt.s32.totalorder %v11471_v35, %v11519_v38  ;;  %v4952_v6 = vadd.s32 1792, %v11471_v35  ;;  %v4956_v22 = vadd.s32 2304, %v11471_v35  ;;  %v12074_v62 = vadd.s32 4224, %v11471_v35 }
 0x402   :  { %v4782_v59 = vadd.f32 -0.28449672, %v4780_v52  ;;  %v4775_v54 = vadd.f32 -1.4531521, %v4773_v39  ;;  %vm8723_vm13 = vmpackc.low %vm5594_vm11, %vm5540_vm7  ;;  %vm5106_vm7 = vcmp.ge.s32.totalorder %v11510_v43, %v11473_v17  ;;  %vm5380_vm11 = vcmp.lt.s32.totalorder %v11510_v43, %v11481_v5 }
 0x403   :  { %8724 = vmatpush.bf16.msk.msra.mxu2 %vm8723_vm13, %v9574_v19  ;;  %vm5432_vm6 = vmand %vm4996_vm15, %vm5216_vm4  ;;  %vm5328_vm15 = vcmp.lt.s32.totalorder %v11531_v45, %v11478_v1 }
 0x404   :  { %v4784_v2 = vmul.f32 %v4782_v59, %v4755_v28  ;;  %v4777_v36 = vmul.f32 %v4775_v54, %v4770_v37  ;;  %v11599_v54 = vadd.s32 640, %v11471_v35  ;;  %v9465_v59 = vld [vmem:[%s13419_s0 + $0x8] sm:$0xff] }
 0x406   :  { %v4786_v30 = vadd.f32 0.2548296, %v4784_v2  ;;  %v4779_v56 = vadd.f32 1.4214138, %v4777_v36  ;;  %v4969_v36 = vadd.s32 3968, %v11471_v35 }
 0x408   :  { %v4788_v61 = vmul.f32 %v4786_v30, %v4755_v28  ;;  %v4781_v3 = vmul.f32 %v4779_v56, %v4770_v37  ;;  %v11484_v28 = vadd.s32 128, %v11471_v35 }
 0x40a   :  { %v4798_v4 = vmul.f32 %v9453_v63, %v4788_v61  ;;  %v4783_v7 = vadd.f32 -0.28449672, %v4781_v3  ;;  %vm5105_vm8 = vcmp.ge.s32.totalorder %v11484_v28, %v11473_v17  ;;  %vm5159_vm9 = vcmp.ge.s32.totalorder %v11484_v28, %v11475_v11 }
 0x40b   :  { %vm5325_vm10 = vcmp.lt.s32.totalorder %v11484_v28, %v11478_v1  ;;  %vm5379_vm12 = vcmp.lt.s32.totalorder %v11484_v28, %v11481_v5 }
 0x40c   :  { %v4800_v9 = vsub.f32 1.0, %v4798_v4  ;;  %v4785_v21 = vmul.f32 %v4783_v7, %v4770_v37  ;;  %vm5541_vm14 = vmand %vm5105_vm8, %vm5325_vm10  ;;  %vm5326_vm8 = vcmp.lt.s32.totalorder %v11510_v43, %v11478_v1  ;;  %vm5160_vm10 = vcmp.ge.s32.totalorder %v11510_v43, %v11475_v11 }
 0x40d   :  { %vm5542_vm13 = vmand %vm5106_vm7, %vm5326_vm8  ;;  %vm5217_vm7 = vcmp.lt.s32.totalorder %v11484_v28, %v11516_v44  ;;  %v11632_v4 = vadd.s32 768, %v11471_v35 }
 0x40e   :  { %v4787_v12 = vadd.f32 0.2548296, %v4785_v21  ;;  %v4804_v40 = vsub.f32 0.0, %v4800_v9 }
 0x410   :  { %v4789_v13 = vmul.f32 %v4787_v12, %v4770_v37  ;;  %v4806_v16 = vsel %vm4802_vm1, %v4804_v40, %v4800_v9  ;;  %vm5595_vm1 = vmand %vm5159_vm9, %vm5379_vm12 }
 0x411   :  { %v4808_v23 = vadd.f32 1.0, %v4806_v16  ;;  %vm8728_vm3 = vmpackc.low %vm5595_vm1, %vm5541_vm14  ;;  %vm5108_vm14 = vcmp.ge.s32.totalorder %v11531_v45, %v11473_v17 }
 0x412   :  { %v4799_v15 = vmul.f32 %v9455_v14, %v4789_v13  ;;  %8729 = vmatpush.bf16.msk.msra.mxu0 %vm8728_vm3, %v9574_v19  ;;  %vm5596_vm1 = vmand %vm5160_vm10, %vm5380_vm11  ;;  %vm5382_vm3 = vcmp.lt.s32.totalorder %v11531_v45, %v11481_v5  ;;  %vm5271_vm10 = vcmp.lt.s32.totalorder %v11484_v28, %v11519_v38  ;;  %v4946_v13 = vadd.s32 1024, %v11471_v35 }
 0x413   :  { %v4810_v49 = vmul.f32 %v4808_v23, %v4732_v51  ;;  %vm8733_vm4 = vmpackc.low %vm5596_vm1, %vm5542_vm13  ;;  %vm4998_vm13 = vcmp.ge.s32.totalorder %v11510_v43, %v11505_v57 }
 0x414   :  { %v4801_v20 = vsub.f32 1.0, %v4799_v15  ;;  %8734 = vmatpush.bf16.msk.msra.mxu1 %vm8733_vm4, %v9574_v19 }
 0x416   :  { %v4805_v8 = vsub.f32 0.0, %v4801_v20 }
 0x418   :  { %v4807_v24 = vsel %vm4803_vm2, %v4805_v8, %v4801_v20  ;;  %vm5050_vm2 = vcmp.ge.s32.totalorder %v11471_v35, %v11507_v41 }
 0x419   :  { %v4809_v26 = vadd.f32 1.0, %v4807_v24  ;;  %vm5486_vm9 = vmand %vm5050_vm2, %vm5270_vm5  ;;  %vm5162_vm2 = vcmp.ge.s32.totalorder %v11531_v45, %v11475_v11 }
 0x41a   :  { %vm8725_vm12 = vmpackc.low %vm5486_vm9, %vm5432_vm6  ;;  %vm4997_vm6 = vcmp.ge.s32.totalorder %v11484_v28, %v11505_v57  ;;  %vm5051_vm9 = vcmp.ge.s32.totalorder %v11484_v28, %v11507_v41  ;;  %v4955_v28 = vadd.s32 2176, %v11471_v35 }
 0x41b   :  { %v4811_v29 = vmul.f32 %v4809_v26, %v4733_v25  ;;  %8726 = vmatpush.bf16.msk.msra.mxu2 %vm8725_vm12, %v9574_v19  ;;  %vm5544_vm5 = vmand %vm5108_vm14, %vm5328_vm15  ;;  %vm5218_vm14 = vcmp.lt.s32.totalorder %v11510_v43, %v11516_v44  ;;  %v4945_v25 = vadd.s32 896, %v11471_v35  ;;  %v4947_v26 = vadd.s32 1152, %v11471_v35 }
 0x41c   :  { %vm5598_vm8 = vmand %vm5162_vm2, %vm5382_vm3  ;;  %vm5052_vm2 = vcmp.ge.s32.totalorder %v11510_v43, %v11507_v41  ;;  %vm5272_vm3 = vcmp.lt.s32.totalorder %v11510_v43, %v11519_v38  ;;  %v4959_v43 = vadd.s32 2688, %v11471_v35 }
 0x41d   :  { %v4812_v53 = vpack.c.bf16 %v4811_v29, %v4810_v49  ;;  %vm8743_vm11 = vmpackc.low %vm5598_vm8, %vm5544_vm5  ;;  %v4948_v49 = vadd.s32 1280, %v11471_v35 }
 0x41e   :  { %8744 = vmatpush.bf16.msk.msra.mxu3 %vm8743_vm11, %v9574_v19  ;;  %vm5433_vm12 = vmand %vm4997_vm6, %vm5217_vm7  ;;  %vm5000_vm6 = vcmp.ge.s32.totalorder %v11531_v45, %v11505_v57  ;;  %vm5220_vm7 = vcmp.lt.s32.totalorder %v11531_v45, %v11516_v44  ;;  %vm5274_vm11 = vcmp.lt.s32.totalorder %v11531_v45, %v11519_v38 }
 0x41f   :  { %4886 = vmatmul.bf16.vlgmr.msrb.gmra.mxu3 %v4812_v53  ;;  %vm5487_vm15 = vmand %vm5051_vm9, %vm5271_vm10  ;;  %vm5054_vm10 = vcmp.ge.s32.totalorder %v11531_v45, %v11507_v41  ;;  %v4962_v45 = vadd.s32 3072, %v11471_v35 }
 0x420   :  { %vm8730_vm1 = vmpackc.low %vm5487_vm15, %vm5433_vm12  ;;  %vm5107_vm15 = vcmp.ge.s32.totalorder %v4941_v58, %v11473_v17 }
 0x421   :  { %8731 = vmatpush.bf16.msk.msra.mxu0 %vm8730_vm1, %v9574_v19  ;;  %vm5434_vm5 = vmand %vm4998_vm13, %vm5218_vm14  ;;  %vm5327_vm1 = vcmp.lt.s32.totalorder %v4941_v58, %v11478_v1 }
 0x422   :  { %vm5488_vm9 = vmand %vm5052_vm2, %vm5272_vm3  ;;  %vm5161_vm3 = vcmp.ge.s32.totalorder %v4941_v58, %v11475_v11 }
 0x423   :  { %vm8735_vm13 = vmpackc.low %vm5488_vm9, %vm5434_vm5 }
 0x424   :  { %8736 = vmatpush.bf16.msk.msra.mxu1 %vm8735_vm13, %v9574_v19  ;;  %vm5436_vm14 = vmand %vm5000_vm6, %vm5220_vm7  ;;  %vm5109_vm6 = vcmp.ge.s32.totalorder %v11599_v54, %v11473_v17  ;;  %vm5329_vm7 = vcmp.lt.s32.totalorder %v11599_v54, %v11478_v1 }
 0x425   :  { %vm5490_vm2 = vmand %vm5054_vm10, %vm5274_vm11 }
 0x426   :  { %vm11608_vm5 = vmand %vm5107_vm15, %vm5327_vm1  ;;  %vm5383_vm15 = vcmp.lt.s32.totalorder %v11599_v54, %v11481_v5 }
 0x4a2   :  { %v4887_v48 = vpop.f32.mrf.mxu3 }
 0x4a3   :  { %v11486_v10 = vadd.f32 %v9441_v32, %v4887_v48  ;;  %v4953_v48 = vadd.s32 1920, %v11471_v35 }
 0x4a5   :  { %v8721_v33 = vmul.f32 -1.442695, %v11486_v10 }
 0x4a7   :  { %9456 = vpow2.f32 %v8721_v33  ;;  %v4957_v33 = vadd.s32 2432, %v11471_v35 }
 0x4aa   :  { %v4889_v27 = vpop.f32.mrf.mxu3 }
 0x4ab   :  { %v11533_v46 = vadd.f32 %v9441_v32, %v4889_v27  ;;  %v4954_v32 = vadd.s32 2048, %v11471_v35  ;;  %v4960_v27 = vadd.s32 2816, %v11471_v35 }
 0x4ad   :  { %v9457_v47 = vpop.eup %9456  ;;  %v8722_v42 = vmul.f32 -1.442695, %v11533_v46 }
 0x4ae   :  { %v11545_v0 = vadd.f32 1.0, %v9457_v47  ;;  %v4963_v47 = vadd.s32 3200, %v11471_v35 }
 0x4af   :  { %9458 = vpow2.f32 %v8722_v42  ;;  %v4964_v42 = vadd.s32 3328, %v11471_v35 }
 0x4b0   :  { %9460 = vrcp.f32 %v11545_v0  ;;  %vm4905_vm8 = vweird.f32 %v11545_v0  ;;  %v4911_v61 = vand.u32 2147483648, %v11545_v0  ;;  %v4909_v63 = vand.u32 2147483647, %v11545_v0 }
 0x4b2   :  { %v4912_v40 = vor.u32 1.1754944e-38, %v4911_v61 }
 0x4b5   :  { %v9459_v50 = vpop.eup %9458 }
 0x4b6   :  { %v11571_v34 = vpop.eup %9460  ;;  %v11573_v52 = vadd.f32 1.0, %v9459_v50  ;;  %v4965_v50 = vadd.s32 3456, %v11471_v35 }
 0x4b7   :  { %v4901_v37 = vmul.f32 %v11571_v34, %v11545_v0  ;;  %vm4906_vm4 = vweird.f32 %v11571_v34  ;;  %v4966_v0 = vadd.s32 3584, %v11471_v35 }
 0x4b8   :  { %9462 = vrcp.f32 %v11573_v52  ;;  %vm11594_vm12 = vmor %vm4905_vm8, %vm4906_vm4  ;;  %vm5381_vm4 = vcmp.lt.s32.totalorder %v4941_v58, %v11481_v5  ;;  %vm4920_vm9 = vweird.f32 %v11573_v52  ;;  %v4926_v7 = vand.u32 2147483648, %v11573_v52 }
 0x4b9   :  { %v4902_v39 = vsub.f32 1.0, %v4901_v37  ;;  %vm8745_vm8 = vmpackc.low %vm5490_vm2, %vm5436_vm14  ;;  %vm5163_vm14 = vcmp.ge.s32.totalorder %v11599_v54, %v11475_v11  ;;  %v4924_v12 = vand.u32 2147483647, %v11573_v52  ;;  %v12012_v37 = vadd.s32 4096, %v11471_v35 }
 0x4ba   :  { %8746 = vmatpush.bf16.msk.msra.mxu3 %vm8745_vm8, %v9574_v19  ;;  %vm5597_vm11 = vmand %vm5161_vm3, %vm5381_vm4  ;;  %vm4999_vm3 = vcmp.ge.s32.totalorder %v4941_v58, %v11505_v57  ;;  %vm5053_vm4 = vcmp.ge.s32.totalorder %v4941_v58, %v11507_v41  ;;  %vm5219_vm8 = vcmp.lt.s32.totalorder %v4941_v58, %v11516_v44  ;;  %v4927_v16 = vor.u32 1.1754944e-38, %v4926_v7 }
 0x4bb   :  { %v4903_v2 = vmul.f32 %v11571_v34, %v4902_v39  ;;  %vm8738_vm1 = vmpackc.low %vm5597_vm11, %vm11608_vm5  ;;  %vm5330_vm11 = vcmp.lt.s32.totalorder %v11632_v4, %v11478_v1 }
 0x4bc   :  { %8739 = vmatpush.bf16.msk.msrb.mxu2 %vm8738_vm1, %v9574_v19  ;;  %vm5545_vm2 = vmand %vm5109_vm6, %vm5329_vm7  ;;  %vm4910_vm7 = vcmp.eq.f32.partialorder %v4909_v63, 8.507059e+37  ;;  %vm5384_vm1 = vcmp.lt.s32.totalorder %v11632_v4, %v11481_v5  ;;  %v9467_v63 = vld [vmem:[%s13419_s0] sm:$0xff] }
 0x4bd   :  { %v4904_v30 = vadd.f32 %v11571_v34, %v4903_v2  ;;  %vm5599_vm5 = vmand %vm5163_vm14, %vm5383_vm15  ;;  %vm5164_vm15 = vcmp.ge.s32.totalorder %v11632_v4, %v11475_v11  ;;  %v9466_v2 = vld [vmem:[%s13419_s0 + $0x10] sm:$0xff] }
 0x4be   :  { %v9463_v55 = vpop.eup %9462  ;;  %vm8748_vm6 = vmpackc.low %vm5599_vm5, %vm5545_vm2  ;;  %vm4925_vm2 = vcmp.eq.f32.partialorder %v4924_v12, 8.507059e+37  ;;  %vm5112_vm5 = vcmp.ge.s32.totalorder %v4946_v13, %v11473_v17  ;;  %v9469_v12 = vld [vmem:[%s13419_s0 + $0x1b8] sm:$0xff] }
 0x4bf   :  { %v4916_v56 = vmul.f32 %v9463_v55, %v11573_v52  ;;  %vm4921_vm10 = vweird.f32 %v9463_v55  ;;  %v4908_v9 = vsel %vm11594_vm12, %v11571_v34, %v4904_v30  ;;  %8749 = vmatpush.bf16.msk.msrb.mxu0 %vm8748_vm6, %v9574_v19  ;;  %vm5110_vm12 = vcmp.ge.s32.totalorder %v11632_v4, %v11473_v17 }
 0x4c0   :  { %vm11620_vm13 = vmor %vm4920_vm9, %vm4921_vm10  ;;  %vm5273_vm9 = vcmp.lt.s32.totalorder %v4941_v58, %v11519_v38  ;;  %v4913_v15 = vsel %vm4910_vm7, %v4912_v40, %v4908_v9  ;;  %vm5332_vm6 = vcmp.lt.s32.totalorder %v4946_v13, %v11478_v1  ;;  %vm5386_vm7 = vcmp.lt.s32.totalorder %v4946_v13, %v11481_v5 }
 0x4c1   :  { %v4917_v3 = vsub.f32 1.0, %v4916_v56  ;;  %vm5435_vm10 = vmand %vm4999_vm3, %vm5219_vm8  ;;  %v4930_v23 = vmul.f32 %v4913_v15, %v11486_v10  ;;  %v4958_v10 = vadd.s32 2560, %v11471_v35  ;;  %v11983_v34 = vadd.s32 3712, %v11471_v35 }
 0x4c2   :  { %vm5489_vm14 = vmand %vm5053_vm4, %vm5273_vm9  ;;  %vm5166_vm9 = vcmp.ge.s32.totalorder %v4946_v13, %v11475_v11  ;;  %v4968_v52 = vadd.s32 3840, %v11471_v35  ;;  %v12132_v15 = vadd.s32 4352, %v11471_v35 }
 0x4c3   :  { %v4918_v21 = vmul.f32 %v9463_v55, %v4917_v3  ;;  %vm8740_vm3 = vmpackc.low %vm5489_vm14, %vm5435_vm10 }
 0x4c4   :  { %8741 = vmatpush.bf16.msk.msrb.mxu2 %vm8740_vm3, %v9574_v19  ;;  %vm5546_vm8 = vmand %vm5110_vm12, %vm5330_vm11  ;;  %vm5001_vm12 = vcmp.ge.s32.totalorder %v11599_v54, %v11505_v57  ;;  %vm5221_vm11 = vcmp.lt.s32.totalorder %v11599_v54, %v11516_v44 }
 0x4c5   :  { %v4919_v14 = vadd.f32 %v9463_v55, %v4918_v21  ;;  %vm5600_vm4 = vmand %vm5164_vm15, %vm5384_vm1  ;;  %vm5055_vm15 = vcmp.ge.s32.totalorder %v11599_v54, %v11507_v41  ;;  %vm5275_vm1 = vcmp.lt.s32.totalorder %v11599_v54, %v11519_v38 }
 0x4c6   :  { %vm5548_vm10 = vmand %vm5112_vm5, %vm5332_vm6  ;;  %vm5222_vm5 = vcmp.lt.s32.totalorder %v11632_v4, %v11516_v44 }
 0x4c7   :  { %v4923_v20 = vsel %vm11620_vm13, %v9463_v55, %v4919_v14  ;;  %vm8753_vm13 = vmpackc.low %vm5600_vm4, %vm5546_vm8  ;;  %vm5002_vm8 = vcmp.ge.s32.totalorder %v11632_v4, %v11505_v57  ;;  %vm5056_vm4 = vcmp.ge.s32.totalorder %v11632_v4, %v11507_v41 }
 0x4c8   :  { %v4928_v8 = vsel %vm4925_vm2, %v4927_v16, %v4923_v20  ;;  %8754 = vmatpush.bf16.msk.msrb.mxu1 %vm8753_vm13, %v9574_v19  ;;  %vm5602_vm14 = vmand %vm5166_vm9, %vm5386_vm7  ;;  %vm5276_vm9 = vcmp.lt.s32.totalorder %v11632_v4, %v11519_v38  ;;  %v9468_v4 = vld [vmem:[%s13419_s0 + $0x20] sm:$0xff]  ;;  %v12142_v16 = vadd.s32 4608, %v11471_v35 }
 0x4c9   :  { %v4931_v24 = vmul.f32 %v4928_v8, %v11533_v46  ;;  %vm8763_vm2 = vmpackc.low %vm5602_vm14, %vm5548_vm10  ;;  %vm5004_vm10 = vcmp.ge.s32.totalorder %v4946_v13, %v11505_v57  ;;  %vm5058_vm14 = vcmp.ge.s32.totalorder %v4946_v13, %v11507_v41  ;;  %v4961_v46 = vadd.s32 2944, %v11471_v35 }
 0x4ca   :  { %vm5437_vm3 = vmand %vm5001_vm12, %vm5221_vm11  ;;  %8764 = vmatpush.bf16.msk.msrb.mxu3 %vm8763_vm2, %v9574_v19  ;;  %vm5224_vm12 = vcmp.lt.s32.totalorder %v4946_v13, %v11516_v44 }
 0x4cb   :  { %v11674_v51 = vpack.c.bf16 %v4931_v24, %v4930_v23  ;;  %vm5491_vm6 = vmand %vm5055_vm15, %vm5275_vm1  ;;  %vm5278_vm15 = vcmp.lt.s32.totalorder %v4946_v13, %v11519_v38  ;;  %v9470_v13 = vld [vmem:[%s13419_s0 + $0x1c0] sm:$0xff]  ;;  %v9471_v24 = vld [vmem:[%s13419_s0 + $0x1b0] sm:$0xff] }
 0x4cc   :  { %vm8750_vm7 = vmpackc.low %vm5491_vm6, %vm5437_vm3  ;;  %vm5111_vm3 = vcmp.ge.s32.totalorder %v4945_v25, %v11473_v17  ;;  %vm5331_vm6 = vcmp.lt.s32.totalorder %v4945_v25, %v11478_v1 }
 0x4cd   :  { %8727 = vmatmul.msk.bf16.vlgmr.msra.gmra.mxu2 %vm13425_vm0, %v11674_v51  ;;  %8732 = vmatmul.msk.bf16.vlgmr.msra.gmra.mxu0 %vm13425_vm0, %v11674_v51  ;;  %vm5438_vm13 = vmand %vm5002_vm8, %vm5222_vm5  ;;  %vm5165_vm5 = vcmp.ge.s32.totalorder %v4945_v25, %v11475_v11 }
 0x4ce   :  { %8737 = vmatmul.msk.bf16.vlgmr.msra.gmra.mxu1 %vm13425_vm0, %v11674_v51  ;;  %8747 = vmatmul.msk.bf16.vlgmr.msra.gmra.mxu3 %vm13425_vm0, %v11674_v51  ;;  %vm5492_vm11 = vmand %vm5056_vm4, %vm5276_vm9 }
 0x4cf   :  { %8751 = vmatpush.bf16.msk.msrb.mxu0 %vm8750_vm7, %v9574_v19  ;;  %vm8755_vm1 = vmpackc.low %vm5492_vm11, %vm5438_vm13  ;;  %vm5385_vm7 = vcmp.lt.s32.totalorder %v4945_v25, %v11481_v5  ;;  %vm5113_vm13 = vcmp.ge.s32.totalorder %v4947_v26, %v11473_v17  ;;  %vm5333_vm11 = vcmp.lt.s32.totalorder %v4947_v26, %v11478_v1 }
 0x4d0   :  { %8756 = vmatpush.bf16.msk.msrb.mxu1 %vm8755_vm1, %v9574_v19  ;;  %vm5440_vm2 = vmand %vm5004_vm10, %vm5224_vm12  ;;  %vm5167_vm10 = vcmp.ge.s32.totalorder %v4947_v26, %v11475_v11  ;;  %vm5387_vm12 = vcmp.lt.s32.totalorder %v4947_v26, %v11481_v5 }
 0x4d1   :  { %vm5494_vm8 = vmand %vm5058_vm14, %vm5278_vm15  ;;  %vm5003_vm15 = vcmp.ge.s32.totalorder %v4945_v25, %v11505_v57 }
 0x4d2   :  { %vm8765_vm4 = vmpackc.low %vm5494_vm8, %vm5440_vm2  ;;  %vm5223_vm2 = vcmp.lt.s32.totalorder %v4945_v25, %v11516_v44 }
 0x4d3   :  { %8766 = vmatpush.bf16.msk.msrb.mxu3 %vm8765_vm4, %v9574_v19  ;;  %vm5547_vm9 = vmand %vm5111_vm3, %vm5331_vm6  ;;  %vm5057_vm6 = vcmp.ge.s32.totalorder %v4945_v25, %v11507_v41 }
 0x4d4   :  { %vm5601_vm0 = vmand %vm5165_vm5, %vm5385_vm7  ;;  %vm13436_vm5 = vcmask 261120  }
 0x4d5   :  { %vm8758_vm1 = vmpackc.low %vm5601_vm0, %vm5547_vm9  ;;  %vm5277_vm0 = vcmp.lt.s32.totalorder %v4945_v25, %v11519_v38  ;;  %vm5114_vm9 = vcmp.ge.s32.totalorder %v4948_v49, %v11473_v17 }
 0x4d6   :  { %8759 = vmatpush.bf16.msk.msra.mxu2 %vm8758_vm1, %v9574_v19  ;;  %vm11721_vm14 = vmand %vm5113_vm13, %vm5333_vm11  ;;  %vm5334_vm13 = vcmp.lt.s32.totalorder %v4948_v49, %v11478_v1  ;;  %vm5168_vm1 = vcmp.ge.s32.totalorder %v4948_v49, %v11475_v11 }
 0x4d7   :  { %vm11727_vm3 = vmand %vm5167_vm10, %vm5387_vm12 }
 0x4d8   :  { %vm8768_vm8 = vmpackc.low %vm11727_vm3, %vm11721_vm14  ;;  %vm5388_vm14 = vcmp.lt.s32.totalorder %v4948_v49, %v11481_v5 }
 0x4d9   :  { %vm13437_vm7 = vmmov %vm13436_vm5  ;;  %8769 = vmatpush.bf16.msk.msra.mxu0 %vm8768_vm8, %v9574_v19  ;;  %vm5005_vm8 = vcmp.ge.s32.totalorder %v4947_v26, %v11505_v57 }
 0x4da   :  { %vm5439_vm4 = vmand %vm5003_vm15, %vm5223_vm2  ;;  %vm5116_vm2 = vcmp.ge.s32.totalorder %v4950_v18, %v11473_v17 }
 0x4db   :  { %vm13438_vm11 = vmmov %vm13436_vm5 }
 0x4dc   :  { %vm13439_vm10 = vmmov %vm13436_vm5 }
 0x4dd   :  { %8742 = vmatmul.msk.bf16.vlgmr.msrb.gmra.mxu2 %vm13436_vm5, %v11674_v51  ;;  %8752 = vmatmul.msk.bf16.vlgmr.msrb.gmra.mxu0 %vm13437_vm7, %v11674_v51  ;;  %vm5493_vm12 = vmand %vm5057_vm6, %vm5277_vm0  ;;  %vm5336_vm5 = vcmp.lt.s32.totalorder %v4950_v18, %v11478_v1 }
 0x4de   :  { %8757 = vmatmul.msk.bf16.vlgmr.msrb.gmra.mxu1 %vm13438_vm11, %v11674_v51  ;;  %8767 = vmatmul.msk.bf16.vlgmr.msrb.gmra.mxu3 %vm13439_vm10, %v11674_v51  ;;  %vm8760_vm3 = vmpackc.low %vm5493_vm12, %vm5439_vm4  ;;  %vm5170_vm11 = vcmp.ge.s32.totalorder %v4950_v18, %v11475_v11  ;;  %vm5390_vm10 = vcmp.lt.s32.totalorder %v4950_v18, %v11481_v5  ;;  %vm5225_vm4 = vcmp.lt.s32.totalorder %v4947_v26, %v11516_v44 }
 0x4df   :  { %8761 = vmatpush.bf16.msk.msra.mxu2 %vm8760_vm3, %v9574_v19  ;;  %vm5550_vm15 = vmand %vm5114_vm9, %vm5334_vm13  ;;  %vm5059_vm9 = vcmp.ge.s32.totalorder %v4947_v26, %v11507_v41  ;;  %vm5279_vm13 = vcmp.lt.s32.totalorder %v4947_v26, %v11519_v38  ;;  %v9472_v26 = vld [vmem:[%s13419_s0 + $0x1d0] sm:$0xff] }
 0x4e0   :  { %vm5604_vm7 = vmand %vm5168_vm1, %vm5388_vm14  ;;  %vm5006_vm14 = vcmp.ge.s32.totalorder %v4948_v49, %v11505_v57 }
 0x4e1   :  { %vm8773_vm6 = vmpackc.low %vm5604_vm7, %vm5550_vm15  ;;  %vm5226_vm15 = vcmp.lt.s32.totalorder %v4948_v49, %v11516_v44 }
 0x4e2   :  { %8774 = vmatpush.bf16.msk.msra.mxu1 %vm8773_vm6, %v9574_v19  ;;  %vm5552_vm0 = vmand %vm5116_vm2, %vm5336_vm5  ;;  %vm5060_vm2 = vcmp.ge.s32.totalorder %v4948_v49, %v11507_v41  ;;  %vm5280_vm5 = vcmp.lt.s32.totalorder %v4948_v49, %v11519_v38 }
 0x4e3   :  { %vm5606_vm12 = vmand %vm5170_vm11, %vm5390_vm10  ;;  %vm5008_vm10 = vcmp.ge.s32.totalorder %v4950_v18, %v11505_v57 }
 0x4e4   :  { %vm8783_vm3 = vmpackc.low %vm5606_vm12, %vm5552_vm0  ;;  %vm5228_vm0 = vcmp.lt.s32.totalorder %v4950_v18, %v11516_v44  ;;  %vm5282_vm12 = vcmp.lt.s32.totalorder %v4950_v18, %v11519_v38 }
 0x4e5   :  { %8784 = vmatpush.bf16.msk.msra.mxu3 %vm8783_vm3, %v9574_v19  ;;  %vm5441_vm1 = vmand %vm5005_vm8, %vm5225_vm4  ;;  %vm5062_vm4 = vcmp.ge.s32.totalorder %v4950_v18, %v11507_v41  ;;  %vm5115_vm3 = vcmp.ge.s32.totalorder %v4949_v60, %v11473_v17  ;;  %v9473_v18 = vld [vmem:[%s13419_s0 + $0x28] sm:$0xff] }
 0x4e6   :  { %vm5495_vm7 = vmand %vm5059_vm9, %vm5279_vm13 }
 0x4e7   :  { %vm8770_vm6 = vmpackc.low %vm5495_vm7, %vm5441_vm1  ;;  %vm5335_vm1 = vcmp.lt.s32.totalorder %v4949_v60, %v11478_v1 }
 0x4e8   :  { %8771 = vmatpush.bf16.msk.msra.mxu0 %vm8770_vm6, %v9574_v19  ;;  %vm5442_vm11 = vmand %vm5006_vm14, %vm5226_vm15  ;;  %vm13440_vm15 = vcmask 261120  }
 0x4e9   :  { %vm5496_vm8 = vmand %vm5060_vm2, %vm5280_vm5  ;;  %vm5169_vm2 = vcmp.ge.s32.totalorder %v4949_v60, %v11475_v11  ;;  %vm5389_vm5 = vcmp.lt.s32.totalorder %v4949_v60, %v11481_v5 }
 0x4ea   :  { %vm8775_vm9 = vmpackc.low %vm5496_vm8, %vm5442_vm11  ;;  %vm5337_vm8 = vcmp.lt.s32.totalorder %v4951_v31, %v11478_v1 }
 0x4eb   :  { %8776 = vmatpush.bf16.msk.msra.mxu1 %vm8775_vm9, %v9574_v19  ;;  %vm5444_vm13 = vmand %vm5008_vm10, %vm5228_vm0  ;;  %vm5117_vm0 = vcmp.ge.s32.totalorder %v4951_v31, %v11473_v17  ;;  %vm5391_vm9 = vcmp.lt.s32.totalorder %v4951_v31, %v11481_v5 }
 0x4ec   :  { %vm5498_vm14 = vmand %vm5062_vm4, %vm5282_vm12  ;;  %vm5171_vm12 = vcmp.ge.s32.totalorder %v4951_v31, %v11475_v11 }
 0x4ed   :  { %8762 = vmatmul.msk.bf16.vlgmr.msra.gmra.mxu2 %vm13440_vm15, %v11674_v51  ;;  %vm13441_vm7 = vmmov %vm13440_vm15 }
 0x4ee   :  { %8772 = vmatmul.msk.bf16.vlgmr.msra.gmra.mxu0 %vm13441_vm7, %v11674_v51  ;;  %vm8785_vm6 = vmpackc.low %vm5498_vm14, %vm5444_vm13 }
 0x4ef   :  { %8786 = vmatpush.bf16.msk.msra.mxu3 %vm8785_vm6, %v9574_v19  ;;  %vm13442_vm11 = vmmov %vm13441_vm7 }
 0x4f0   :  { %8777 = vmatmul.msk.bf16.vlgmr.msra.gmra.mxu1 %vm13442_vm11, %v11674_v51  ;;  %vm5551_vm10 = vmand %vm5115_vm3, %vm5335_vm1  ;;  %vm5007_vm3 = vcmp.ge.s32.totalorder %v4949_v60, %v11505_v57  ;;  %vm5227_vm1 = vcmp.lt.s32.totalorder %v4949_v60, %v11516_v44 }
 0x4f1   :  { %vm5605_vm4 = vmand %vm5169_vm2, %vm5389_vm5  ;;  %vm5061_vm2 = vcmp.ge.s32.totalorder %v4949_v60, %v11507_v41  ;;  %vm5281_vm5 = vcmp.lt.s32.totalorder %v4949_v60, %v11519_v38 }
 0x4f2   :  { %vm8778_vm15 = vmpackc.low %vm5605_vm4, %vm5551_vm10  ;;  %vm5118_vm10 = vcmp.ge.s32.totalorder %v4952_v6, %v11473_v17  ;;  %vm5338_vm4 = vcmp.lt.s32.totalorder %v4952_v6, %v11478_v1 }
 0x4f3   :  { %8779 = vmatpush.bf16.msk.msrb.mxu2 %vm8778_vm15, %v9574_v19  ;;  %vm13443_vm13 = vmmov %vm13441_vm7  ;;  %vm5392_vm15 = vcmp.lt.s32.totalorder %v4952_v6, %v11481_v5 }
 0x4f4   :  { %8787 = vmatmul.msk.bf16.vlgmr.msra.gmra.mxu3 %vm13443_vm13, %v11674_v51  ;;  %vm5553_vm14 = vmand %vm5117_vm0, %vm5337_vm8  ;;  %vm5172_vm8 = vcmp.ge.s32.totalorder %v4952_v6, %v11475_v11  ;;  %vm5120_vm13 = vcmp.ge.s32.totalorder %v4954_v32, %v11473_v17 }
 0x4f5   :  { %vm5607_vm7 = vmand %vm5171_vm12, %vm5391_vm9 }
 0x4f6   :  { %vm8788_vm6 = vmpackc.low %vm5607_vm7, %vm5553_vm14  ;;  %vm5340_vm14 = vcmp.lt.s32.totalorder %v4954_v32, %v11478_v1 }
 0x4f7   :  { %8789 = vmatpush.bf16.msk.msrb.mxu0 %vm8788_vm6, %v9574_v19  ;;  %vm5443_vm11 = vmand %vm5007_vm3, %vm5227_vm1  ;;  %vm5174_vm3 = vcmp.ge.s32.totalorder %v4954_v32, %v11475_v11  ;;  %vm5394_vm1 = vcmp.lt.s32.totalorder %v4954_v32, %v11481_v5 }
 0x4f8   :  { %vm5497_vm0 = vmand %vm5061_vm2, %vm5281_vm5  ;;  %vm5009_vm5 = vcmp.ge.s32.totalorder %v4951_v31, %v11505_v57 }
 0x4f9   :  { %vm8780_vm12 = vmpackc.low %vm5497_vm0, %vm5443_vm11  ;;  %vm5229_vm11 = vcmp.lt.s32.totalorder %v4951_v31, %v11516_v44 }
 0x4fa   :  { %8781 = vmatpush.bf16.msk.msrb.mxu2 %vm8780_vm12, %v9574_v19  ;;  %vm5554_vm9 = vmand %vm5118_vm10, %vm5338_vm4  ;;  %vm5063_vm10 = vcmp.ge.s32.totalorder %v4951_v31, %v11507_v41  ;;  %vm5283_vm4 = vcmp.lt.s32.totalorder %v4951_v31, %v11519_v38  ;;  %v9474_v31 = vld [vmem:[%s13419_s0 + $0x30] sm:$0xff] }
 0x4fb   :  { %vm5608_vm7 = vmand %vm5172_vm8, %vm5392_vm15  ;;  %vm13444_vm8 = vcmask 261120  }
 0x4fc   :  { %vm8793_vm6 = vmpackc.low %vm5608_vm7, %vm5554_vm9  ;;  %vm5010_vm9 = vcmp.ge.s32.totalorder %v4952_v6, %v11505_v57  ;;  %vm5064_vm7 = vcmp.ge.s32.totalorder %v4952_v6, %v11507_v41 }
 0x4fd   :  { %8794 = vmatpush.bf16.msk.msrb.mxu1 %vm8793_vm6, %v9574_v19  ;;  %vm5556_vm2 = vmand %vm5120_vm13, %vm5340_vm14  ;;  %8782 = vmatmul.msk.bf16.vlgmr.msrb.gmra.mxu2 %vm13444_vm8, %v11674_v51  ;;  %vm5230_vm13 = vcmp.lt.s32.totalorder %v4952_v6, %v11516_v44 }
 0x4fe   :  { %vm5610_vm0 = vmand %vm5174_vm3, %vm5394_vm1  ;;  %vm5284_vm3 = vcmp.lt.s32.totalorder %v4952_v6, %v11519_v38 }
 0x4ff   :  { %vm8803_vm12 = vmpackc.low %vm5610_vm0, %vm5556_vm2  ;;  %vm5012_vm2 = vcmp.ge.s32.totalorder %v4954_v32, %v11505_v57  ;;  %vm5232_vm0 = vcmp.lt.s32.totalorder %v4954_v32, %v11516_v44 }
 0x500   :  { %8804 = vmatpush.bf16.msk.msrb.mxu3 %vm8803_vm12, %v9574_v19  ;;  %vm5445_vm15 = vmand %vm5009_vm5, %vm5229_vm11  ;;  %vm5066_vm11 = vcmp.ge.s32.totalorder %v4954_v32, %v11507_v41  ;;  %vm5286_vm12 = vcmp.lt.s32.totalorder %v4954_v32, %v11519_v38  ;;  %v4973_v32 = vadd.s32 4480, %v11471_v35 }
 0x501   :  { %vm5499_vm14 = vmand %vm5063_vm10, %vm5283_vm4 }
 0x502   :  { %vm8790_vm1 = vmpackc.low %vm5499_vm14, %vm5445_vm15  ;;  %vm5119_vm15 = vcmp.ge.s32.totalorder %v4953_v48, %v11473_v17  ;;  %vm5173_vm14 = vcmp.ge.s32.totalorder %v4953_v48, %v11475_v11 }
 0x503   :  { %8791 = vmatpush.bf16.msk.msrb.mxu0 %vm8790_vm1, %v9574_v19  ;;  %vm5446_vm6 = vmand %vm5010_vm9, %vm5230_vm13  ;;  %vm5339_vm9 = vcmp.lt.s32.totalorder %v4953_v48, %v11478_v1 }
 0x504   :  { %vm5500_vm5 = vmand %vm5064_vm7, %vm5284_vm3  ;;  %vm5393_vm7 = vcmp.lt.s32.totalorder %v4953_v48, %v11481_v5 }
 0x505   :  { %vm8795_vm10 = vmpackc.low %vm5500_vm5, %vm5446_vm6 }
 0x506   :  { %8796 = vmatpush.bf16.msk.msrb.mxu1 %vm8795_vm10, %v9574_v19  ;;  %vm5448_vm4 = vmand %vm5012_vm2, %vm5232_vm0  ;;  %8792 = vmatmul.msk.bf16.vlgmr.msrb.gmra.mxu0 %vm13444_vm8, %v11674_v51  ;;  %vm5121_vm2 = vcmp.ge.s32.totalorder %v4955_v28, %v11473_v17  ;;  %vm5341_vm0 = vcmp.lt.s32.totalorder %v4955_v28, %v11478_v1  ;;  %vm5175_vm10 = vcmp.ge.s32.totalorder %v4955_v28, %v11475_v11 }
 0x507   :  { %vm5502_vm13 = vmand %vm5066_vm11, %vm5286_vm12  ;;  %vm5395_vm11 = vcmp.lt.s32.totalorder %v4955_v28, %v11481_v5 }
 0x508   :  { %vm8805_vm3 = vmpackc.low %vm5502_vm13, %vm5448_vm4 }
 0x509   :  { %8806 = vmatpush.bf16.msk.msrb.mxu3 %vm8805_vm3, %v9574_v19  ;;  %vm13445_vm1 = vmmov %vm13444_vm8 }
 0x50a   :  { %8797 = vmatmul.msk.bf16.vlgmr.msrb.gmra.mxu1 %vm13445_vm1, %v11674_v51  ;;  %vm5555_vm6 = vmand %vm5119_vm15, %vm5339_vm9  ;;  %vm5011_vm15 = vcmp.ge.s32.totalorder %v4953_v48, %v11505_v57  ;;  %vm5231_vm9 = vcmp.lt.s32.totalorder %v4953_v48, %v11516_v44 }
 0x50b   :  { %vm5609_vm5 = vmand %vm5173_vm14, %vm5393_vm7  ;;  %vm5065_vm14 = vcmp.ge.s32.totalorder %v4953_v48, %v11507_v41  ;;  %vm5285_vm7 = vcmp.lt.s32.totalorder %v4953_v48, %v11519_v38 }
 0x50c   :  { %vm8798_vm12 = vmpackc.low %vm5609_vm5, %vm5555_vm6  ;;  %vm5122_vm6 = vcmp.ge.s32.totalorder %v4956_v22, %v11473_v17  ;;  %vm5342_vm5 = vcmp.lt.s32.totalorder %v4956_v22, %v11478_v1 }
 0x50d   :  { %8799 = vmatpush.bf16.msk.msra.mxu2 %vm8798_vm12, %v9574_v19  ;;  %vm13446_vm4 = vmmov %vm13445_vm1  ;;  %vm5396_vm12 = vcmp.lt.s32.totalorder %v4956_v22, %v11481_v5 }
 0x50e   :  { %8807 = vmatmul.msk.bf16.vlgmr.msrb.gmra.mxu3 %vm13446_vm4, %v11674_v51  ;;  %vm5557_vm8 = vmand %vm5121_vm2, %vm5341_vm0  ;;  %vm5176_vm0 = vcmp.ge.s32.totalorder %v4956_v22, %v11475_v11  ;;  %vm5124_vm4 = vcmp.ge.s32.totalorder %v4958_v10, %v11473_v17 }
 0x50f   :  { %vm5611_vm13 = vmand %vm5175_vm10, %vm5395_vm11 }
 0x510   :  { %vm8808_vm3 = vmpackc.low %vm5611_vm13, %vm5557_vm8  ;;  %vm5344_vm8 = vcmp.lt.s32.totalorder %v4958_v10, %v11478_v1 }
 0x511   :  { %8809 = vmatpush.bf16.msk.msra.mxu0 %vm8808_vm3, %v9574_v19  ;;  %vm5447_vm1 = vmand %vm5011_vm15, %vm5231_vm9  ;;  %vm5178_vm15 = vcmp.ge.s32.totalorder %v4958_v10, %v11475_v11  ;;  %vm5398_vm9 = vcmp.lt.s32.totalorder %v4958_v10, %v11481_v5 }
 0x512   :  { %vm5501_vm2 = vmand %vm5065_vm14, %vm5285_vm7  ;;  %vm5013_vm7 = vcmp.ge.s32.totalorder %v4955_v28, %v11505_v57 }
 0x513   :  { %vm8800_vm10 = vmpackc.low %vm5501_vm2, %vm5447_vm1  ;;  %vm5233_vm1 = vcmp.lt.s32.totalorder %v4955_v28, %v11516_v44  ;;  %vm13447_vm2 = vcmask 261120  }
 0x514   :  { %8801 = vmatpush.bf16.msk.msra.mxu2 %vm8800_vm10, %v9574_v19  ;;  %vm5558_vm11 = vmand %vm5122_vm6, %vm5342_vm5  ;;  %vm5067_vm5 = vcmp.ge.s32.totalorder %v4955_v28, %v11507_v41 }
 0x515   :  { %vm5612_vm13 = vmand %vm5176_vm0, %vm5396_vm12  ;;  %vm5287_vm0 = vcmp.lt.s32.totalorder %v4955_v28, %v11519_v38 }
 0x516   :  { %vm8813_vm3 = vmpackc.low %vm5612_vm13, %vm5558_vm11  ;;  %vm5014_vm11 = vcmp.ge.s32.totalorder %v4956_v22, %v11505_v57  ;;  %vm5068_vm13 = vcmp.ge.s32.totalorder %v4956_v22, %v11507_v41 }
 0x517   :  { %8814 = vmatpush.bf16.msk.msra.mxu1 %vm8813_vm3, %v9574_v19  ;;  %vm5560_vm14 = vmand %vm5124_vm4, %vm5344_vm8  ;;  %8802 = vmatmul.msk.bf16.vlgmr.msra.gmra.mxu2 %vm13447_vm2, %v11674_v51  ;;  %vm5234_vm4 = vcmp.lt.s32.totalorder %v4956_v22, %v11516_v44  ;;  %vm5288_vm3 = vcmp.lt.s32.totalorder %v4956_v22, %v11519_v38 }
 0x518   :  { %vm5614_vm6 = vmand %vm5178_vm15, %vm5398_vm9  ;;  %vm5016_vm9 = vcmp.ge.s32.totalorder %v4958_v10, %v11505_v57 }
 0x519   :  { %vm8823_vm12 = vmpackc.low %vm5614_vm6, %vm5560_vm14  ;;  %vm5236_vm14 = vcmp.lt.s32.totalorder %v4958_v10, %v11516_v44  ;;  %vm5290_vm6 = vcmp.lt.s32.totalorder %v4958_v10, %v11519_v38 }
 0x51a   :  { %8824 = vmatpush.bf16.msk.msra.mxu3 %vm8823_vm12, %v9574_v19  ;;  %vm5449_vm10 = vmand %vm5013_vm7, %vm5233_vm1  ;;  %vm5070_vm1 = vcmp.ge.s32.totalorder %v4958_v10, %v11507_v41  ;;  %vm13448_vm12 = vcmask 261120   ;;  %v12239_v10 = vadd.s32 4736, %v11471_v35 }
 0x51b   :  { %vm5503_vm8 = vmand %vm5067_vm5, %vm5287_vm0 }
 0x51c   :  { %vm8810_vm2 = vmpackc.low %vm5503_vm8, %vm5449_vm10  ;;  %vm5123_vm10 = vcmp.ge.s32.totalorder %v4957_v33, %v11473_v17  ;;  %vm5177_vm8 = vcmp.ge.s32.totalorder %v4957_v33, %v11475_v11 }
 0x51d   :  { %8811 = vmatpush.bf16.msk.msra.mxu0 %vm8810_vm2, %v9574_v19  ;;  %vm5450_vm15 = vmand %vm5014_vm11, %vm5234_vm4  ;;  %vm5343_vm11 = vcmp.lt.s32.totalorder %v4957_v33, %v11478_v1 }
 0x51e   :  { %vm5504_vm7 = vmand %vm5068_vm13, %vm5288_vm3  ;;  %vm5397_vm13 = vcmp.lt.s32.totalorder %v4957_v33, %v11481_v5 }
 0x51f   :  { %vm8815_vm5 = vmpackc.low %vm5504_vm7, %vm5450_vm15 }
 0x520   :  { %8816 = vmatpush.bf16.msk.msra.mxu1 %vm8815_vm5, %v9574_v19  ;;  %vm5452_vm0 = vmand %vm5016_vm9, %vm5236_vm14  ;;  %8812 = vmatmul.msk.bf16.vlgmr.msra.gmra.mxu0 %vm13448_vm12, %v11674_v51  ;;  %vm5125_vm9 = vcmp.ge.s32.totalorder %v4959_v43, %v11473_v17  ;;  %vm5345_vm14 = vcmp.lt.s32.totalorder %v4959_v43, %v11478_v1  ;;  %vm5179_vm5 = vcmp.ge.s32.totalorder %v4959_v43, %v11475_v11 }
 0x521   :  { %vm5506_vm4 = vmand %vm5070_vm1, %vm5290_vm6  ;;  %vm5399_vm1 = vcmp.lt.s32.totalorder %v4959_v43, %v11481_v5 }
 0x522   :  { %vm8825_vm3 = vmpackc.low %vm5506_vm4, %vm5452_vm0 }
 0x523   :  { %8826 = vmatpush.bf16.msk.msra.mxu3 %vm8825_vm3, %v9574_v19  ;;  %vm13449_vm2 = vmmov %vm13448_vm12 }
 0x524   :  { %8817 = vmatmul.msk.bf16.vlgmr.msra.gmra.mxu1 %vm13449_vm2, %v11674_v51  ;;  %vm5559_vm15 = vmand %vm5123_vm10, %vm5343_vm11  ;;  %vm5015_vm10 = vcmp.ge.s32.totalorder %v4957_v33, %v11505_v57  ;;  %vm5235_vm11 = vcmp.lt.s32.totalorder %v4957_v33, %v11516_v44 }
 0x525   :  { %vm5613_vm7 = vmand %vm5177_vm8, %vm5397_vm13  ;;  %vm5069_vm8 = vcmp.ge.s32.totalorder %v4957_v33, %v11507_v41  ;;  %vm5289_vm13 = vcmp.lt.s32.totalorder %v4957_v33, %v11519_v38  ;;  %v9475_v33 = vld [vmem:[%s13419_s0 + $0x18] sm:$0xff] }
 0x526   :  { %vm8818_vm6 = vmpackc.low %vm5613_vm7, %vm5559_vm15  ;;  %vm5126_vm15 = vcmp.ge.s32.totalorder %v4960_v27, %v11473_v17  ;;  %vm5346_vm7 = vcmp.lt.s32.totalorder %v4960_v27, %v11478_v1 }
 0x527   :  { %8819 = vmatpush.bf16.msk.msrb.mxu2 %vm8818_vm6, %v9574_v19  ;;  %vm13450_vm0 = vmmov %vm13449_vm2  ;;  %vm5400_vm6 = vcmp.lt.s32.totalorder %v4960_v27, %v11481_v5 }
 0x528   :  { %8827 = vmatmul.msk.bf16.vlgmr.msra.gmra.mxu3 %vm13450_vm0, %v11674_v51  ;;  %vm5561_vm12 = vmand %vm5125_vm9, %vm5345_vm14  ;;  %vm5180_vm14 = vcmp.ge.s32.totalorder %v4960_v27, %v11475_v11  ;;  %vm5128_vm0 = vcmp.ge.s32.totalorder %v4962_v45, %v11473_v17 }
 0x529   :  { %vm5615_vm4 = vmand %vm5179_vm5, %vm5399_vm1 }
 0x52a   :  { %vm8828_vm3 = vmpackc.low %vm5615_vm4, %vm5561_vm12  ;;  %vm5348_vm12 = vcmp.lt.s32.totalorder %v4962_v45, %v11478_v1 }
 0x52b   :  { %8829 = vmatpush.bf16.msk.msrb.mxu0 %vm8828_vm3, %v9574_v19  ;;  %vm5451_vm2 = vmand %vm5015_vm10, %vm5235_vm11  ;;  %vm5182_vm10 = vcmp.ge.s32.totalorder %v4962_v45, %v11475_v11  ;;  %vm5402_vm11 = vcmp.lt.s32.totalorder %v4962_v45, %v11481_v5 }
 0x52c   :  { %vm5505_vm9 = vmand %vm5069_vm8, %vm5289_vm13  ;;  %vm5017_vm13 = vcmp.ge.s32.totalorder %v4959_v43, %v11505_v57 }
 0x52d   :  { %vm8820_vm5 = vmpackc.low %vm5505_vm9, %vm5451_vm2  ;;  %vm5237_vm2 = vcmp.lt.s32.totalorder %v4959_v43, %v11516_v44  ;;  %vm13451_vm9 = vcmask 261120  }
 0x52e   :  { %8821 = vmatpush.bf16.msk.msrb.mxu2 %vm8820_vm5, %v9574_v19  ;;  %vm5562_vm1 = vmand %vm5126_vm15, %vm5346_vm7  ;;  %vm5071_vm7 = vcmp.ge.s32.totalorder %v4959_v43, %v11507_v41 }
 0x52f   :  { %vm5616_vm4 = vmand %vm5180_vm14, %vm5400_vm6  ;;  %vm5291_vm14 = vcmp.lt.s32.totalorder %v4959_v43, %v11519_v38 }
 0x530   :  { %vm8833_vm3 = vmpackc.low %vm5616_vm4, %vm5562_vm1  ;;  %vm5018_vm1 = vcmp.ge.s32.totalorder %v4960_v27, %v11505_v57  ;;  %vm5072_vm4 = vcmp.ge.s32.totalorder %v4960_v27, %v11507_v41 }
 0x531   :  { %8834 = vmatpush.bf16.msk.msrb.mxu1 %vm8833_vm3, %v9574_v19  ;;  %vm5564_vm8 = vmand %vm5128_vm0, %vm5348_vm12  ;;  %8822 = vmatmul.msk.bf16.vlgmr.msrb.gmra.mxu2 %vm13451_vm9, %v11674_v51  ;;  %vm5238_vm0 = vcmp.lt.s32.totalorder %v4960_v27, %v11516_v44  ;;  %vm5292_vm3 = vcmp.lt.s32.totalorder %v4960_v27, %v11519_v38  ;;  %v9476_v27 = vld [vmem:[%s13419_s0 + $0x40] sm:$0xff] }
 0x532   :  { %vm5618_vm15 = vmand %vm5182_vm10, %vm5402_vm11  ;;  %vm5020_vm11 = vcmp.ge.s32.totalorder %v4962_v45, %v11505_v57 }
 0x533   :  { %vm8843_vm6 = vmpackc.low %vm5618_vm15, %vm5564_vm8  ;;  %vm5240_vm8 = vcmp.lt.s32.totalorder %v4962_v45, %v11516_v44  ;;  %vm5294_vm15 = vcmp.lt.s32.totalorder %v4962_v45, %v11519_v38 }
 0x534   :  { %8844 = vmatpush.bf16.msk.msrb.mxu3 %vm8843_vm6, %v9574_v19  ;;  %vm5453_vm5 = vmand %vm5017_vm13, %vm5237_vm2  ;;  %vm5074_vm2 = vcmp.ge.s32.totalorder %v4962_v45, %v11507_v41  ;;  %vm13452_vm6 = vcmask 261120  }
 0x535   :  { %vm5507_vm12 = vmand %vm5071_vm7, %vm5291_vm14 }
 0x536   :  { %vm8830_vm9 = vmpackc.low %vm5507_vm12, %vm5453_vm5  ;;  %vm5127_vm5 = vcmp.ge.s32.totalorder %v4961_v46, %v11473_v17  ;;  %vm5181_vm12 = vcmp.ge.s32.totalorder %v4961_v46, %v11475_v11 }
 0x537   :  { %8831 = vmatpush.bf16.msk.msrb.mxu0 %vm8830_vm9, %v9574_v19  ;;  %vm5454_vm10 = vmand %vm5018_vm1, %vm5238_vm0  ;;  %vm5347_vm1 = vcmp.lt.s32.totalorder %v4961_v46, %v11478_v1 }
 0x538   :  { %vm5508_vm13 = vmand %vm5072_vm4, %vm5292_vm3  ;;  %vm5401_vm4 = vcmp.lt.s32.totalorder %v4961_v46, %v11481_v5 }
 0x539   :  { %vm8835_vm7 = vmpackc.low %vm5508_vm13, %vm5454_vm10 }
 0x53a   :  { %8836 = vmatpush.bf16.msk.msrb.mxu1 %vm8835_vm7, %v9574_v19  ;;  %vm5456_vm14 = vmand %vm5020_vm11, %vm5240_vm8  ;;  %8832 = vmatmul.msk.bf16.vlgmr.msrb.gmra.mxu0 %vm13452_vm6, %v11674_v51  ;;  %vm5129_vm11 = vcmp.ge.s32.totalorder %v4963_v47, %v11473_v17  ;;  %vm5349_vm8 = vcmp.lt.s32.totalorder %v4963_v47, %v11478_v1  ;;  %vm5183_vm7 = vcmp.ge.s32.totalorder %v4963_v47, %v11475_v11 }
 0x53b   :  { %vm5510_vm0 = vmand %vm5074_vm2, %vm5294_vm15  ;;  %vm5403_vm2 = vcmp.lt.s32.totalorder %v4963_v47, %v11481_v5 }
 0x53c   :  { %vm8845_vm3 = vmpackc.low %vm5510_vm0, %vm5456_vm14 }
 0x53d   :  { %8846 = vmatpush.bf16.msk.msrb.mxu3 %vm8845_vm3, %v9574_v19  ;;  %vm13453_vm9 = vmmov %vm13452_vm6 }
 0x53e   :  { %8837 = vmatmul.msk.bf16.vlgmr.msrb.gmra.mxu1 %vm13453_vm9, %v11674_v51  ;;  %vm5563_vm10 = vmand %vm5127_vm5, %vm5347_vm1  ;;  %vm5019_vm5 = vcmp.ge.s32.totalorder %v4961_v46, %v11505_v57  ;;  %vm5239_vm1 = vcmp.lt.s32.totalorder %v4961_v46, %v11516_v44 }
 0x53f   :  { %vm5617_vm13 = vmand %vm5181_vm12, %vm5401_vm4  ;;  %vm5073_vm12 = vcmp.ge.s32.totalorder %v4961_v46, %v11507_v41  ;;  %vm5293_vm4 = vcmp.lt.s32.totalorder %v4961_v46, %v11519_v38 }
 0x540   :  { %vm8838_vm15 = vmpackc.low %vm5617_vm13, %vm5563_vm10  ;;  %vm5130_vm10 = vcmp.ge.s32.totalorder %v4964_v42, %v11473_v17  ;;  %vm5350_vm13 = vcmp.lt.s32.totalorder %v4964_v42, %v11478_v1 }
 0x541   :  { %8839 = vmatpush.bf16.msk.msra.mxu2 %vm8838_vm15, %v9574_v19  ;;  %vm13454_vm14 = vmmov %vm13452_vm6  ;;  %vm5404_vm15 = vcmp.lt.s32.totalorder %v4964_v42, %v11481_v5 }
 0x542   :  { %8847 = vmatmul.msk.bf16.vlgmr.msrb.gmra.mxu3 %vm13454_vm14, %v11674_v51  ;;  %vm5565_vm6 = vmand %vm5129_vm11, %vm5349_vm8  ;;  %vm5184_vm8 = vcmp.ge.s32.totalorder %v4964_v42, %v11475_v11  ;;  %vm5132_vm14 = vcmp.ge.s32.totalorder %v4966_v0, %v11473_v17 }
 0x543   :  { %vm5619_vm0 = vmand %vm5183_vm7, %vm5403_vm2 }
 0x544   :  { %vm8848_vm3 = vmpackc.low %vm5619_vm0, %vm5565_vm6  ;;  %vm5352_vm6 = vcmp.lt.s32.totalorder %v4966_v0, %v11478_v1 }
 0x545   :  { %8849 = vmatpush.bf16.msk.msra.mxu0 %vm8848_vm3, %v9574_v19  ;;  %vm5455_vm9 = vmand %vm5019_vm5, %vm5239_vm1  ;;  %vm5186_vm5 = vcmp.ge.s32.totalorder %v4966_v0, %v11475_v11  ;;  %vm5406_vm1 = vcmp.lt.s32.totalorder %v4966_v0, %v11481_v5 }
 0x546   :  { %vm5509_vm11 = vmand %vm5073_vm12, %vm5293_vm4  ;;  %vm5021_vm4 = vcmp.ge.s32.totalorder %v4963_v47, %v11505_v57 }
 0x547   :  { %vm8840_vm7 = vmpackc.low %vm5509_vm11, %vm5455_vm9  ;;  %vm5241_vm9 = vcmp.lt.s32.totalorder %v4963_v47, %v11516_v44  ;;  %vm13455_vm11 = vcmask 261120  }
 0x548   :  { %8841 = vmatpush.bf16.msk.msra.mxu2 %vm8840_vm7, %v9574_v19  ;;  %vm5566_vm2 = vmand %vm5130_vm10, %vm5350_vm13  ;;  %vm5075_vm13 = vcmp.ge.s32.totalorder %v4963_v47, %v11507_v41 }
 0x549   :  { %vm5620_vm0 = vmand %vm5184_vm8, %vm5404_vm15  ;;  %vm5295_vm8 = vcmp.lt.s32.totalorder %v4963_v47, %v11519_v38 }
 0x54a   :  { %vm8853_vm3 = vmpackc.low %vm5620_vm0, %vm5566_vm2  ;;  %vm5022_vm2 = vcmp.ge.s32.totalorder %v4964_v42, %v11505_v57  ;;  %vm5076_vm0 = vcmp.ge.s32.totalorder %v4964_v42, %v11507_v41  ;;  %v5999_v58 = vpop.f32.mrf.mxu0 }
 0x54b   :  { %8854 = vmatpush.bf16.msk.msra.mxu1 %vm8853_vm3, %v9574_v19  ;;  %vm5568_vm12 = vmand %vm5132_vm14, %vm5352_vm6  ;;  %8842 = vmatmul.msk.bf16.vlgmr.msra.gmra.mxu2 %vm13455_vm11, %v11674_v51  ;;  %vm5242_vm14 = vcmp.lt.s32.totalorder %v4964_v42, %v11516_v44  ;;  %vm5296_vm3 = vcmp.lt.s32.totalorder %v4964_v42, %v11519_v38  ;;  %v6013_v39 = vpop.f32.mrf.mxu1  ;;  %v6733_v54 = vadd.f32 %v9465_v59, %v5999_v58  ;;  %v9477_v42 = vld [vmem:[%s13419_s0 + $0x1d8] sm:$0xff] }
 0x54c   :  { %vm5622_vm10 = vmand %vm5186_vm5, %vm5406_vm1  ;;  %vm5024_vm1 = vcmp.ge.s32.totalorder %v4966_v0, %v11505_v57  ;;  %v6734_v55 = vadd.f32 %v9466_v2, %v6013_v39 }
 0x54d   :  { %vm8863_vm15 = vmpackc.low %vm5622_vm10, %vm5568_vm12  ;;  %vm5244_vm12 = vcmp.lt.s32.totalorder %v4966_v0, %v11516_v44  ;;  %vm5298_vm10 = vcmp.lt.s32.totalorder %v4966_v0, %v11519_v38  ;;  %6841 = vst [vmem:[%s13424_s7 + $0x8] sm:$0xff] %v6733_v54  ;;  %v9479_v54 = vld [vmem:[%s13419_s0 + $0x1c8] sm:$0xff] }
 0x54e   :  { %8864 = vmatpush.bf16.msk.msra.mxu3 %vm8863_vm15, %v9574_v19  ;;  %vm5457_vm7 = vmand %vm5021_vm4, %vm5241_vm9  ;;  %vm5078_vm9 = vcmp.ge.s32.totalorder %v4966_v0, %v11507_v41  ;;  %vm13456_vm15 = vcmask 261120   ;;  %6842 = vst [vmem:[%s13424_s7 + $0x10] sm:$0xff] %v6734_v55  ;;  %v9480_v55 = vld [vmem:[%s13419_s0 + $0x1f0] sm:$0xff] }
 0x54f   :  { %vm5511_vm6 = vmand %vm5075_vm13, %vm5295_vm8 }
 0x550   :  { %vm8850_vm11 = vmpackc.low %vm5511_vm6, %vm5457_vm7  ;;  %vm5131_vm7 = vcmp.ge.s32.totalorder %v4965_v50, %v11473_v17  ;;  %vm5185_vm6 = vcmp.ge.s32.totalorder %v4965_v50, %v11475_v11  ;;  %v5985_v56 = vpop.f32.mrf.mxu2 }
 0x551   :  { %8851 = vmatpush.bf16.msk.msra.mxu0 %vm8850_vm11, %v9574_v19  ;;  %vm5458_vm5 = vmand %vm5022_vm2, %vm5242_vm14  ;;  %vm5351_vm2 = vcmp.lt.s32.totalorder %v4965_v50, %v11478_v1  ;;  %v6041_v61 = vpop.f32.mrf.mxu3  ;;  %v6732_v3 = vadd.f32 %v9467_v63, %v5985_v56  ;;  %v9482_v63 = vld [vmem:[%s13419_s0 + $0x50] sm:$0xff] }
 0x552   :  { %vm5512_vm4 = vmand %vm5076_vm0, %vm5296_vm3  ;;  %vm5405_vm0 = vcmp.lt.s32.totalorder %v4965_v50, %v11481_v5  ;;  %v6736_v7 = vadd.f32 %v9468_v4, %v6041_v61  ;;  %v6001_v9 = vpop.f32.mrf.mxu0  ;;  %v9481_v61 = vld [vmem:[%s13419_s0 + $0x48] sm:$0xff]  ;;  %v4977_v4 = vadd.s32 4992, %v11471_v35 }
 0x553   :  { %vm8855_vm13 = vmpackc.low %vm5512_vm4, %vm5458_vm5  ;;  %v6015_v21 = vpop.f32.mrf.mxu1  ;;  %v6787_v40 = vadd.f32 %v9469_v12, %v6001_v9  ;;  %6840 = vst [vmem:[%s13424_s7] sm:$0xff] %v6732_v3  ;;  %v12404_v12 = vadd.s32 5248, %v11471_v35 }
 0x554   :  { %8856 = vmatpush.bf16.msk.msra.mxu1 %vm8855_vm13, %v9574_v19  ;;  %vm5460_vm8 = vmand %vm5024_vm1, %vm5244_vm12  ;;  %8852 = vmatmul.msk.bf16.vlgmr.msra.gmra.mxu0 %vm13456_vm15, %v11674_v51  ;;  %vm5133_vm1 = vcmp.ge.s32.totalorder %v11983_v34, %v11473_v17  ;;  %vm5353_vm12 = vcmp.lt.s32.totalorder %v11983_v34, %v11478_v1  ;;  %v6788_v14 = vadd.f32 %v9470_v13, %v6015_v21 }
 0x555   :  { %vm5514_vm14 = vmand %vm5078_vm9, %vm5298_vm10  ;;  %vm5187_vm9 = vcmp.ge.s32.totalorder %v11983_v34, %v11475_v11  ;;  %vm5407_vm10 = vcmp.lt.s32.totalorder %v11983_v34, %v11481_v5  ;;  %6844 = vst [vmem:[%s13424_s7 + $0x20] sm:$0xff] %v6736_v7 }
 0x556   :  { %vm8865_vm3 = vmpackc.low %vm5514_vm14, %vm5460_vm8  ;;  %6895 = vst [vmem:[%s13424_s7 + $0x1b8] sm:$0xff] %v6787_v40  ;;  %v9483_v40 = vld [vmem:[%s13419_s0 + $0x38] sm:$0xff] }
 0x557   :  { %8866 = vmatpush.bf16.msk.msra.mxu3 %vm8865_vm3, %v9574_v19  ;;  %vm13457_vm11 = vmmov %vm13456_vm15  ;;  %6896 = vst [vmem:[%s13424_s7 + $0x1c0] sm:$0xff] %v6788_v14  ;;  %v9484_v14 = vld [vmem:[%s13419_s0 + $0x60] sm:$0xff] }
 0x558   :  { %8857 = vmatmul.msk.bf16.vlgmr.msra.gmra.mxu1 %vm13457_vm11, %v11674_v51  ;;  %vm5567_vm5 = vmand %vm5131_vm7, %vm5351_vm2  ;;  %vm5023_vm7 = vcmp.ge.s32.totalorder %v4965_v50, %v11505_v57  ;;  %vm5243_vm2 = vcmp.lt.s32.totalorder %v4965_v50, %v11516_v44  ;;  %v5987_v8 = vpop.f32.mrf.mxu2 }
 0x559   :  { %vm5621_vm4 = vmand %vm5185_vm6, %vm5405_vm0  ;;  %vm5077_vm6 = vcmp.ge.s32.totalorder %v4965_v50, %v11507_v41  ;;  %vm5297_vm0 = vcmp.lt.s32.totalorder %v4965_v50, %v11519_v38  ;;  %v6043_v23 = vpop.f32.mrf.mxu3  ;;  %v6786_v25 = vadd.f32 %v9471_v24, %v5987_v8  ;;  %v9478_v50 = vld [vmem:[%s13419_s0 + $0x1e0] sm:$0xff]  ;;  %v9485_v8 = vld [vmem:[%s13419_s0 + $0x1f8] sm:$0xff] }
 0x55a   :  { %vm8858_vm13 = vmpackc.low %vm5621_vm4, %vm5567_vm5  ;;  %vm5134_vm5 = vcmp.ge.s32.totalorder %v4968_v52, %v11473_v17  ;;  %vm5188_vm4 = vcmp.ge.s32.totalorder %v4968_v52, %v11475_v11  ;;  %v6790_v49 = vadd.f32 %v9472_v26, %v6043_v23  ;;  %v6055_v29 = vpop.f32.mrf.mxu0  ;;  %v9486_v24 = vld [vmem:[%s13419_s0 + $0x200] sm:$0xff]  ;;  %v12462_v26 = vadd.s32 5376, %v11471_v35 }
 0x55b   :  { %8859 = vmatpush.bf16.msk.msrb.mxu2 %vm8858_vm13, %v9574_v19  ;;  %vm13458_vm8 = vmmov %vm13457_vm11  ;;  %v6069_v53 = vpop.f32.mrf.mxu1  ;;  %v6737_v60 = vadd.f32 %v9473_v18, %v6055_v29  ;;  %6894 = vst [vmem:[%s13424_s7 + $0x1b0] sm:$0xff] %v6786_v25 }
 0x55c   :  { %8867 = vmatmul.msk.bf16.vlgmr.msra.gmra.mxu3 %vm13458_vm8, %v11674_v51  ;;  %vm5569_vm15 = vmand %vm5133_vm1, %vm5353_vm12  ;;  %vm5354_vm1 = vcmp.lt.s32.totalorder %v4968_v52, %v11478_v1  ;;  %vm5136_vm8 = vcmp.ge.s32.totalorder %v12012_v37, %v11473_v17  ;;  %v6738_v6 = vadd.f32 %v9474_v31, %v6069_v53  ;;  %6898 = vst [vmem:[%s13424_s7 + $0x1d0] sm:$0xff] %v6790_v49  ;;  %v12472_v49 = vadd.s32 5632, %v11471_v35 }
 0x55d   :  { %vm5623_vm14 = vmand %vm5187_vm9, %vm5407_vm10  ;;  %vm5408_vm9 = vcmp.lt.s32.totalorder %v4968_v52, %v11481_v5  ;;  %6845 = vst [vmem:[%s13424_s7 + $0x28] sm:$0xff] %v6737_v60  ;;  %v9487_v60 = vld [vmem:[%s13419_s0 + $0x1e8] sm:$0xff] }
 0x55e   :  { %vm8868_vm3 = vmpackc.low %vm5623_vm14, %vm5569_vm15  ;;  %vm5356_vm15 = vcmp.lt.s32.totalorder %v12012_v37, %v11478_v1  ;;  %vm5410_vm14 = vcmp.lt.s32.totalorder %v12012_v37, %v11481_v5  ;;  %6846 = vst [vmem:[%s13424_s7 + $0x30] sm:$0xff] %v6738_v6  ;;  %v9488_v6 = vld [vmem:[%s13419_s0 + $0x210] sm:$0xff] }
 0x55f   :  { %8869 = vmatpush.bf16.msk.msrb.mxu0 %vm8868_vm3, %v9574_v19  ;;  %vm5459_vm11 = vmand %vm5023_vm7, %vm5243_vm2  ;;  %vm5190_vm2 = vcmp.ge.s32.totalorder %v12012_v37, %v11475_v11  ;;  %vm5025_vm3 = vcmp.ge.s32.totalorder %v11983_v34, %v11505_v57 }
 0x560   :  { %vm5513_vm12 = vmand %vm5077_vm6, %vm5297_vm0  ;;  %v6027_v28 = vpop.f32.mrf.mxu2 }
 0x561   :  { %vm8860_vm10 = vmpackc.low %vm5513_vm12, %vm5459_vm11  ;;  %vm5245_vm11 = vcmp.lt.s32.totalorder %v11983_v34, %v11516_v44  ;;  %vm5079_vm12 = vcmp.ge.s32.totalorder %v11983_v34, %v11507_v41  ;;  %v6097_v22 = vpop.f32.mrf.mxu3  ;;  %v6735_v43 = vadd.f32 %v9475_v33, %v6027_v28  ;;  %v9490_v33 = vld [vmem:[%s13419_s0 + $0x70] sm:$0xff] }
 0x562   :  { %8861 = vmatpush.bf16.msk.msrb.mxu2 %vm8860_vm10, %v9574_v19  ;;  %vm5570_vm13 = vmand %vm5134_vm5, %vm5354_vm1  ;;  %vm13459_vm5 = vcmask 261120   ;;  %v6740_v45 = vadd.f32 %v9476_v27, %v6097_v22  ;;  %v6057_v46 = vpop.f32.mrf.mxu0  ;;  %v9489_v22 = vld [vmem:[%s13419_s0 + $0x68] sm:$0xff]  ;;  %v4981_v27 = vadd.s32 5504, %v11471_v35 }
 0x563   :  { %vm5624_vm7 = vmand %vm5188_vm4, %vm5408_vm9  ;;  %vm5299_vm4 = vcmp.lt.s32.totalorder %v11983_v34, %v11519_v38  ;;  %v6071_v47 = vpop.f32.mrf.mxu1  ;;  %v6791_v0 = vadd.f32 %v9477_v42, %v6057_v46  ;;  %6843 = vst [vmem:[%s13424_s7 + $0x18] sm:$0xff] %v6735_v43  ;;  %v12569_v42 = vadd.s32 5760, %v11471_v35 }
 0x564   :  { %vm8873_vm6 = vmpackc.low %vm5624_vm7, %vm5570_vm13  ;;  %vm5026_vm13 = vcmp.ge.s32.totalorder %v4968_v52, %v11505_v57  ;;  %vm5080_vm7 = vcmp.ge.s32.totalorder %v4968_v52, %v11507_v41  ;;  %v6792_v34 = vadd.f32 %v9478_v50, %v6071_v47  ;;  %6848 = vst [vmem:[%s13424_s7 + $0x40] sm:$0xff] %v6740_v45 }
 0x565   :  { %8874 = vmatpush.bf16.msk.msrb.mxu1 %vm8873_vm6, %v9574_v19  ;;  %vm5572_vm0 = vmand %vm5136_vm8, %vm5356_vm15  ;;  %8862 = vmatmul.msk.bf16.vlgmr.msrb.gmra.mxu2 %vm13459_vm5, %v11674_v51  ;;  %vm5246_vm8 = vcmp.lt.s32.totalorder %v4968_v52, %v11516_v44  ;;  %vm5300_vm6 = vcmp.lt.s32.totalorder %v4968_v52, %v11519_v38  ;;  %vm5082_vm5 = vcmp.ge.s32.totalorder %v12012_v37, %v11507_v41  ;;  %v12297_v52 = vadd.s32 4864, %v11471_v35 }
 0x566   :  { %vm5626_vm1 = vmand %vm5190_vm2, %vm5410_vm14  ;;  %6899 = vst [vmem:[%s13424_s7 + $0x1d8] sm:$0xff] %v6791_v0  ;;  %v9491_v0 = vld [vmem:[%s13419_s0 + $0x58] sm:$0xff] }
 0x567   :  { %vm8883_vm9 = vmpackc.low %vm5626_vm1, %vm5572_vm0  ;;  %vm5028_vm0 = vcmp.ge.s32.totalorder %v12012_v37, %v11505_v57  ;;  %vm5302_vm1 = vcmp.lt.s32.totalorder %v12012_v37, %v11519_v38  ;;  %6900 = vst [vmem:[%s13424_s7 + $0x1e0] sm:$0xff] %v6792_v34  ;;  %v9492_v34 = vld [vmem:[%s13419_s0 + $0x80] sm:$0xff] }
 0x568   :  { %8884 = vmatpush.bf16.msk.msrb.mxu3 %vm8883_vm9, %v9574_v19  ;;  %vm5461_vm10 = vmand %vm5025_vm3, %vm5245_vm11  ;;  %vm5248_vm3 = vcmp.lt.s32.totalorder %v12012_v37, %v11516_v44  ;;  %v12307_v37 = vadd.s32 5120, %v11471_v35  ;;  %v6029_v39 = vpop.f32.mrf.mxu2 }
 0x569   :  { %vm5515_vm15 = vmand %vm5079_vm12, %vm5299_vm4  ;;  %vm5135_vm4 = vcmp.ge.s32.totalorder %v4969_v36, %v11473_v17  ;;  %v6099_v59 = vpop.f32.mrf.mxu3  ;;  %v6789_v2 = vadd.f32 %v9479_v54, %v6029_v39  ;;  %v9493_v39 = vld [vmem:[%s13419_s0 + $0x218] sm:$0xff]  ;;  %v9494_v54 = vld [vmem:[%s13419_s0 + $0x220] sm:$0xff] }
 0x56a   :  { %vm8870_vm2 = vmpackc.low %vm5515_vm15, %vm5461_vm10  ;;  %vm13462_vm10 = vcmask 261120   ;;  %vm5189_vm15 = vcmp.ge.s32.totalorder %v4969_v36, %v11475_v11 }
 0x56b   :  { %8871 = vmatpush.bf16.msk.msrb.mxu0 %vm8870_vm2, %v9574_v19  ;;  %vm12058_vm14 = vmand %vm5026_vm13, %vm5246_vm8  ;;  %vm5355_vm13 = vcmp.lt.s32.totalorder %v4969_v36, %v11478_v1  ;;  %v6111_v30 = vpop.f32.mrf.mxu0  ;;  %6897 = vst [vmem:[%s13424_s7 + $0x1c8] sm:$0xff] %v6789_v2 }
 0x56c   :  { %vm5516_vm11 = vmand %vm5080_vm7, %vm5300_vm6  ;;  %vm5409_vm7 = vcmp.lt.s32.totalorder %v4969_v36, %v11481_v5 }
 0x56d   :  { %vm8875_vm12 = vmpackc.low %vm5516_vm11, %vm12058_vm14  ;;  %v6125_v56 = vpop.f32.mrf.mxu1 }
 0x56e   :  { %8876 = vmatpush.bf16.msk.msrb.mxu1 %vm8875_vm12, %v9574_v19  ;;  %vm5464_vm9 = vmand %vm5028_vm0, %vm5248_vm3  ;;  %8872 = vmatmul.msk.bf16.vlgmr.msrb.gmra.mxu0 %vm13462_vm10, %v11674_v51  ;;  %vm5137_vm0 = vcmp.ge.s32.totalorder %v12074_v62, %v11473_v17  ;;  %vm5357_vm3 = vcmp.lt.s32.totalorder %v12074_v62, %v11478_v1  ;;  %v6742_v3 = vadd.f32 %v9482_v63, %v6125_v56 }
 0x56f   :  { %vm5518_vm8 = vmand %vm5082_vm5, %vm5302_vm1  ;;  %vm5191_vm5 = vcmp.ge.s32.totalorder %v12074_v62, %v11475_v11  ;;  %vm5411_vm1 = vcmp.lt.s32.totalorder %v12074_v62, %v11481_v5 }
 0x570   :  { %vm8885_vm6 = vmpackc.low %vm5518_vm8, %vm5464_vm9  ;;  %6850 = vst [vmem:[%s13424_s7 + $0x50] sm:$0xff] %v6742_v3  ;;  %v6083_v9 = vpop.f32.mrf.mxu2  ;;  %v9496_v3 = vld [vmem:[%s13419_s0 + $0x230] sm:$0xff] }
 0x571   :  { %8886 = vmatpush.bf16.msk.msrb.mxu3 %vm8885_vm6, %v9574_v19  ;;  %vm13463_vm2 = vmmov %vm13462_vm10  ;;  %vm5027_vm10 = vcmp.ge.s32.totalorder %v4969_v36, %v11505_v57  ;;  %v6739_v13 = vadd.f32 %v9483_v40, %v6083_v9  ;;  %v9498_v40 = vld [vmem:[%s13419_s0 + $0x90] sm:$0xff] }
 0x572   :  { %8877 = vmatmul.msk.bf16.vlgmr.msrb.gmra.mxu1 %vm13463_vm2, %v11674_v51  ;;  %vm5571_vm14 = vmand %vm5135_vm4, %vm5355_vm13  ;;  %vm5247_vm13 = vcmp.lt.s32.totalorder %v4969_v36, %v11516_v44 }
 0x573   :  { %vm5625_vm11 = vmand %vm5189_vm15, %vm5409_vm7  ;;  %vm5081_vm15 = vcmp.ge.s32.totalorder %v4969_v36, %v11507_v41  ;;  %vm5301_vm7 = vcmp.lt.s32.totalorder %v4969_v36, %v11519_v38  ;;  %v6794_v36 = vadd.f32 %v9480_v55, %v6099_v59  ;;  %6847 = vst [vmem:[%s13424_s7 + $0x38] sm:$0xff] %v6739_v13  ;;  %v12627_v55 = vadd.s32 5888, %v11471_v35 }
 0x574   :  { %vm8878_vm12 = vmpackc.low %vm5625_vm11, %vm5571_vm14  ;;  %vm5138_vm14 = vcmp.ge.s32.totalorder %v12132_v15, %v11473_v17  ;;  %vm5192_vm11 = vcmp.ge.s32.totalorder %v12132_v15, %v11475_v11 }
 0x575   :  { %8879 = vmatpush.bf16.msk.msra.mxu2 %vm8878_vm12, %v9574_v19  ;;  %vm13464_vm4 = vmmov %vm13463_vm2  ;;  %6902 = vst [vmem:[%s13424_s7 + $0x1f0] sm:$0xff] %v6794_v36  ;;  %v6127_v20 = vpop.f32.mrf.mxu1  ;;  %v12637_v36 = vadd.s32 6144, %v11471_v35 }
 0x576   :  { %8887 = vmatmul.msk.bf16.vlgmr.msrb.gmra.mxu3 %vm13464_vm4, %v11674_v51  ;;  %vm5573_vm9 = vmand %vm5137_vm0, %vm5357_vm3  ;;  %vm5358_vm0 = vcmp.lt.s32.totalorder %v12132_v15, %v11478_v1  ;;  %vm5140_vm4 = vcmp.ge.s32.totalorder %v12142_v16, %v11473_v17  ;;  %v6796_v25 = vadd.f32 %v9486_v24, %v6127_v20 }
 0x577   :  { %vm5627_vm8 = vmand %vm5191_vm5, %vm5411_vm1  ;;  %vm5412_vm5 = vcmp.lt.s32.totalorder %v12132_v15, %v11481_v5  ;;  %v6153_v21 = vpop.f32.mrf.mxu3 }
 0x578   :  { %vm8888_vm6 = vmpackc.low %vm5627_vm8, %vm5573_vm9  ;;  %vm5360_vm9 = vcmp.lt.s32.totalorder %v12142_v16, %v11478_v1  ;;  %vm5414_vm8 = vcmp.lt.s32.totalorder %v12142_v16, %v11481_v5  ;;  %6904 = vst [vmem:[%s13424_s7 + $0x200] sm:$0xff] %v6796_v25  ;;  %v6085_v53 = vpop.f32.mrf.mxu2  ;;  %v9500_v25 = vld [vmem:[%s13419_s0 + $0xa0] sm:$0xff] }
 0x579   :  { %8889 = vmatpush.bf16.msk.msra.mxu0 %vm8888_vm6, %v9574_v19  ;;  %vm12145_vm2 = vmand %vm5027_vm10, %vm5247_vm13  ;;  %vm5194_vm13 = vcmp.ge.s32.totalorder %v12142_v16, %v11475_v11  ;;  %vm5029_vm6 = vcmp.ge.s32.totalorder %v12074_v62, %v11505_v57  ;;  %v6793_v31 = vadd.f32 %v9487_v60, %v6085_v53  ;;  %v9501_v53 = vld [vmem:[%s13419_s0 + $0x238] sm:$0xff]  ;;  %v9502_v60 = vld [vmem:[%s13419_s0 + $0x240] sm:$0xff] }
 0x57a   :  { %vm5517_vm3 = vmand %vm5081_vm15, %vm5301_vm7 }
 0x57b   :  { %vm8880_vm1 = vmpackc.low %vm5517_vm3, %vm12145_vm2  ;;  %vm5249_vm2 = vcmp.lt.s32.totalorder %v12074_v62, %v11516_v44  ;;  %vm5083_vm3 = vcmp.ge.s32.totalorder %v12074_v62, %v11507_v41  ;;  %6901 = vst [vmem:[%s13424_s7 + $0x1e8] sm:$0xff] %v6793_v31 }
 0x57c   :  { %8881 = vmatpush.bf16.msk.msra.mxu2 %vm8880_vm1, %v9574_v19  ;;  %vm5574_vm12 = vmand %vm5138_vm14, %vm5358_vm0  ;;  %vm13467_vm14 = vcmask 261120  }
 0x57d   :  { %vm5628_vm10 = vmand %vm5192_vm11, %vm5412_vm5  ;;  %vm5303_vm11 = vcmp.lt.s32.totalorder %v12074_v62, %v11519_v38  ;;  %v6741_v62 = vadd.f32 %v9481_v61, %v6111_v30  ;;  %v9509_v30 = vld [vmem:[%s13419_s0 + $0x258] sm:$0xff] }
 0x57e   :  { %vm8893_vm15 = vmpackc.low %vm5628_vm10, %vm5574_vm12  ;;  %vm5030_vm12 = vcmp.ge.s32.totalorder %v12132_v15, %v11505_v57  ;;  %vm5084_vm10 = vcmp.ge.s32.totalorder %v12132_v15, %v11507_v41 }
 0x57f   :  { %8894 = vmatpush.bf16.msk.msra.mxu1 %vm8893_vm15, %v9574_v19  ;;  %vm5576_vm7 = vmand %vm5140_vm4, %vm5360_vm9  ;;  %8882 = vmatmul.msk.bf16.vlgmr.msra.gmra.mxu2 %vm13467_vm14, %v11674_v51  ;;  %vm5250_vm4 = vcmp.lt.s32.totalorder %v12132_v15, %v11516_v44  ;;  %vm5086_vm14 = vcmp.ge.s32.totalorder %v12142_v16, %v11507_v41  ;;  %6849 = vst [vmem:[%s13424_s7 + $0x48] sm:$0xff] %v6741_v62  ;;  %v6155_v18 = vpop.f32.mrf.mxu3  ;;  %v9495_v62 = vld [vmem:[%s13419_s0 + $0x208] sm:$0xff] }
 0x580   :  { %vm5630_vm0 = vmand %vm5194_vm13, %vm5414_vm8  ;;  %vm5304_vm13 = vcmp.lt.s32.totalorder %v12132_v15, %v11519_v38  ;;  %v6744_v15 = vadd.f32 %v9484_v14, %v6153_v21  ;;  %v6139_v46 = vpop.f32.mrf.mxu2  ;;  %v9497_v21 = vld [vmem:[%s13419_s0 + $0x88] sm:$0xff]  ;;  %v12717_v14 = vadd.s32 6016, %v11471_v35 }
 0x581   :  { %vm8903_vm5 = vmpackc.low %vm5630_vm0, %vm5576_vm7  ;;  %vm5032_vm7 = vcmp.ge.s32.totalorder %v12142_v16, %v11505_v57  ;;  %vm5306_vm0 = vcmp.lt.s32.totalorder %v12142_v16, %v11519_v38  ;;  %v6743_v50 = vadd.f32 %v9491_v0, %v6139_v46 }
 0x582   :  { %8904 = vmatpush.bf16.msk.msra.mxu3 %vm8903_vm5, %v9574_v19  ;;  %vm5465_vm1 = vmand %vm5029_vm6, %vm5249_vm2  ;;  %vm5252_vm6 = vcmp.lt.s32.totalorder %v12142_v16, %v11516_v44  ;;  %v6113_v16 = vpop.f32.mrf.mxu0  ;;  %6852 = vst [vmem:[%s13424_s7 + $0x60] sm:$0xff] %v6744_v15 }
 0x583   :  { %vm5519_vm9 = vmand %vm5083_vm3, %vm5303_vm11  ;;  %vm5139_vm11 = vcmp.ge.s32.totalorder %v4973_v32, %v11473_v17  ;;  %v6795_v23 = vadd.f32 %v9485_v8, %v6113_v16  ;;  %6851 = vst [vmem:[%s13424_s7 + $0x58] sm:$0xff] %v6743_v50  ;;  %v12737_v8 = vadd.s32 6272, %v11471_v35  ;;  %v9506_v50 = vld [vmem:[%s13419_s0 + $0xb0] sm:$0xff] }
 0x584   :  { %vm8890_vm8 = vmpackc.low %vm5519_vm9, %vm5465_vm1  ;;  %vm13470_vm1 = vcmask 261120   ;;  %vm5193_vm9 = vcmp.ge.s32.totalorder %v4973_v32, %v11475_v11 }
 0x585   :  { %8891 = vmatpush.bf16.msk.msra.mxu0 %vm8890_vm8, %v9574_v19  ;;  %vm12223_vm15 = vmand %vm5030_vm12, %vm5250_vm4  ;;  %vm5359_vm12 = vcmp.lt.s32.totalorder %v4973_v32, %v11478_v1  ;;  %6903 = vst [vmem:[%s13424_s7 + $0x1f8] sm:$0xff] %v6795_v23  ;;  %v9499_v23 = vld [vmem:[%s13419_s0 + $0x78] sm:$0xff] }
 0x586   :  { %vm5520_vm2 = vmand %vm5084_vm10, %vm5304_vm13  ;;  %vm5413_vm10 = vcmp.lt.s32.totalorder %v4973_v32, %v11481_v5 }
 0x587   :  { %vm8895_vm3 = vmpackc.low %vm5520_vm2, %vm12223_vm15  ;;  %v6181_v28 = vpop.f32.mrf.mxu1 }
 0x588   :  { %8896 = vmatpush.bf16.msk.msra.mxu1 %vm8895_vm3, %v9574_v19  ;;  %vm5468_vm5 = vmand %vm5032_vm7, %vm5252_vm6  ;;  %8892 = vmatmul.msk.bf16.vlgmr.msra.gmra.mxu0 %vm13470_vm1, %v11674_v51  ;;  %vm5141_vm7 = vcmp.ge.s32.totalorder %v12239_v10, %v11473_v17  ;;  %vm5361_vm6 = vcmp.lt.s32.totalorder %v12239_v10, %v11478_v1  ;;  %v6746_v43 = vadd.f32 %v9490_v33, %v6181_v28  ;;  %v6141_v56 = vpop.f32.mrf.mxu2 }
 0x589   :  { %vm5522_vm4 = vmand %vm5086_vm14, %vm5306_vm0  ;;  %vm5195_vm14 = vcmp.ge.s32.totalorder %v12239_v10, %v11475_v11  ;;  %vm5415_vm0 = vcmp.lt.s32.totalorder %v12239_v10, %v11481_v5  ;;  %v6797_v63 = vadd.f32 %v9495_v62, %v6141_v56 }
 0x58a   :  { %vm8905_vm13 = vmpackc.low %vm5522_vm4, %vm5468_vm5  ;;  %v6167_v48 = vpop.f32.mrf.mxu0  ;;  %6854 = vst [vmem:[%s13424_s7 + $0x70] sm:$0xff] %v6746_v43  ;;  %v9504_v43 = vld [vmem:[%s13419_s0 + $0x250] sm:$0xff] }
 0x58b   :  { %8906 = vmatpush.bf16.msk.msra.mxu3 %vm8905_vm13, %v9574_v19  ;;  %vm13471_vm8 = vmmov %vm13470_vm1  ;;  %6905 = vst [vmem:[%s13424_s7 + $0x208] sm:$0xff] %v6797_v63  ;;  %v12938_v63 = vadd.s32 6528, %v11471_v35 }
 0x58c   :  { %8897 = vmatmul.msk.bf16.vlgmr.msra.gmra.mxu1 %vm13471_vm8, %v11674_v51  ;;  %vm5575_vm15 = vmand %vm5139_vm11, %vm5359_vm12  ;;  %vm5251_vm12 = vcmp.lt.s32.totalorder %v4973_v32, %v11516_v44 }
 0x58d   :  { %vm5629_vm2 = vmand %vm5193_vm9, %vm5413_vm10  ;;  %vm5085_vm9 = vcmp.ge.s32.totalorder %v4973_v32, %v11507_v41  ;;  %vm5305_vm10 = vcmp.lt.s32.totalorder %v4973_v32, %v11519_v38 }
 0x58e   :  { %vm8898_vm3 = vmpackc.low %vm5629_vm2, %vm5575_vm15  ;;  %vm5142_vm15 = vcmp.ge.s32.totalorder %v12297_v52, %v11473_v17  ;;  %vm5196_vm2 = vcmp.ge.s32.totalorder %v12297_v52, %v11475_v11 }
 0x58f   :  { %8899 = vmatpush.bf16.msk.msrb.mxu2 %vm8898_vm3, %v9574_v19  ;;  %vm13472_vm11 = vmmov %vm13470_vm1  ;;  %vm5031_vm1 = vcmp.ge.s32.totalorder %v4973_v32, %v11505_v57  ;;  %v6798_v32 = vadd.f32 %v9488_v6, %v6155_v18  ;;  %v6183_v58 = vpop.f32.mrf.mxu1  ;;  %v12799_v6 = vadd.s32 6400, %v11471_v35 }
 0x590   :  { %8907 = vmatmul.msk.bf16.vlgmr.msra.gmra.mxu3 %vm13472_vm11, %v11674_v51  ;;  %vm5577_vm5 = vmand %vm5141_vm7, %vm5361_vm6  ;;  %vm5362_vm7 = vcmp.lt.s32.totalorder %v12297_v52, %v11478_v1  ;;  %vm5144_vm11 = vcmp.ge.s32.totalorder %v12307_v37, %v11473_v17  ;;  %v6800_v2 = vadd.f32 %v9494_v54, %v6183_v58  ;;  %v9508_v54 = vld [vmem:[%s13419_s0 + $0xc0] sm:$0xff] }
 0x591   :  { %vm5631_vm4 = vmand %vm5195_vm14, %vm5415_vm0  ;;  %vm5416_vm14 = vcmp.lt.s32.totalorder %v12297_v52, %v11481_v5  ;;  %6906 = vst [vmem:[%s13424_s7 + $0x210] sm:$0xff] %v6798_v32  ;;  %v6209_v47 = vpop.f32.mrf.mxu3 }
 0x592   :  { %vm8908_vm13 = vmpackc.low %vm5631_vm4, %vm5577_vm5  ;;  %vm5364_vm5 = vcmp.lt.s32.totalorder %v12307_v37, %v11478_v1  ;;  %vm5418_vm4 = vcmp.lt.s32.totalorder %v12307_v37, %v11481_v5  ;;  %6908 = vst [vmem:[%s13424_s7 + $0x220] sm:$0xff] %v6800_v2 }
 0x593   :  { %8909 = vmatpush.bf16.msk.msrb.mxu0 %vm8908_vm13, %v9574_v19  ;;  %vm12310_vm8 = vmand %vm5031_vm1, %vm5251_vm12  ;;  %vm5198_vm12 = vcmp.ge.s32.totalorder %v12307_v37, %v11475_v11  ;;  %vm5033_vm13 = vcmp.ge.s32.totalorder %v12239_v10, %v11505_v57 }
 0x594   :  { %vm5521_vm6 = vmand %vm5085_vm9, %vm5305_vm10 }
 0x595   :  { %vm8900_vm0 = vmpackc.low %vm5521_vm6, %vm12310_vm8  ;;  %vm5253_vm8 = vcmp.lt.s32.totalorder %v12239_v10, %v11516_v44  ;;  %vm5087_vm6 = vcmp.ge.s32.totalorder %v12239_v10, %v11507_v41 }
 0x596   :  { %8901 = vmatpush.bf16.msk.msrb.mxu2 %vm8900_vm0, %v9574_v19  ;;  %vm5578_vm3 = vmand %vm5142_vm15, %vm5362_vm7  ;;  %vm13475_vm15 = vcmask 261120  }
 0x597   :  { %vm5632_vm1 = vmand %vm5196_vm2, %vm5416_vm14  ;;  %vm5307_vm2 = vcmp.lt.s32.totalorder %v12239_v10, %v11519_v38  ;;  %v6745_v10 = vadd.f32 %v9489_v22, %v6167_v48  ;;  %v9522_v22 = vld [vmem:[%s13419_s0 + $0xf0] sm:$0xff] }
 0x598   :  { %vm8913_vm9 = vmpackc.low %vm5632_vm1, %vm5578_vm3  ;;  %vm5034_vm3 = vcmp.ge.s32.totalorder %v12297_v52, %v11505_v57  ;;  %vm5088_vm1 = vcmp.ge.s32.totalorder %v12297_v52, %v11507_v41 }
 0x599   :  { %8914 = vmatpush.bf16.msk.msrb.mxu1 %vm8913_vm9, %v9574_v19  ;;  %vm5580_vm10 = vmand %vm5144_vm11, %vm5364_vm5  ;;  %8902 = vmatmul.msk.bf16.vlgmr.msrb.gmra.mxu2 %vm13475_vm15, %v11674_v51  ;;  %vm5254_vm11 = vcmp.lt.s32.totalorder %v12297_v52, %v11516_v44  ;;  %vm5090_vm15 = vcmp.ge.s32.totalorder %v12307_v37, %v11507_v41  ;;  %6853 = vst [vmem:[%s13424_s7 + $0x68] sm:$0xff] %v6745_v10  ;;  %v6211_v61 = vpop.f32.mrf.mxu3  ;;  %v9503_v10 = vld [vmem:[%s13419_s0 + $0x228] sm:$0xff] }
 0x59a   :  { %vm5634_vm7 = vmand %vm5198_vm12, %vm5418_vm4  ;;  %vm5308_vm12 = vcmp.lt.s32.totalorder %v12297_v52, %v11519_v38  ;;  %v6748_v52 = vadd.f32 %v9492_v34, %v6209_v47  ;;  %v6195_v16 = vpop.f32.mrf.mxu2  ;;  %v12831_v47 = vadd.s32 6656, %v11471_v35 }
 0x59b   :  { %vm8923_vm14 = vmpackc.low %vm5634_vm7, %vm5580_vm10  ;;  %vm5036_vm10 = vcmp.ge.s32.totalorder %v12307_v37, %v11505_v57  ;;  %vm5310_vm7 = vcmp.lt.s32.totalorder %v12307_v37, %v11519_v38  ;;  %v6747_v24 = vadd.f32 %v9499_v23, %v6195_v16 }
 0x59c   :  { %8924 = vmatpush.bf16.msk.msrb.mxu3 %vm8923_vm14, %v9574_v19  ;;  %vm5469_vm0 = vmand %vm5033_vm13, %vm5253_vm8  ;;  %vm5256_vm13 = vcmp.lt.s32.totalorder %v12307_v37, %v11516_v44  ;;  %v6169_v37 = vpop.f32.mrf.mxu0  ;;  %6856 = vst [vmem:[%s13424_s7 + $0x80] sm:$0xff] %v6748_v52 }
 0x59d   :  { %vm5523_vm5 = vmand %vm5087_vm6, %vm5307_vm2  ;;  %vm5143_vm2 = vcmp.ge.s32.totalorder %v4977_v4, %v11473_v17  ;;  %v6799_v59 = vadd.f32 %v9493_v39, %v6169_v37  ;;  %6855 = vst [vmem:[%s13424_s7 + $0x78] sm:$0xff] %v6747_v24  ;;  %v9507_v39 = vld [vmem:[%s13419_s0 + $0x98] sm:$0xff]  ;;  %v9516_v24 = vld [vmem:[%s13419_s0 + $0xe0] sm:$0xff] }
 0x59e   :  { %vm8910_vm4 = vmpackc.low %vm5523_vm5, %vm5469_vm0  ;;  %vm13478_vm0 = vcmask 261120   ;;  %vm5197_vm5 = vcmp.ge.s32.totalorder %v4977_v4, %v11475_v11 }
 0x59f   :  { %8911 = vmatpush.bf16.msk.msrb.mxu0 %vm8910_vm4, %v9574_v19  ;;  %vm12388_vm9 = vmand %vm5034_vm3, %vm5254_vm11  ;;  %vm5363_vm3 = vcmp.lt.s32.totalorder %v4977_v4, %v11478_v1  ;;  %6907 = vst [vmem:[%s13424_s7 + $0x218] sm:$0xff] %v6799_v59 }
 0x5a0   :  { %vm5524_vm8 = vmand %vm5088_vm1, %vm5308_vm12  ;;  %vm5417_vm1 = vcmp.lt.s32.totalorder %v4977_v4, %v11481_v5 }
 0x5a1   :  { %vm8915_vm6 = vmpackc.low %vm5524_vm8, %vm12388_vm9  ;;  %v6237_v9 = vpop.f32.mrf.mxu1 }
 0x5a2   :  { %8916 = vmatpush.bf16.msk.msrb.mxu1 %vm8915_vm6, %v9574_v19  ;;  %vm5472_vm14 = vmand %vm5036_vm10, %vm5256_vm13  ;;  %8912 = vmatmul.msk.bf16.vlgmr.msrb.gmra.mxu0 %vm13478_vm0, %v11674_v51  ;;  %vm5145_vm10 = vcmp.ge.s32.totalorder %v12404_v12, %v11473_v17  ;;  %vm5365_vm13 = vcmp.lt.s32.totalorder %v12404_v12, %v11478_v1  ;;  %v6750_v13 = vadd.f32 %v9498_v40, %v6237_v9  ;;  %v6197_v48 = vpop.f32.mrf.mxu2  ;;  %v12964_v9 = vadd.s32 6784, %v11471_v35  ;;  %v9512_v40 = vld [vmem:[%s13419_s0 + $0x270] sm:$0xff]  ;;  %v9513_v35 = vld [vmem:[%s13419_s0 + $0xc8] sm:$0xff] }
 0x5a3   :  { %vm5526_vm11 = vmand %vm5090_vm15, %vm5310_vm7  ;;  %vm5199_vm15 = vcmp.ge.s32.totalorder %v12404_v12, %v11475_v11  ;;  %vm5419_vm7 = vcmp.lt.s32.totalorder %v12404_v12, %v11481_v5  ;;  %v6801_v33 = vadd.f32 %v9503_v10, %v6197_v48 }
 0x5a4   :  { %vm8925_vm12 = vmpackc.low %vm5526_vm11, %vm5472_vm14  ;;  %v6223_v7 = vpop.f32.mrf.mxu0  ;;  %6858 = vst [vmem:[%s13424_s7 + $0x90] sm:$0xff] %v6750_v13 }
 0x5a5   :  { %8926 = vmatpush.bf16.msk.msrb.mxu3 %vm8925_vm12, %v9574_v19  ;;  %vm13479_vm4 = vmmov %vm13478_vm0  ;;  %6909 = vst [vmem:[%s13424_s7 + $0x228] sm:$0xff] %v6801_v33 }
 0x5a6   :  { %8917 = vmatmul.msk.bf16.vlgmr.msrb.gmra.mxu1 %vm13479_vm4, %v11674_v51  ;;  %vm5579_vm9 = vmand %vm5143_vm2, %vm5363_vm3  ;;  %vm5255_vm3 = vcmp.lt.s32.totalorder %v4977_v4, %v11516_v44 }
 0x5a7   :  { %vm5633_vm8 = vmand %vm5197_vm5, %vm5417_vm1  ;;  %vm5089_vm5 = vcmp.ge.s32.totalorder %v4977_v4, %v11507_v41  ;;  %vm5309_vm1 = vcmp.lt.s32.totalorder %v4977_v4, %v11519_v38 }
 0x5a8   :  { %vm8918_vm6 = vmpackc.low %vm5633_vm8, %vm5579_vm9  ;;  %vm5146_vm9 = vcmp.ge.s32.totalorder %v12462_v26, %v11473_v17  ;;  %vm5200_vm8 = vcmp.ge.s32.totalorder %v12462_v26, %v11475_v11 }
 0x5a9   :  { %8919 = vmatpush.bf16.msk.msra.mxu2 %vm8918_vm6, %v9574_v19  ;;  %vm13480_vm2 = vmmov %vm13478_vm0  ;;  %vm5035_vm0 = vcmp.ge.s32.totalorder %v4977_v4, %v11505_v57  ;;  %v6802_v4 = vadd.f32 %v9496_v3, %v6211_v61  ;;  %v6239_v29 = vpop.f32.mrf.mxu1  ;;  %v9510_v61 = vld [vmem:[%s13419_s0 + $0x260] sm:$0xff]  ;;  %v9531_v3 = vld [vmem:[%s13419_s0 + $0xf8] sm:$0xff] }
 0x5aa   :  { %8927 = vmatmul.msk.bf16.vlgmr.msrb.gmra.mxu3 %vm13480_vm2, %v11674_v51  ;;  %vm5581_vm14 = vmand %vm5145_vm10, %vm5365_vm13  ;;  %vm5366_vm10 = vcmp.lt.s32.totalorder %v12462_v26, %v11478_v1  ;;  %vm5148_vm2 = vcmp.ge.s32.totalorder %v12472_v49, %v11473_v17  ;;  %v6804_v31 = vadd.f32 %v9502_v60, %v6239_v29  ;;  %v9517_v29 = vld [vmem:[%s13419_s0 + $0x278] sm:$0xff] }
 0x5ab   :  { %vm5635_vm11 = vmand %vm5199_vm15, %vm5419_vm7  ;;  %vm5420_vm15 = vcmp.lt.s32.totalorder %v12462_v26, %v11481_v5  ;;  %6910 = vst [vmem:[%s13424_s7 + $0x230] sm:$0xff] %v6802_v4  ;;  %v6265_v20 = vpop.f32.mrf.mxu3 }
 0x5ac   :  { %vm8928_vm12 = vmpackc.low %vm5635_vm11, %vm5581_vm14  ;;  %vm5368_vm14 = vcmp.lt.s32.totalorder %v12472_v49, %v11478_v1  ;;  %vm5422_vm11 = vcmp.lt.s32.totalorder %v12472_v49, %v11481_v5  ;;  %6912 = vst [vmem:[%s13424_s7 + $0x240] sm:$0xff] %v6804_v31  ;;  %v9520_v31 = vld [vmem:[%s13419_s0 + $0x290] sm:$0xff] }
 0x5ad   :  { %8929 = vmatpush.bf16.msk.msra.mxu0 %vm8928_vm12, %v9574_v19  ;;  %vm12475_vm4 = vmand %vm5035_vm0, %vm5255_vm3  ;;  %vm5202_vm3 = vcmp.ge.s32.totalorder %v12472_v49, %v11475_v11  ;;  %vm5037_vm12 = vcmp.ge.s32.totalorder %v12404_v12, %v11505_v57 }
 0x5ae   :  { %vm5525_vm13 = vmand %vm5089_vm5, %vm5309_vm1 }
 0x5af   :  { %vm8920_vm7 = vmpackc.low %vm5525_vm13, %vm12475_vm4  ;;  %vm5257_vm4 = vcmp.lt.s32.totalorder %v12404_v12, %v11516_v44  ;;  %vm5091_vm13 = vcmp.ge.s32.totalorder %v12404_v12, %v11507_v41 }
 0x5b0   :  { %8921 = vmatpush.bf16.msk.msra.mxu2 %vm8920_vm7, %v9574_v19  ;;  %vm5582_vm6 = vmand %vm5146_vm9, %vm5366_vm10  ;;  %vm13483_vm9 = vcmask 261120  }
 0x5b1   :  { %vm5636_vm0 = vmand %vm5200_vm8, %vm5420_vm15  ;;  %vm5311_vm8 = vcmp.lt.s32.totalorder %v12404_v12, %v11519_v38  ;;  %v6749_v12 = vadd.f32 %v9497_v21, %v6223_v7  ;;  %v9511_v21 = vld [vmem:[%s13419_s0 + $0x248] sm:$0xff] }
 0x5b2   :  { %vm8933_vm5 = vmpackc.low %vm5636_vm0, %vm5582_vm6  ;;  %vm5038_vm6 = vcmp.ge.s32.totalorder %v12462_v26, %v11505_v57  ;;  %vm5092_vm0 = vcmp.ge.s32.totalorder %v12462_v26, %v11507_v41 }
 0x5b3   :  { %8934 = vmatpush.bf16.msk.msra.mxu1 %vm8933_vm5, %v9574_v19  ;;  %vm5584_vm1 = vmand %vm5148_vm2, %vm5368_vm14  ;;  %8922 = vmatmul.msk.bf16.vlgmr.msra.gmra.mxu2 %vm13483_vm9, %v11674_v51  ;;  %vm5258_vm2 = vcmp.lt.s32.totalorder %v12462_v26, %v11516_v44  ;;  %vm5094_vm9 = vcmp.ge.s32.totalorder %v12472_v49, %v11507_v41  ;;  %6857 = vst [vmem:[%s13424_s7 + $0x88] sm:$0xff] %v6749_v12  ;;  %v6267_v28 = vpop.f32.mrf.mxu3 }
 0x5b4   :  { %vm5638_vm10 = vmand %vm5202_vm3, %vm5422_vm11  ;;  %vm5312_vm3 = vcmp.lt.s32.totalorder %v12462_v26, %v11519_v38  ;;  %v6752_v26 = vadd.f32 %v9500_v25, %v6265_v20  ;;  %v6251_v52 = vpop.f32.mrf.mxu2  ;;  %v9514_v20 = vld [vmem:[%s13419_s0 + $0xd0] sm:$0xff] }
 0x5b5   :  { %vm8943_vm15 = vmpackc.low %vm5638_vm10, %vm5584_vm1  ;;  %vm5040_vm1 = vcmp.ge.s32.totalorder %v12472_v49, %v11505_v57  ;;  %vm5314_vm10 = vcmp.lt.s32.totalorder %v12472_v49, %v11519_v38  ;;  %v6751_v59 = vadd.f32 %v9507_v39, %v6251_v52  ;;  %v9527_v39 = vld [vmem:[%s13419_s0 + $0x288] sm:$0xff] }
 0x5b6   :  { %8944 = vmatpush.bf16.msk.msra.mxu3 %vm8943_vm15, %v9574_v19  ;;  %vm5473_vm7 = vmand %vm5037_vm12, %vm5257_vm4  ;;  %vm5260_vm12 = vcmp.lt.s32.totalorder %v12472_v49, %v11516_v44  ;;  %v6225_v49 = vpop.f32.mrf.mxu0  ;;  %6860 = vst [vmem:[%s13424_s7 + $0xa0] sm:$0xff] %v6752_v26 }
 0x5b7   :  { %vm5527_vm14 = vmand %vm5091_vm13, %vm5311_vm8  ;;  %vm5147_vm8 = vcmp.ge.s32.totalorder %v4981_v27, %v11473_v17  ;;  %v6803_v18 = vadd.f32 %v9501_v53, %v6225_v49  ;;  %6859 = vst [vmem:[%s13424_s7 + $0x98] sm:$0xff] %v6751_v59 }
 0x5b8   :  { %vm8930_vm11 = vmpackc.low %vm5527_vm14, %vm5473_vm7  ;;  %vm13486_vm7 = vcmask 261120   ;;  %vm5201_vm14 = vcmp.ge.s32.totalorder %v4981_v27, %v11475_v11 }
 0x5b9   :  { %8931 = vmatpush.bf16.msk.msra.mxu0 %vm8930_vm11, %v9574_v19  ;;  %vm12553_vm5 = vmand %vm5038_vm6, %vm5258_vm2  ;;  %vm5367_vm6 = vcmp.lt.s32.totalorder %v4981_v27, %v11478_v1  ;;  %6911 = vst [vmem:[%s13424_s7 + $0x238] sm:$0xff] %v6803_v18  ;;  %v9518_v18 = vld [vmem:[%s13419_s0 + $0x280] sm:$0xff] }
 0x5ba   :  { %vm5528_vm4 = vmand %vm5092_vm0, %vm5312_vm3  ;;  %vm5421_vm0 = vcmp.lt.s32.totalorder %v4981_v27, %v11481_v5 }
 0x5bb   :  { %vm8935_vm13 = vmpackc.low %vm5528_vm4, %vm12553_vm5  ;;  %v6293_v46 = vpop.f32.mrf.mxu1 }
 0x5bc   :  { %8936 = vmatpush.bf16.msk.msra.mxu1 %vm8935_vm13, %v9574_v19  ;;  %vm5476_vm15 = vmand %vm5040_vm1, %vm5260_vm12  ;;  %8932 = vmatmul.msk.bf16.vlgmr.msra.gmra.mxu0 %vm13486_vm7, %v11674_v51  ;;  %vm5149_vm1 = vcmp.ge.s32.totalorder %v12569_v42, %v11473_v17  ;;  %vm5369_vm12 = vcmp.lt.s32.totalorder %v12569_v42, %v11478_v1  ;;  %v6754_v34 = vadd.f32 %v9506_v50, %v6293_v46  ;;  %v6253_v4 = vpop.f32.mrf.mxu2 }
 0x5bd   :  { %vm5530_vm2 = vmand %vm5094_vm9, %vm5314_vm10  ;;  %vm5203_vm9 = vcmp.ge.s32.totalorder %v12569_v42, %v11475_v11  ;;  %vm5423_vm10 = vcmp.lt.s32.totalorder %v12569_v42, %v11481_v5  ;;  %v6805_v12 = vadd.f32 %v9511_v21, %v6253_v4 }
 0x5be   :  { %vm8945_vm3 = vmpackc.low %vm5530_vm2, %vm5476_vm15  ;;  %v6279_v45 = vpop.f32.mrf.mxu0  ;;  %6862 = vst [vmem:[%s13424_s7 + $0xb0] sm:$0xff] %v6754_v34  ;;  %v9526_v34 = vld [vmem:[%s13419_s0 + $0x2a0] sm:$0xff] }
 0x5bf   :  { %8946 = vmatpush.bf16.msk.msra.mxu3 %vm8945_vm3, %v9574_v19  ;;  %vm13487_vm11 = vmmov %vm13486_vm7  ;;  %6913 = vst [vmem:[%s13424_s7 + $0x248] sm:$0xff] %v6805_v12 }
 0x5c0   :  { %8937 = vmatmul.msk.bf16.vlgmr.msra.gmra.mxu1 %vm13487_vm11, %v11674_v51  ;;  %vm5583_vm5 = vmand %vm5147_vm8, %vm5367_vm6  ;;  %vm5259_vm6 = vcmp.lt.s32.totalorder %v4981_v27, %v11516_v44 }
 0x5c1   :  { %vm5637_vm4 = vmand %vm5201_vm14, %vm5421_vm0  ;;  %vm5093_vm14 = vcmp.ge.s32.totalorder %v4981_v27, %v11507_v41  ;;  %vm5313_vm0 = vcmp.lt.s32.totalorder %v4981_v27, %v11519_v38 }
 0x5c2   :  { %vm8938_vm13 = vmpackc.low %vm5637_vm4, %vm5583_vm5  ;;  %vm5150_vm5 = vcmp.ge.s32.totalorder %v12627_v55, %v11473_v17  ;;  %vm5204_vm4 = vcmp.ge.s32.totalorder %v12627_v55, %v11475_v11 }
 0x5c3   :  { %8939 = vmatpush.bf16.msk.msrb.mxu2 %vm8938_vm13, %v9574_v19  ;;  %vm13488_vm8 = vmmov %vm13486_vm7  ;;  %vm5039_vm7 = vcmp.ge.s32.totalorder %v4981_v27, %v11505_v57  ;;  %v6806_v27 = vadd.f32 %v9504_v43, %v6267_v28  ;;  %v9521_v28 = vld [vmem:[%s13419_s0 + $0xe8] sm:$0xff] }
 0x5c4   :  { %8947 = vmatmul.msk.bf16.vlgmr.msra.gmra.mxu3 %vm13488_vm8, %v11674_v51  ;;  %vm5585_vm15 = vmand %vm5149_vm1, %vm5369_vm12  ;;  %vm5370_vm1 = vcmp.lt.s32.totalorder %v12627_v55, %v11478_v1  ;;  %vm5152_vm8 = vcmp.ge.s32.totalorder %v12637_v36, %v11473_v17 }
 0x5c5   :  { %vm5639_vm2 = vmand %vm5203_vm9, %vm5423_vm10  ;;  %vm5424_vm9 = vcmp.lt.s32.totalorder %v12627_v55, %v11481_v5  ;;  %6914 = vst [vmem:[%s13424_s7 + $0x250] sm:$0xff] %v6806_v27  ;;  %v6321_v37 = vpop.f32.mrf.mxu3  ;;  %v9523_v27 = vld [vmem:[%s13419_s0 + $0xd8] sm:$0xff] }
 0x5c6   :  { %vm8948_vm3 = vmpackc.low %vm5639_vm2, %vm5585_vm15  ;;  %vm5372_vm15 = vcmp.lt.s32.totalorder %v12637_v36, %v11478_v1  ;;  %vm5426_vm2 = vcmp.lt.s32.totalorder %v12637_v36, %v11481_v5  ;;  %v6756_v2 = vadd.f32 %v9508_v54, %v6321_v37  ;;  %v9528_v54 = vld [vmem:[%s13419_s0 + $0x2b0] sm:$0xff] }
 0x5c7   :  { %8949 = vmatpush.bf16.msk.msrb.mxu0 %vm8948_vm3, %v9574_v19  ;;  %vm12640_vm11 = vmand %vm5039_vm7, %vm5259_vm6  ;;  %vm5206_vm6 = vcmp.ge.s32.totalorder %v12637_v36, %v11475_v11  ;;  %vm5041_vm3 = vcmp.ge.s32.totalorder %v12569_v42, %v11505_v57 }
 0x5c8   :  { %vm5529_vm12 = vmand %vm5093_vm14, %vm5313_vm0  ;;  %6864 = vst [vmem:[%s13424_s7 + $0xc0] sm:$0xff] %v6756_v2 }
 0x5c9   :  { %vm8940_vm10 = vmpackc.low %vm5529_vm12, %vm12640_vm11  ;;  %vm5261_vm11 = vcmp.lt.s32.totalorder %v12569_v42, %v11516_v44  ;;  %vm5095_vm12 = vcmp.ge.s32.totalorder %v12569_v42, %v11507_v41 }
 0x5ca   :  { %8941 = vmatpush.bf16.msk.msrb.mxu2 %vm8940_vm10, %v9574_v19  ;;  %vm5586_vm13 = vmand %vm5150_vm5, %vm5370_vm1  ;;  %vm13491_vm5 = vcmask 261120  }
 0x5cb   :  { %vm5640_vm7 = vmand %vm5204_vm4, %vm5424_vm9  ;;  %vm5315_vm4 = vcmp.lt.s32.totalorder %v12569_v42, %v11519_v38  ;;  %v9505_v42 = vld [vmem:[%s13419_s0 + $0xa8] sm:$0xff] }
 0x5cc   :  { %vm8953_vm14 = vmpackc.low %vm5640_vm7, %vm5586_vm13  ;;  %vm5042_vm13 = vcmp.ge.s32.totalorder %v12627_v55, %v11505_v57  ;;  %vm5096_vm7 = vcmp.ge.s32.totalorder %v12627_v55, %v11507_v41  ;;  %v6753_v0 = vadd.f32 %v9505_v42, %v6279_v45 }
 0x5cd   :  { %8954 = vmatpush.bf16.msk.msrb.mxu1 %vm8953_vm14, %v9574_v19  ;;  %vm5588_vm0 = vmand %vm5152_vm8, %vm5372_vm15  ;;  %8942 = vmatmul.msk.bf16.vlgmr.msrb.gmra.mxu2 %vm13491_vm5, %v11674_v51  ;;  %vm5262_vm8 = vcmp.lt.s32.totalorder %v12627_v55, %v11516_v44  ;;  %vm5098_vm5 = vcmp.ge.s32.totalorder %v12637_v36, %v11507_v41  ;;  %v6323_v7 = vpop.f32.mrf.mxu3 }
 0x5ce   :  { %vm5642_vm1 = vmand %vm5206_vm6, %vm5426_vm2  ;;  %vm5316_vm6 = vcmp.lt.s32.totalorder %v12627_v55, %v11519_v38  ;;  %6861 = vst [vmem:[%s13424_s7 + $0xa8] sm:$0xff] %v6753_v0  ;;  %v6281_v55 = vpop.f32.mrf.mxu0  ;;  %v6810_v13 = vadd.f32 %v9512_v40, %v6323_v7  ;;  %v9525_v0 = vld [vmem:[%s13419_s0 + $0x298] sm:$0xff] }
 0x5cf   :  { %vm8963_vm9 = vmpackc.low %vm5642_vm1, %vm5588_vm0  ;;  %vm5044_vm0 = vcmp.ge.s32.totalorder %v12637_v36, %v11505_v57  ;;  %vm5318_vm1 = vcmp.lt.s32.totalorder %v12637_v36, %v11519_v38  ;;  %v6807_v56 = vadd.f32 %v9509_v30, %v6281_v55 }
 0x5d0   :  { %8964 = vmatpush.bf16.msk.msrb.mxu3 %vm8963_vm9, %v9574_v19  ;;  %vm5477_vm10 = vmand %vm5041_vm3, %vm5261_vm11  ;;  %vm5264_vm3 = vcmp.lt.s32.totalorder %v12637_v36, %v11516_v44  ;;  %v6295_v36 = vpop.f32.mrf.mxu1  ;;  %6918 = vst [vmem:[%s13424_s7 + $0x270] sm:$0xff] %v6810_v13  ;;  %v9533_v13 = vld [vmem:[%s13419_s0 + $0x2c0] sm:$0xff] }
 0x5d1   :  { %vm5531_vm15 = vmand %vm5095_vm12, %vm5315_vm4  ;;  %vm5151_vm4 = vcmp.ge.s32.totalorder %v12717_v14, %v11473_v17  ;;  %v6808_v62 = vadd.f32 %v9510_v61, %v6295_v36  ;;  %6915 = vst [vmem:[%s13424_s7 + $0x258] sm:$0xff] %v6807_v56  ;;  %v9529_v36 = vld [vmem:[%s13419_s0 + $0x108] sm:$0xff]  ;;  %v9530_v61 = vld [vmem:[%s13419_s0 + $0x110] sm:$0xff] }
 0x5d2   :  { %vm8950_vm2 = vmpackc.low %vm5531_vm15, %vm5477_vm10  ;;  %vm13494_vm10 = vcmask 261120   ;;  %vm5205_vm15 = vcmp.ge.s32.totalorder %v12717_v14, %v11475_v11 }
 0x5d3   :  { %8951 = vmatpush.bf16.msk.msrb.mxu0 %vm8950_vm2, %v9574_v19  ;;  %vm12720_vm14 = vmand %vm5042_vm13, %vm5262_vm8  ;;  %vm5371_vm13 = vcmp.lt.s32.totalorder %v12717_v14, %v11478_v1  ;;  %6916 = vst [vmem:[%s13424_s7 + $0x260] sm:$0xff] %v6808_v62 }
 0x5d4   :  { %vm5532_vm11 = vmand %vm5096_vm7, %vm5316_vm6  ;;  %vm5425_vm7 = vcmp.lt.s32.totalorder %v12717_v14, %v11481_v5 }
 0x5d5   :  { %vm8955_vm12 = vmpackc.low %vm5532_vm11, %vm12720_vm14 }
 0x5d6   :  { %8956 = vmatpush.bf16.msk.msrb.mxu1 %vm8955_vm12, %v9574_v19  ;;  %vm5480_vm9 = vmand %vm5044_vm0, %vm5264_vm3  ;;  %8952 = vmatmul.msk.bf16.vlgmr.msrb.gmra.mxu0 %vm13494_vm10, %v11674_v51  ;;  %vm5153_vm0 = vcmp.ge.s32.totalorder %v12737_v8, %v11473_v17  ;;  %vm5373_vm3 = vcmp.lt.s32.totalorder %v12737_v8, %v11478_v1 }
 0x5d7   :  { %vm5534_vm8 = vmand %vm5098_vm5, %vm5318_vm1  ;;  %vm5207_vm5 = vcmp.ge.s32.totalorder %v12737_v8, %v11475_v11  ;;  %vm5427_vm1 = vcmp.lt.s32.totalorder %v12737_v8, %v11481_v5 }
 0x5d8   :  { %vm8965_vm6 = vmpackc.low %vm5534_vm8, %vm5480_vm9  ;;  %v6349_v15 = vpop.f32.mrf.mxu1 }
 0x5d9   :  { %8966 = vmatpush.bf16.msk.msrb.mxu3 %vm8965_vm6, %v9574_v19  ;;  %vm13495_vm2 = vmmov %vm13494_vm10  ;;  %vm5043_vm10 = vcmp.ge.s32.totalorder %v12717_v14, %v11505_v57 }
 0x5da   :  { %8957 = vmatmul.msk.bf16.vlgmr.msrb.gmra.mxu1 %vm13495_vm2, %v11674_v51  ;;  %vm5587_vm14 = vmand %vm5151_vm4, %vm5371_vm13  ;;  %vm5263_vm13 = vcmp.lt.s32.totalorder %v12717_v14, %v11516_v44 }
 0x5db   :  { %vm5641_vm11 = vmand %vm5205_vm15, %vm5425_vm7  ;;  %vm5097_vm15 = vcmp.ge.s32.totalorder %v12717_v14, %v11507_v41  ;;  %vm5317_vm7 = vcmp.lt.s32.totalorder %v12717_v14, %v11519_v38  ;;  %v6335_v14 = vpop.f32.mrf.mxu0 }
 0x5dc   :  { %vm8958_vm12 = vmpackc.low %vm5641_vm11, %vm5587_vm14  ;;  %vm5154_vm14 = vcmp.ge.s32.totalorder %v12799_v6, %v11473_v17  ;;  %vm5208_vm11 = vcmp.ge.s32.totalorder %v12799_v6, %v11475_v11  ;;  %v6757_v16 = vadd.f32 %v9513_v35, %v6335_v14 }
 0x5dd   :  { %8959 = vmatpush.bf16.msk.msra.mxu2 %vm8958_vm12, %v9574_v19  ;;  %vm13496_vm4 = vmmov %vm13495_vm2 }
 0x5de   :  { %8967 = vmatmul.msk.bf16.vlgmr.msrb.gmra.mxu3 %vm13496_vm4, %v11674_v51  ;;  %vm12804_vm9 = vmand %vm5153_vm0, %vm5373_vm3  ;;  %vm5374_vm0 = vcmp.lt.s32.totalorder %v12799_v6, %v11478_v1  ;;  %vm5156_vm4 = vcmp.ge.s32.totalorder %v12831_v47, %v11473_v17  ;;  %6865 = vst [vmem:[%s13424_s7 + $0xc8] sm:$0xff] %v6757_v16 }
 0x5df   :  { %vm12812_vm8 = vmand %vm5207_vm5, %vm5427_vm1  ;;  %vm5428_vm5 = vcmp.lt.s32.totalorder %v12799_v6, %v11481_v5 }
 0x5e0   :  { %vm8968_vm6 = vmpackc.low %vm12812_vm8, %vm12804_vm9  ;;  %vm5376_vm9 = vcmp.lt.s32.totalorder %v12831_v47, %v11478_v1  ;;  %vm5430_vm8 = vcmp.lt.s32.totalorder %v12831_v47, %v11481_v5  ;;  %v6351_v49 = vpop.f32.mrf.mxu1 }
 0x5e1   :  { %8969 = vmatpush.bf16.msk.msra.mxu0 %vm8968_vm6, %v9574_v19  ;;  %vm5479_vm2 = vmand %vm5043_vm10, %vm5263_vm13  ;;  %vm5210_vm13 = vcmp.ge.s32.totalorder %v12831_v47, %v11475_v11  ;;  %v6812_v60 = vadd.f32 %v9518_v18, %v6351_v49 }
 0x5e2   :  { %vm5533_vm3 = vmand %vm5097_vm15, %vm5317_vm7  ;;  %vm5045_vm7 = vcmp.ge.s32.totalorder %v12737_v8, %v11505_v57 }
 0x5e3   :  { %vm8960_vm1 = vmpackc.low %vm5533_vm3, %vm5479_vm2  ;;  %vm5265_vm2 = vcmp.lt.s32.totalorder %v12737_v8, %v11516_v44  ;;  %vm5099_vm3 = vcmp.ge.s32.totalorder %v12737_v8, %v11507_v41  ;;  %v6337_v26 = vpop.f32.mrf.mxu0  ;;  %6920 = vst [vmem:[%s13424_s7 + $0x280] sm:$0xff] %v6812_v60 }
 0x5e4   :  { %8961 = vmatpush.bf16.msk.msra.mxu2 %vm8960_vm1, %v9574_v19  ;;  %vm5590_vm12 = vmand %vm5154_vm14, %vm5374_vm0  ;;  %vm13503_vm14 = vcmask 261120   ;;  %v6811_v53 = vadd.f32 %v9517_v29, %v6337_v26  ;;  %v9538_v26 = vld [vmem:[%s13419_s0 + $0x118] sm:$0xff] }
 0x5e5   :  { %vm5644_vm10 = vmand %vm5208_vm11, %vm5428_vm5  ;;  %vm5319_vm11 = vcmp.lt.s32.totalorder %v12737_v8, %v11519_v38  ;;  %v6758_v8 = vadd.f32 %v9514_v20, %v6349_v15  ;;  %v9534_v15 = vld [vmem:[%s13419_s0 + $0x120] sm:$0xff]  ;;  %v9535_v20 = vld [vmem:[%s13419_s0 + $0x2a8] sm:$0xff] }
 0x5e6   :  { %vm8973_vm15 = vmpackc.low %vm5644_vm10, %vm5590_vm12  ;;  %vm5046_vm12 = vcmp.ge.s32.totalorder %v12799_v6, %v11505_v57  ;;  %vm5100_vm10 = vcmp.ge.s32.totalorder %v12799_v6, %v11507_v41  ;;  %6919 = vst [vmem:[%s13424_s7 + $0x278] sm:$0xff] %v6811_v53  ;;  %v9539_v53 = vld [vmem:[%s13419_s0 + $0x130] sm:$0xff] }
 0x5e7   :  { %8974 = vmatpush.bf16.msk.msra.mxu1 %vm8973_vm15, %v9574_v19  ;;  %vm12884_vm6 = vmand %vm5156_vm4, %vm5376_vm9  ;;  %8962 = vmatmul.msk.bf16.vlgmr.msra.gmra.mxu2 %vm13503_vm14, %v11674_v51  ;;  %vm5266_vm4 = vcmp.lt.s32.totalorder %v12799_v6, %v11516_v44  ;;  %vm5102_vm14 = vcmp.ge.s32.totalorder %v12831_v47, %v11507_v41  ;;  %6866 = vst [vmem:[%s13424_s7 + $0xd0] sm:$0xff] %v6758_v8 }
 0x5e8   :  { %vm5646_vm0 = vmand %vm5210_vm13, %vm5430_vm8  ;;  %vm5320_vm13 = vcmp.lt.s32.totalorder %v12799_v6, %v11519_v38 }
 0x5e9   :  { %vm8983_vm5 = vmpackc.low %vm5646_vm0, %vm12884_vm6  ;;  %vm5268_vm6 = vcmp.lt.s32.totalorder %v12831_v47, %v11516_v44  ;;  %vm5322_vm0 = vcmp.lt.s32.totalorder %v12831_v47, %v11519_v38 }
 0x5ea   :  { %8984 = vmatpush.bf16.msk.msra.mxu3 %vm8983_vm5, %v9574_v19  ;;  %vm5481_vm1 = vmand %vm5045_vm7, %vm5265_vm2  ;;  %vm5048_vm7 = vcmp.ge.s32.totalorder %v12831_v47, %v11505_v57 }
 0x5eb   :  { %vm5535_vm9 = vmand %vm5099_vm3, %vm5319_vm11  ;;  %vm5155_vm11 = vcmp.ge.s32.totalorder %v12938_v63, %v11473_v17  ;;  %v6391_v32 = vpop.f32.mrf.mxu0 }
 0x5ec   :  { %vm8970_vm8 = vmpackc.low %vm5535_vm9, %vm5481_vm1  ;;  %vm13506_vm1 = vcmask 261120   ;;  %vm5209_vm9 = vcmp.ge.s32.totalorder %v12938_v63, %v11475_v11 }
 0x5ed   :  { %8971 = vmatpush.bf16.msk.msra.mxu0 %vm8970_vm8, %v9574_v19  ;;  %vm12947_vm15 = vmand %vm5046_vm12, %vm5266_vm4  ;;  %vm5375_vm12 = vcmp.lt.s32.totalorder %v12938_v63, %v11478_v1 }
 0x5ee   :  { %vm5536_vm2 = vmand %vm5100_vm10, %vm5320_vm13  ;;  %vm5429_vm10 = vcmp.lt.s32.totalorder %v12938_v63, %v11481_v5 }
 0x5ef   :  { %vm8975_vm3 = vmpackc.low %vm5536_vm2, %vm12947_vm15  ;;  %v6405_v48 = vpop.f32.mrf.mxu1 }
 0x5f0   :  { %8976 = vmatpush.bf16.msk.msra.mxu1 %vm8975_vm3, %v9574_v19  ;;  %vm5484_vm5 = vmand %vm5048_vm7, %vm5268_vm6  ;;  %8972 = vmatmul.msk.bf16.vlgmr.msra.gmra.mxu0 %vm13506_vm1, %v11674_v51  ;;  %vm5157_vm7 = vcmp.ge.s32.totalorder %v12964_v9, %v11473_v17  ;;  %vm5377_vm6 = vcmp.lt.s32.totalorder %v12964_v9, %v11478_v1  ;;  %v6377_v1 = vpop.f32.mrf.mxu3  ;;  %v6762_v10 = vadd.f32 %v9522_v22, %v6405_v48  ;;  %v9542_v48 = vld [vmem:[%s13419_s0 + $0x2e0] sm:$0xff] }
 0x5f1   :  { %vm5538_vm4 = vmand %vm5102_vm14, %vm5322_vm0  ;;  %vm5211_vm14 = vcmp.ge.s32.totalorder %v12964_v9, %v11475_v11  ;;  %vm5431_vm0 = vcmp.lt.s32.totalorder %v12964_v9, %v11481_v5  ;;  %v6307_v11 = vpop.f32.mrf.mxu2  ;;  %v9515_v5 = vld [vmem:[%s13419_s0 + $0xb8] sm:$0xff]  ;;  %v6760_v25 = vadd.f32 %v9516_v24, %v6377_v1 }
 0x5f2   :  { %vm8985_vm13 = vmpackc.low %vm5538_vm4, %vm5484_vm5  ;;  %v6755_v23 = vadd.f32 %v9515_v5, %v6307_v11  ;;  %6870 = vst [vmem:[%s13424_s7 + $0xf0] sm:$0xff] %v6762_v10  ;;  %v9536_v11 = vld [vmem:[%s13419_s0 + $0x2d0] sm:$0xff] }
 0x5f3   :  { %8986 = vmatpush.bf16.msk.msra.mxu3 %vm8985_vm13, %v9574_v19  ;;  %vm13507_vm8 = vmmov %vm13506_vm1  ;;  %6868 = vst [vmem:[%s13424_s7 + $0xe0] sm:$0xff] %v6760_v25  ;;  %v6393_v47 = vpop.f32.mrf.mxu0 }
 0x5f4   :  { %8977 = vmatmul.msk.bf16.vlgmr.msra.gmra.mxu1 %vm13507_vm8, %v11674_v51  ;;  %vm5591_vm15 = vmand %vm5155_vm11, %vm5375_vm12  ;;  %vm5267_vm12 = vcmp.lt.s32.totalorder %v12938_v63, %v11516_v44  ;;  %6863 = vst [vmem:[%s13424_s7 + $0xb8] sm:$0xff] %v6755_v23  ;;  %v6815_v50 = vadd.f32 %v9525_v0, %v6393_v47  ;;  %v9537_v23 = vld [vmem:[%s13419_s0 + $0x128] sm:$0xff] }
 0x5f5   :  { %vm5645_vm2 = vmand %vm5209_vm9, %vm5429_vm10  ;;  %vm5101_vm9 = vcmp.ge.s32.totalorder %v12938_v63, %v11507_v41  ;;  %vm5321_vm10 = vcmp.lt.s32.totalorder %v12938_v63, %v11519_v38  ;;  %v9546_v47 = vld [vmem:[%s13419_s0 + $0x148] sm:$0xff] }
 0x5f6   :  { %vm8978_vm3 = vmpackc.low %vm5645_vm2, %vm5591_vm15  ;;  %vm5049_vm15 = vcmp.ge.s32.totalorder %v12964_v9, %v11505_v57  ;;  %vm5103_vm2 = vcmp.ge.s32.totalorder %v12964_v9, %v11507_v41  ;;  %6923 = vst [vmem:[%s13424_s7 + $0x298] sm:$0xff] %v6815_v50  ;;  %v9547_v50 = vld [vmem:[%s13419_s0 + $0x150] sm:$0xff] }
 0x5f7   :  { %8979 = vmatpush.bf16.msk.msrb.mxu2 %vm8978_vm3, %v9574_v19  ;;  %vm13508_vm11 = vmmov %vm13506_vm1  ;;  %vm5047_vm1 = vcmp.ge.s32.totalorder %v12938_v63, %v11505_v57  ;;  %v6407_v42 = vpop.f32.mrf.mxu1 }
 0x5f8   :  { %8987 = vmatmul.msk.bf16.vlgmr.msra.gmra.mxu3 %vm13508_vm11, %v11674_v51  ;;  %vm13028_vm5 = vmand %vm5157_vm7, %vm5377_vm6  ;;  %vm5269_vm7 = vcmp.lt.s32.totalorder %v12964_v9, %v11516_v44  ;;  %v6379_v41 = vpop.f32.mrf.mxu3  ;;  %v9519_v44 = vld [vmem:[%s13419_s0 + $0x268] sm:$0xff]  ;;  %v6816_v52 = vadd.f32 %v9526_v34, %v6407_v42 }
 0x5f9   :  { %vm5647_vm4 = vmand %vm5211_vm14, %vm5431_vm0  ;;  %vm5323_vm14 = vcmp.lt.s32.totalorder %v12964_v9, %v11519_v38  ;;  %v6309_v57 = vpop.f32.mrf.mxu2  ;;  %v6814_v6 = vadd.f32 %v9520_v31, %v6379_v41  ;;  %v9532_v9 = vld [vmem:[%s13419_s0 + $0x2b8] sm:$0xff] }
 0x5fa   :  { %vm8988_vm13 = vmpackc.low %vm5647_vm4, %vm13028_vm5  ;;  %v6809_v38 = vadd.f32 %v9519_v44, %v6309_v57  ;;  %6924 = vst [vmem:[%s13424_s7 + $0x2a0] sm:$0xff] %v6816_v52  ;;  %v9540_v57 = vld [vmem:[%s13419_s0 + $0x2d8] sm:$0xff] }
 0x5fb   :  { %8989 = vmatpush.bf16.msk.msrb.mxu0 %vm8988_vm13, %v9574_v19  ;;  %vm5483_vm8 = vmand %vm5047_vm1, %vm5267_vm12  ;;  %vm13511_vm1 = vcmask 261120   ;;  %6922 = vst [vmem:[%s13424_s7 + $0x290] sm:$0xff] %v6814_v6 }
 0x5fc   :  { %vm5537_vm6 = vmand %vm5101_vm9, %vm5321_vm10  ;;  %6917 = vst [vmem:[%s13424_s7 + $0x268] sm:$0xff] %v6809_v38  ;;  %v9541_v38 = vld [vmem:[%s13419_s0 + $0x2c8] sm:$0xff] }
 0x5fd   :  { %vm8980_vm0 = vmpackc.low %vm5537_vm6, %vm5483_vm8 }
 0x5fe   :  { %8981 = vmatpush.bf16.msk.msrb.mxu2 %vm8980_vm0, %v9574_v19  ;;  %vm5485_vm3 = vmand %vm5049_vm15, %vm5269_vm7 }
 0x5ff   :  { %vm5539_vm11 = vmand %vm5103_vm2, %vm5323_vm14 }
 0x600   :  { %vm8990_vm5 = vmpackc.low %vm5539_vm11, %vm5485_vm3  ;;  %v6433_v43 = vpop.f32.mrf.mxu3 }
 0x601   :  { %8991 = vmatpush.bf16.msk.msrb.mxu0 %vm8990_vm5, %v9574_v19  ;;  %8982 = vmatmul.msk.bf16.vlgmr.msrb.gmra.mxu2 %vm13511_vm1, %v11674_v51  ;;  %v6761_v19 = vadd.f32 %v9521_v28, %v6391_v32  ;;  %vm13512_vm12 = vmmov %vm13511_vm1  ;;  %v6363_v33 = vpop.f32.mrf.mxu2 }
 0x602   :  { %v6759_v45 = vadd.f32 %v9523_v27, %v6363_v33  ;;  %v9544_v33 = vld [vmem:[%s13419_s0 + $0x2f0] sm:$0xff] }
 0x603   :  { %6869 = vst [vmem:[%s13424_s7 + $0xe8] sm:$0xff] %v6761_v19  ;;  %v9543_v19 = vld [vmem:[%s13419_s0 + $0x140] sm:$0xff] }
 0x604   :  { %8992 = vmatmul.msk.bf16.vlgmr.msrb.gmra.mxu0 %vm13512_vm12, %v11674_v51  ;;  %v9524_v51 = vld [vmem:[%s13419_s0 + $0x100] sm:$0xff]  ;;  %6867 = vst [vmem:[%s13424_s7 + $0xd8] sm:$0xff] %v6759_v45  ;;  %v9545_v45 = vld [vmem:[%s13419_s0 + $0x138] sm:$0xff] }
 0x605   :  { %v6764_v46 = vadd.f32 %v9524_v51, %v6433_v43  ;;  %v6447_v55 = vpop.f32.mrf.mxu0 }
 0x606   :  { %v6765_v30 = vadd.f32 %v9529_v36, %v6447_v55  ;;  %v9550_v36 = vld [vmem:[%s13419_s0 + $0x300] sm:$0xff] }
 0x607   :  { %6872 = vst [vmem:[%s13424_s7 + $0x100] sm:$0xff] %v6764_v46 }
 0x608   :  { %v6435_v58 = vpop.f32.mrf.mxu3  ;;  %6873 = vst [vmem:[%s13424_s7 + $0x108] sm:$0xff] %v6765_v30 }
 0x609   :  { %v6365_v37 = vpop.f32.mrf.mxu2  ;;  %v6818_v2 = vadd.f32 %v9528_v54, %v6435_v58  ;;  %v6461_v56 = vpop.f32.mrf.mxu1 }
 0x60a   :  { %v6813_v59 = vadd.f32 %v9527_v39, %v6365_v37  ;;  %v6766_v62 = vadd.f32 %v9530_v61, %v6461_v56  ;;  %v9548_v37 = vld [vmem:[%s13419_s0 + $0x2e8] sm:$0xff]  ;;  %v9551_v56 = vld [vmem:[%s13419_s0 + $0x160] sm:$0xff] }
 0x60b   :  { %6926 = vst [vmem:[%s13424_s7 + $0x2b0] sm:$0xff] %v6818_v2 }
 0x60c   :  { %6921 = vst [vmem:[%s13424_s7 + $0x288] sm:$0xff] %v6813_v59  ;;  %v9549_v59 = vld [vmem:[%s13419_s0 + $0x2f8] sm:$0xff] }
 0x60d   :  { %6874 = vst [vmem:[%s13424_s7 + $0x110] sm:$0xff] %v6766_v62  ;;  %v6449_v7 = vpop.f32.mrf.mxu0 }
 0x60e   :  { %v6819_v21 = vadd.f32 %v9532_v9, %v6449_v7  ;;  %v9553_v7 = vld [vmem:[%s13419_s0 + $0x158] sm:$0xff] }
 0x610   :  { %6927 = vst [vmem:[%s13424_s7 + $0x2b8] sm:$0xff] %v6819_v21 }
 0x611   :  { %v6419_v63 = vpop.f32.mrf.mxu2  ;;  %v6463_v12 = vpop.f32.mrf.mxu1 }
 0x612   :  { %v6763_v4 = vadd.f32 %v9531_v3, %v6419_v63  ;;  %v6820_v14 = vadd.f32 %v9533_v13, %v6463_v12  ;;  %v9552_v63 = vld [vmem:[%s13419_s0 + $0x310] sm:$0xff]  ;;  %v9554_v12 = vld [vmem:[%s13419_s0 + $0x168] sm:$0xff] }
 0x613   :  { %v6489_v40 = vpop.f32.mrf.mxu3 }
 0x614   :  { %6871 = vst [vmem:[%s13424_s7 + $0xf8] sm:$0xff] %v6763_v4  ;;  %v6768_v35 = vadd.f32 %v9534_v15, %v6489_v40 }
 0x615   :  { %6928 = vst [vmem:[%s13424_s7 + $0x2c0] sm:$0xff] %v6820_v14  ;;  %v9555_v14 = vld [vmem:[%s13419_s0 + $0x170] sm:$0xff] }
 0x616   :  { %6876 = vst [vmem:[%s13424_s7 + $0x120] sm:$0xff] %v6768_v35 }
 0x619   :  { %v6421_v16 = vpop.f32.mrf.mxu2 }
 0x61a   :  { %v6817_v8 = vadd.f32 %v9535_v20, %v6421_v16  ;;  %v9556_v16 = vld [vmem:[%s13419_s0 + $0x308] sm:$0xff] }
 0x61b   :  { %v6491_v17 = vpop.f32.mrf.mxu3 }
 0x61c   :  { %6925 = vst [vmem:[%s13424_s7 + $0x2a8] sm:$0xff] %v6817_v8  ;;  %v6822_v1 = vadd.f32 %v9536_v11, %v6491_v17  ;;  %v9557_v17 = vld [vmem:[%s13419_s0 + $0x318] sm:$0xff] }
 0x61e   :  { %6930 = vst [vmem:[%s13424_s7 + $0x2d0] sm:$0xff] %v6822_v1 }
 0x61f   :  { %v6503_v5 = vpop.f32.mrf.mxu0 }
 0x620   :  { %v6769_v24 = vadd.f32 %v9537_v23, %v6503_v5  ;;  %v9558_v23 = vld [vmem:[%s13419_s0 + $0x320] sm:$0xff] }
 0x621   :  { %v6475_v25 = vpop.f32.mrf.mxu2 }
 0x622   :  { %v6767_v49 = vadd.f32 %v9538_v26, %v6475_v25  ;;  %6877 = vst [vmem:[%s13424_s7 + $0x128] sm:$0xff] %v6769_v24  ;;  %v9559_v25 = vld [vmem:[%s13419_s0 + $0x180] sm:$0xff] }
 0x623   :  { %v6517_v29 = vpop.f32.mrf.mxu1 }
 0x624   :  { %v6770_v18 = vadd.f32 %v9539_v53, %v6517_v29  ;;  %6875 = vst [vmem:[%s13424_s7 + $0x118] sm:$0xff] %v6767_v49  ;;  %v9560_v29 = vld [vmem:[%s13419_s0 + $0x330] sm:$0xff] }
 0x626   :  { %6878 = vst [vmem:[%s13424_s7 + $0x130] sm:$0xff] %v6770_v18 }
 0x627   :  { %v6505_v60 = vpop.f32.mrf.mxu0 }
 0x628   :  { %v6823_v41 = vadd.f32 %v9540_v57, %v6505_v60  ;;  %v9561_v60 = vld [vmem:[%s13419_s0 + $0x178] sm:$0xff] }
 0x629   :  { %v6477_v44 = vpop.f32.mrf.mxu2 }
 0x62a   :  { %v6821_v31 = vadd.f32 %v9541_v38, %v6477_v44  ;;  %6931 = vst [vmem:[%s13424_s7 + $0x2d8] sm:$0xff] %v6823_v41  ;;  %v9562_v44 = vld [vmem:[%s13419_s0 + $0x188] sm:$0xff] }
 0x62b   :  { %v6519_v6 = vpop.f32.mrf.mxu1 }
 0x62c   :  { %v6824_v28 = vadd.f32 %v9542_v48, %v6519_v6  ;;  %6929 = vst [vmem:[%s13424_s7 + $0x2c8] sm:$0xff] %v6821_v31  ;;  %v9563_v6 = vld [vmem:[%s13419_s0 + $0x190] sm:$0xff] }
 0x62d   :  { %v6545_v32 = vpop.f32.mrf.mxu3 }
 0x62e   :  { %v6772_v22 = vadd.f32 %v9543_v19, %v6545_v32  ;;  %6932 = vst [vmem:[%s13424_s7 + $0x2e0] sm:$0xff] %v6824_v28  ;;  %v9564_v28 = vld [vmem:[%s13419_s0 + $0x328] sm:$0xff] }
 0x630   :  { %6880 = vst [vmem:[%s13424_s7 + $0x140] sm:$0xff] %v6772_v22 }
 0x635   :  { %v6547_v10 = vpop.f32.mrf.mxu3 }
 0x636   :  { %v6826_v43 = vadd.f32 %v9544_v33, %v6547_v10  ;;  %v6531_v27 = vpop.f32.mrf.mxu2  ;;  %v9565_v10 = vld [vmem:[%s13419_s0 + $0x338] sm:$0xff] }
 0x637   :  { %v6771_v51 = vadd.f32 %v9545_v45, %v6531_v27  ;;  %v9566_v45 = vld [vmem:[%s13419_s0 + $0x340] sm:$0xff] }
 0x638   :  { %6934 = vst [vmem:[%s13424_s7 + $0x2f0] sm:$0xff] %v6826_v43 }
 0x639   :  { %v6559_v46 = vpop.f32.mrf.mxu0  ;;  %6879 = vst [vmem:[%s13424_s7 + $0x138] sm:$0xff] %v6771_v51 }
 0x63a   :  { %v6773_v42 = vadd.f32 %v9546_v47, %v6559_v46  ;;  %v9567_v46 = vld [vmem:[%s13419_s0 + $0x1a0] sm:$0xff] }
 0x63c   :  { %6881 = vst [vmem:[%s13424_s7 + $0x148] sm:$0xff] %v6773_v42 }
 0x63d   :  { %v6573_v0 = vpop.f32.mrf.mxu1 }
 0x63e   :  { %v6774_v34 = vadd.f32 %v9547_v50, %v6573_v0  ;;  %v6533_v52 = vpop.f32.mrf.mxu2  ;;  %v9568_v0 = vld [vmem:[%s13419_s0 + $0x1a8] sm:$0xff] }
 0x63f   :  { %v6825_v58 = vadd.f32 %v9548_v37, %v6533_v52  ;;  %v9569_v52 = vld [vmem:[%s13419_s0 + $0x350] sm:$0xff] }
 0x640   :  { %6882 = vst [vmem:[%s13424_s7 + $0x150] sm:$0xff] %v6774_v34 }
 0x641   :  { %v6561_v39 = vpop.f32.mrf.mxu0  ;;  %6933 = vst [vmem:[%s13424_s7 + $0x2e8] sm:$0xff] %v6825_v58 }
 0x642   :  { %v6827_v54 = vadd.f32 %v9549_v59, %v6561_v39  ;;  %v9570_v39 = vld [vmem:[%s13419_s0 + $0x198] sm:$0xff] }
 0x644   :  { %6935 = vst [vmem:[%s13424_s7 + $0x2f8] sm:$0xff] %v6827_v54 }
 0x645   :  { %v6575_v2 = vpop.f32.mrf.mxu1 }
 0x646   :  { %v6828_v30 = vadd.f32 %v9550_v36, %v6575_v2  ;;  %v9571_v2 = vld [vmem:[%s13419_s0 + $0x358] sm:$0xff] }
 0x647   :  { %v6601_v55 = vpop.f32.mrf.mxu3 }
 0x648   :  { %v6776_v61 = vadd.f32 %v9551_v56, %v6601_v55  ;;  %6936 = vst [vmem:[%s13424_s7 + $0x300] sm:$0xff] %v6828_v30  ;;  %v9572_v30 = vld [vmem:[%s13419_s0 + $0x348] sm:$0xff] }
 0x64a   :  { %6884 = vst [vmem:[%s13424_s7 + $0x160] sm:$0xff] %v6776_v61 }
 0x64f   :  { %v6603_v62 = vpop.f32.mrf.mxu3 }
 0x650   :  { %v6830_v3 = vadd.f32 %v9552_v63, %v6603_v62  ;;  %v6587_v4 = vpop.f32.mrf.mxu2 }
 0x651   :  { %v6775_v9 = vadd.f32 %v9553_v7, %v6587_v4 }
 0x652   :  { %6938 = vst [vmem:[%s13424_s7 + $0x310] sm:$0xff] %v6830_v3 }
 0x653   :  { %v6615_v21 = vpop.f32.mrf.mxu0  ;;  %6883 = vst [vmem:[%s13424_s7 + $0x158] sm:$0xff] %v6775_v9 }
 0x654   :  { %v6777_v40 = vadd.f32 %v9554_v12, %v6615_v21 }
 0x656   :  { %6885 = vst [vmem:[%s13424_s7 + $0x168] sm:$0xff] %v6777_v40 }
 0x657   :  { %v6629_v13 = vpop.f32.mrf.mxu1 }
 0x658   :  { %v6778_v15 = vadd.f32 %v9555_v14, %v6629_v13  ;;  %v6589_v35 = vpop.f32.mrf.mxu2 }
 0x659   :  { %v6829_v20 = vadd.f32 %v9556_v16, %v6589_v35 }
 0x65a   :  { %6886 = vst [vmem:[%s13424_s7 + $0x170] sm:$0xff] %v6778_v15 }
 0x65b   :  { %v6617_v8 = vpop.f32.mrf.mxu0  ;;  %6937 = vst [vmem:[%s13424_s7 + $0x308] sm:$0xff] %v6829_v20 }
 0x65c   :  { %v6831_v11 = vadd.f32 %v9557_v17, %v6617_v8 }
 0x65e   :  { %6939 = vst [vmem:[%s13424_s7 + $0x318] sm:$0xff] %v6831_v11 }
 0x65f   :  { %v6631_v1 = vpop.f32.mrf.mxu1 }
 0x660   :  { %v6832_v24 = vadd.f32 %v9558_v23, %v6631_v1 }
 0x661   :  { %v6657_v5 = vpop.f32.mrf.mxu3 }
 0x662   :  { %v6780_v26 = vadd.f32 %v9559_v25, %v6657_v5  ;;  %6940 = vst [vmem:[%s13424_s7 + $0x320] sm:$0xff] %v6832_v24 }
 0x664   :  { %6888 = vst [vmem:[%s13424_s7 + $0x180] sm:$0xff] %v6780_v26 }
 0x669   :  { %v6659_v49 = vpop.f32.mrf.mxu3 }
 0x66a   :  { %v6834_v53 = vadd.f32 %v9560_v29, %v6659_v49  ;;  %v6643_v18 = vpop.f32.mrf.mxu2 }
 0x66b   :  { %v6779_v57 = vadd.f32 %v9561_v60, %v6643_v18 }
 0x66c   :  { %6942 = vst [vmem:[%s13424_s7 + $0x330] sm:$0xff] %v6834_v53 }
 0x66d   :  { %v6671_v41 = vpop.f32.mrf.mxu0  ;;  %6887 = vst [vmem:[%s13424_s7 + $0x178] sm:$0xff] %v6779_v57 }
 0x66e   :  { %v6781_v38 = vadd.f32 %v9562_v44, %v6671_v41 }
 0x670   :  { %6889 = vst [vmem:[%s13424_s7 + $0x188] sm:$0xff] %v6781_v38 }
 0x671   :  { %v6685_v31 = vpop.f32.mrf.mxu1 }
 0x672   :  { %v6782_v32 = vadd.f32 %v9563_v6, %v6685_v31  ;;  %v6645_v48 = vpop.f32.mrf.mxu2 }
 0x673   :  { %v6833_v19 = vadd.f32 %v9564_v28, %v6645_v48 }
 0x674   :  { %6890 = vst [vmem:[%s13424_s7 + $0x190] sm:$0xff] %v6782_v32 }
 0x675   :  { %v6673_v22 = vpop.f32.mrf.mxu0  ;;  %6941 = vst [vmem:[%s13424_s7 + $0x328] sm:$0xff] %v6833_v19 }
 0x676   :  { %v6835_v33 = vadd.f32 %v9565_v10, %v6673_v22 }
 0x678   :  { %6943 = vst [vmem:[%s13424_s7 + $0x338] sm:$0xff] %v6835_v33 }
 0x679   :  { %v6687_v43 = vpop.f32.mrf.mxu1 }
 0x67a   :  { %v6836_v51 = vadd.f32 %v9566_v45, %v6687_v43 }
 0x67b   :  { %v6713_v27 = vpop.f32.mrf.mxu3 }
 0x67c   :  { %v6784_v47 = vadd.f32 %v9567_v46, %v6713_v27  ;;  %6944 = vst [vmem:[%s13424_s7 + $0x340] sm:$0xff] %v6836_v51 }
 0x67e   :  { %6892 = vst [vmem:[%s13424_s7 + $0x1a0] sm:$0xff] %v6784_v47 }
 0x681   :  { %v6727_v42 = vpop.f32.mrf.mxu0 }
 0x682   :  { %v6785_v50 = vadd.f32 %v9568_v0, %v6727_v42 }
 0x683   :  { %v6715_v34 = vpop.f32.mrf.mxu3 }
 0x684   :  { %v6838_v37 = vadd.f32 %v9569_v52, %v6715_v34  ;;  %6893 = vst [vmem:[%s13424_s7 + $0x1a8] sm:$0xff] %v6785_v50  ;;  %v6699_v58 = vpop.f32.mrf.mxu2 }
 0x685   :  { %v6783_v59 = vadd.f32 %v9570_v39, %v6699_v58 }
 0x686   :  { %6946 = vst [vmem:[%s13424_s7 + $0x350] sm:$0xff] %v6838_v37 }
 0x687   :  { %6891 = vst [vmem:[%s13424_s7 + $0x198] sm:$0xff] %v6783_v59 }
 0x689   :  { %v6729_v54 = vpop.f32.mrf.mxu0 }
 0x68a   :  { %v6839_v55 = vadd.f32 %v9571_v2, %v6729_v54 }
 0x68c   :  { %6947 = vst [vmem:[%s13424_s7 + $0x358] sm:$0xff] %v6839_v55  ;;  %v6701_v36 = vpop.f32.mrf.mxu2 }
 0x68d   :  { %v6837_v56 = vadd.f32 %v9572_v30, %v6701_v36 }
 0x68f   :  { %6945 = vst [vmem:[%s13424_s7 + $0x348] sm:$0xff] %v6837_v56 }

</bundles_post_ra>
